<compile_context>
chip_gen: v7x
topology: tpu7x:2x2x1
jax: 0.10.0
libtpu: 0.0.40
codegen_flags: <defaults>
</compile_context>

<pallas_src>
import functools
import numpy as np
import jax
import jax.numpy as jnp
from jax import lax
from jax.experimental import pallas as pl
from jax.experimental.pallas import tpu as pltpu


def _dft_stack(n):
    """Stack [Fr, Fi, Fr+Fi, Fr-Fi] of the orthonormal 1-D DFT, shape (4, n, n) f32."""
    k = np.arange(n)
    f = np.exp(-2j * np.pi * np.outer(k, k) / n) / np.sqrt(n)
    fr = f.real.astype(np.float32)
    fi = f.imag.astype(np.float32)
    return np.stack([fr, fi, fr + fi, fr - fi], axis=0)


def _dc_cg_kernel(lam_ref, zk_ref, x0_ref, csr_ref, csi_ref, mskT_ref,
                  fw_ref, fh_ref, out_ref, *, n_iter=10, mm_dtype=jnp.float32):
    lam = lam_ref[0]
    B, C, H, W = csr_ref.shape
    M = B * C

    csr = csr_ref[...]                      # (B, C, H, W)
    csi = csi_ref[...]
    mskT = mskT_ref[...]                    # (M*W, H): mask^T, pre-broadcast over coils

    # DFT factor matrices — cast once to the MXU input dtype (no-op for f32),
    # hoisted out of the CG loop.
    fwr, fwi = fw_ref[0].astype(mm_dtype), fw_ref[1].astype(mm_dtype)   # (W, W)
    fws, fwd = fw_ref[2].astype(mm_dtype), fw_ref[3].astype(mm_dtype)
    fhr, fhi = fh_ref[0].astype(mm_dtype), fh_ref[1].astype(mm_dtype)   # (H, H)
    fhs, fhd = fh_ref[2].astype(mm_dtype), fh_ref[3].astype(mm_dtype)

    # rhs = x0 + lam * z_k  (r2c: channel 0 = real, channel 1 = imag)
    rhs_r = x0_ref[0] + lam * zk_ref[0]     # (B, H, W)
    rhs_i = x0_ref[1] + lam * zk_ref[1]

    def mm(a, b):
        # Cast the activation only at the MXU boundary; accumulate in f32.
        return jnp.dot(a.astype(mm_dtype), b, preferred_element_type=jnp.float32)

    def cmm(ar, ai, br, bi, bs, conj_b=False):
        # 3-matmul (Karatsuba) complex product A @ B (or A @ conj(B)).
        # bs must be br+bi for the plain product and br-bi for the conjugated one.
        t1 = mm(ar, br)
        t2 = mm(ai, bi)
        t3 = mm(ar + ai, bs)
        if conj_b:
            return t1 + t2, t3 - t1 + t2
        return t1 - t2, t3 - t1 - t2

    def swap_hw(x, d0, d1):
        # (M*d0, d1) -> (M*d1, d0): swap the two spatial axes of every image.
        return jnp.swapaxes(x.reshape(M, d0, d1), 1, 2).reshape(M * d1, d0)

    def AtA(pr, pi):
        # Coil expansion (VPU, f32): csm * p, batch+coil folded into matmul rows.
        cr = (csr * pr[:, None] - csi * pi[:, None]).reshape(M * H, W)
        ci = (csr * pi[:, None] + csi * pr[:, None]).reshape(M * H, W)
        # FFT2 (ortho, separable): right-mul F_W, minor transpose, right-mul F_H.
        kr, ki = cmm(cr, ci, fwr, fwi, fws)                 # (M*H, W)
        kr, ki = swap_hw(kr, H, W), swap_hw(ki, H, W)       # (M*W, H)  == K^T layout
        kr, ki = cmm(kr, ki, fhr, fhi, fhs)
        # k-space mask (pre-transposed, pre-broadcast over coils).
        kr = kr * mskT
        ki = ki * mskT
        # IFFT2 (ortho): right-mul conj(F_H), transpose back, right-mul conj(F_W).
        ir, ii = cmm(kr, ki, fhr, fhi, fhd, conj_b=True)    # (M*W, H)
        ir, ii = swap_hw(ir, W, H), swap_hw(ii, W, H)       # (M*H, W)
        ir, ii = cmm(ir, ii, fwr, fwi, fwd, conj_b=True)
        ir = ir.reshape(B, C, H, W)
        ii = ii.reshape(B, C, H, W)
        # Adjoint coil combine: sum_c conj(csm) * im, plus Tikhonov term.
        ur = jnp.sum(csr * ir + csi * ii, axis=1)           # (B, H, W)
        ui = jnp.sum(csr * ii - csi * ir, axis=1)
        return ur + lam * pr, ui + lam * pi

    xr0 = jnp.zeros_like(rhs_r)
    xi0 = jnp.zeros_like(rhs_i)
    rTr0 = jnp.sum(rhs_r * rhs_r + rhs_i * rhs_i)           # global over whole batch

    def body(_, carry):
        xr, xi, rr_, ri_, pr, pi, rTr = carry
        active = rTr > 1e-10                                # mimics the `while` early-stop
        Apr, Api = AtA(pr, pi)
        pAp = jnp.sum(pr * Apr + pi * Api)                  # Re(sum conj(p)*Ap), global
        denom = jnp.where(pAp == 0.0, 1.0, pAp)
        alpha = jnp.where(active, rTr / denom, 0.0)
        xr = xr + alpha * pr
        xi = xi + alpha * pi
        rr_n = rr_ - alpha * Apr
        ri_n = ri_ - alpha * Api
        rTrNew = jnp.sum(rr_n * rr_n + ri_n * ri_n)
        beta = jnp.where(active, rTrNew / rTr, 0.0)
        pr_n = jnp.where(active, rr_n + beta * pr, pr)
        pi_n = jnp.where(active, ri_n + beta * pi, pi)
        rTr_n = jnp.where(active, rTrNew, rTr)
        return (xr, xi, rr_n, ri_n, pr_n, pi_n, rTr_n)

    carry = (xr0, xi0, rhs_r, rhs_i, rhs_r, rhs_i, rTr0)
    xr, xi, *_ = lax.fori_loop(0, n_iter, body, carry)

    out_ref[0] = xr
    out_ref[1] = xi


def data_consistency_pallas(z_k, x0, csm, mask, lam, *, n_iter=10,
                            mm_dtype=jnp.float32):
    """z_k, x0: (B,2,H,W) f32; csm: (B,C,H,W) c64; mask: (B,H,W) f32; lam: scalar."""
    B, two, H, W = z_k.shape
    assert two == 2
    C = csm.shape[1]
    # Sublane-aligned spatial dims keep the in-kernel reshapes/transposes layout-exact.
    assert H % 8 == 0 and W % 8 == 0, "H and W must be multiples of 8"

    fw = jnp.asarray(_dft_stack(W))                 # (4, W, W)
    fh = jnp.asarray(_dft_stack(H))                 # (4, H, H)

    zk_t = jnp.transpose(z_k, (1, 0, 2, 3))         # (2, B, H, W)
    x0_t = jnp.transpose(x0, (1, 0, 2, 3))
    csr = jnp.real(csm).astype(jnp.float32)         # (B, C, H, W)
    csi = jnp.imag(csm).astype(jnp.float32)
    # Mask in the transposed (v, u) k-space layout, broadcast over coils on the XLA side
    # so the kernel body only does a 2-D elementwise multiply inside the CG loop.
    mskT = jnp.broadcast_to(
        jnp.swapaxes(mask.astype(jnp.float32), 1, 2)[:, None], (B, C, W, H)
    ).reshape(B * C * W, H)
    lam_arr = jnp.reshape(jnp.asarray(lam, jnp.float32), (1,))

    # VMEM budget: everything is resident (no grid). Account for lane/sublane padding
    # plus the live coil-sized intermediates inside AtA, with generous headroom.
    def padded_bytes(shape):
        s = list(shape)
        s[-1] = -(-s[-1] // 128) * 128
        if len(s) >= 2:
            s[-2] = -(-s[-2] // 8) * 8
        return int(np.prod(s)) * 4

    resident = sum(padded_bytes(a.shape) for a in
                   (zk_t, x0_t, csr, csi, mskT, fw, fh)) + padded_bytes((2, B, H, W))
    work = 10 * padded_bytes((B * C * H, W))        # live coil-stack temporaries in AtA
    # Cap below the smallest physical VMEM (64 MiB on v7x) minus headroom.
    vmem_limit = int(min(56 * 1024 * 1024,
                         max(32 * 1024 * 1024, 2 * (resident + work))))

    vm = pltpu.MemorySpace.VMEM
    kernel = functools.partial(_dc_cg_kernel, n_iter=n_iter, mm_dtype=mm_dtype)
    out = pl.pallas_call(
        kernel,
        out_shape=jax.ShapeDtypeStruct((2, B, H, W), jnp.float32),
        in_specs=[
            pl.BlockSpec(memory_space=pltpu.MemorySpace.SMEM),  # lam (scalar)
            pl.BlockSpec(memory_space=vm),                      # z_k   (2,B,H,W)
            pl.BlockSpec(memory_space=vm),                      # x0    (2,B,H,W)
            pl.BlockSpec(memory_space=vm),                      # csm real
            pl.BlockSpec(memory_space=vm),                      # csm imag
            pl.BlockSpec(memory_space=vm),                      # mask^T (B*C*W, H)
            pl.BlockSpec(memory_space=vm),                      # F_W stack (4,W,W)
            pl.BlockSpec(memory_space=vm),                      # F_H stack (4,H,H)
        ],
        out_specs=pl.BlockSpec(memory_space=vm),
        compiler_params=pltpu.CompilerParams(vmem_limit_bytes=vmem_limit),
    )(lam_arr, zk_t, x0_t, csr, csi, mskT, fw, fh)

    return jnp.transpose(out, (1, 0, 2, 3))


def data_consistency_ref_np(z_k, x0, csm, mask, lam):
    """Pure-numpy (f64) reference mirroring the PyTorch module (host-side, no TPU FFT)."""
    z_k = np.asarray(z_k, np.float64)
    x0 = np.asarray(x0, np.float64)
    csm = np.asarray(csm, np.complex128)
    mask = np.asarray(mask, np.float64)
    lam = float(lam)

    zc = z_k[:, 0] + 1j * z_k[:, 1]
    xc = x0[:, 0] + 1j * x0[:, 1]
    rhs = xc + lam * zc
    m = mask[:, None]

    def AtA(p):
        coil = csm * p[:, None]
        k = np.fft.fft2(coil, norm="ortho") * m
        im = np.fft.ifft2(k, norm="ortho")
        adj = np.sum(np.conj(csm) * im, axis=1)
        return adj + lam * p

    x = np.zeros_like(rhs)
    r = rhs
    p = rhs
    rTr = np.sum(np.conj(r) * r).real
    i = 0
    while i < 10 and rTr > 1e-10:
        Ap = AtA(p)
        alpha = rTr / np.sum(np.conj(p) * Ap).real
        x = x + alpha * p
        r = r - alpha * Ap
        rTrNew = np.sum(np.conj(r) * r).real
        beta = rTrNew / rTr
        p = r + beta * p
        i += 1
        rTr = rTrNew
    return np.stack([x.real, x.imag], axis=1)


if __name__ == "__main__":
    B, C, H, W = 2, 4, 16, 16
    key = jax.random.PRNGKey(0)
    k1, k2, k3, k4, k5 = jax.random.split(key, 5)

    z_k = jax.random.normal(k1, (B, 2, H, W), jnp.float32)
    x0 = jax.random.normal(k2, (B, 2, H, W), jnp.float32)
    csm = ((jax.random.normal(k3, (B, C, H, W), jnp.float32)
            + 1j * jax.random.normal(k4, (B, C, H, W), jnp.float32))
           / jnp.sqrt(float(C))).astype(jnp.complex64)
    mask = (jax.random.uniform(k5, (B, H, W)) > 0.4).astype(jnp.float32)
    lam = jnp.float32(0.05)   # nn.Parameter(torch.tensor(0.05)) initial value

    rec = data_consistency_pallas(z_k, x0, csm, mask, lam)
    rec = jax.block_until_ready(rec)

    ref = data_consistency_ref_np(np.asarray(z_k), np.asarray(x0),
                                  np.asarray(csm), np.asarray(mask), 0.05)
    np.testing.assert_allclose(np.asarray(rec), ref, rtol=1e-2, atol=1e-2)

    print("KERNEL_OK")
</pallas_src>

<mosaic_0001>
module attributes {stable_mosaic.version = 11 : i64} {
  func.func @_dc_cg_kernel(%arg0: memref<1xf32, #tpu.memory_space<smem>>, %arg1: memref<2x2x16x16xf32, #tpu.memory_space<vmem>>, %arg2: memref<2x2x16x16xf32, #tpu.memory_space<vmem>>, %arg3: memref<2x4x16x16xf32, #tpu.memory_space<vmem>>, %arg4: memref<2x4x16x16xf32, #tpu.memory_space<vmem>>, %arg5: memref<128x16xf32, #tpu.memory_space<vmem>>, %arg6: memref<4x16x16xf32, #tpu.memory_space<vmem>>, %arg7: memref<4x16x16xf32, #tpu.memory_space<vmem>>, %arg8: memref<2x2x16x16xf32, #tpu.memory_space<vmem>>) attributes {dimension_semantics = [], scalar_prefetch = 0 : i64, scratch_operands = 0 : i64, tpu.core_type = #tpu.core_type<tc>} {
    %c0 = arith.constant 0 : index
    %0 = memref.load %arg0[%c0] : memref<1xf32, #tpu.memory_space<smem>>
    %c0_0 = arith.constant 0 : index
    %c0_1 = arith.constant 0 : index
    %c0_2 = arith.constant 0 : index
    %c0_3 = arith.constant 0 : index
    %1 = vector.load %arg3[%c0_0, %c0_1, %c0_2, %c0_3] : memref<2x4x16x16xf32, #tpu.memory_space<vmem>>, vector<2x4x16x16xf32>
    %c0_4 = arith.constant 0 : index
    %c0_5 = arith.constant 0 : index
    %c0_6 = arith.constant 0 : index
    %c0_7 = arith.constant 0 : index
    %2 = vector.load %arg4[%c0_4, %c0_5, %c0_6, %c0_7] : memref<2x4x16x16xf32, #tpu.memory_space<vmem>>, vector<2x4x16x16xf32>
    %c0_8 = arith.constant 0 : index
    %c0_9 = arith.constant 0 : index
    %3 = vector.load %arg5[%c0_8, %c0_9] : memref<128x16xf32, #tpu.memory_space<vmem>>, vector<128x16xf32>
    %c0_10 = arith.constant 0 : index
    %c0_11 = arith.constant 0 : index
    %c0_12 = arith.constant 0 : index
    %4 = vector.load %arg6[%c0_10, %c0_11, %c0_12] : memref<4x16x16xf32, #tpu.memory_space<vmem>>, vector<1x16x16xf32>
    %5 = vector.shape_cast %4 : vector<1x16x16xf32> to vector<16x16xf32>
    %c1 = arith.constant 1 : index
    %c0_13 = arith.constant 0 : index
    %c0_14 = arith.constant 0 : index
    %6 = vector.load %arg6[%c1, %c0_13, %c0_14] : memref<4x16x16xf32, #tpu.memory_space<vmem>>, vector<1x16x16xf32>
    %7 = vector.shape_cast %6 : vector<1x16x16xf32> to vector<16x16xf32>
    %c2 = arith.constant 2 : index
    %c0_15 = arith.constant 0 : index
    %c0_16 = arith.constant 0 : index
    %8 = vector.load %arg6[%c2, %c0_15, %c0_16] : memref<4x16x16xf32, #tpu.memory_space<vmem>>, vector<1x16x16xf32>
    %9 = vector.shape_cast %8 : vector<1x16x16xf32> to vector<16x16xf32>
    %c3 = arith.constant 3 : index
    %c0_17 = arith.constant 0 : index
    %c0_18 = arith.constant 0 : index
    %10 = vector.load %arg6[%c3, %c0_17, %c0_18] : memref<4x16x16xf32, #tpu.memory_space<vmem>>, vector<1x16x16xf32>
    %11 = vector.shape_cast %10 : vector<1x16x16xf32> to vector<16x16xf32>
    %c0_19 = arith.constant 0 : index
    %c0_20 = arith.constant 0 : index
    %c0_21 = arith.constant 0 : index
    %12 = vector.load %arg7[%c0_19, %c0_20, %c0_21] : memref<4x16x16xf32, #tpu.memory_space<vmem>>, vector<1x16x16xf32>
    %13 = vector.shape_cast %12 : vector<1x16x16xf32> to vector<16x16xf32>
    %c1_22 = arith.constant 1 : index
    %c0_23 = arith.constant 0 : index
    %c0_24 = arith.constant 0 : index
    %14 = vector.load %arg7[%c1_22, %c0_23, %c0_24] : memref<4x16x16xf32, #tpu.memory_space<vmem>>, vector<1x16x16xf32>
    %15 = vector.shape_cast %14 : vector<1x16x16xf32> to vector<16x16xf32>
    %c2_25 = arith.constant 2 : index
    %c0_26 = arith.constant 0 : index
    %c0_27 = arith.constant 0 : index
    %16 = vector.load %arg7[%c2_25, %c0_26, %c0_27] : memref<4x16x16xf32, #tpu.memory_space<vmem>>, vector<1x16x16xf32>
    %17 = vector.shape_cast %16 : vector<1x16x16xf32> to vector<16x16xf32>
    %c3_28 = arith.constant 3 : index
    %c0_29 = arith.constant 0 : index
    %c0_30 = arith.constant 0 : index
    %18 = vector.load %arg7[%c3_28, %c0_29, %c0_30] : memref<4x16x16xf32, #tpu.memory_space<vmem>>, vector<1x16x16xf32>
    %19 = vector.shape_cast %18 : vector<1x16x16xf32> to vector<16x16xf32>
    %c0_31 = arith.constant 0 : index
    %c0_32 = arith.constant 0 : index
    %c0_33 = arith.constant 0 : index
    %c0_34 = arith.constant 0 : index
    %20 = vector.load %arg2[%c0_31, %c0_32, %c0_33, %c0_34] : memref<2x2x16x16xf32, #tpu.memory_space<vmem>>, vector<1x2x16x16xf32>
    %21 = vector.shape_cast %20 : vector<1x2x16x16xf32> to vector<2x16x16xf32>
    %c0_35 = arith.constant 0 : index
    %c0_36 = arith.constant 0 : index
    %c0_37 = arith.constant 0 : index
    %c0_38 = arith.constant 0 : index
    %22 = vector.load %arg1[%c0_35, %c0_36, %c0_37, %c0_38] : memref<2x2x16x16xf32, #tpu.memory_space<vmem>>, vector<1x2x16x16xf32>
    %23 = vector.shape_cast %22 : vector<1x2x16x16xf32> to vector<2x16x16xf32>
    %24 = vector.broadcast %0 : f32 to vector<2x16x16xf32>
    %25 = arith.mulf %24, %23 : vector<2x16x16xf32>
    %26 = arith.addf %21, %25 : vector<2x16x16xf32>
    %c1_39 = arith.constant 1 : index
    %c0_40 = arith.constant 0 : index
    %c0_41 = arith.constant 0 : index
    %c0_42 = arith.constant 0 : index
    %27 = vector.load %arg2[%c1_39, %c0_40, %c0_41, %c0_42] : memref<2x2x16x16xf32, #tpu.memory_space<vmem>>, vector<1x2x16x16xf32>
    %28 = vector.shape_cast %27 : vector<1x2x16x16xf32> to vector<2x16x16xf32>
    %c1_43 = arith.constant 1 : index
    %c0_44 = arith.constant 0 : index
    %c0_45 = arith.constant 0 : index
    %c0_46 = arith.constant 0 : index
    %29 = vector.load %arg1[%c1_43, %c0_44, %c0_45, %c0_46] : memref<2x2x16x16xf32, #tpu.memory_space<vmem>>, vector<1x2x16x16xf32>
    %30 = vector.shape_cast %29 : vector<1x2x16x16xf32> to vector<2x16x16xf32>
    %31 = vector.broadcast %0 : f32 to vector<2x16x16xf32>
    %32 = arith.mulf %31, %30 : vector<2x16x16xf32>
    %33 = arith.addf %28, %32 : vector<2x16x16xf32>
    %cst = arith.constant 0.000000e+00 : f32
    %34 = vector.broadcast %cst : f32 to vector<2x16x16xf32>
    %cst_47 = arith.constant 0.000000e+00 : f32
    %35 = vector.broadcast %cst_47 : f32 to vector<2x16x16xf32>
    %36 = arith.mulf %26, %26 : vector<2x16x16xf32>
    %37 = arith.mulf %33, %33 : vector<2x16x16xf32>
    %38 = arith.addf %36, %37 : vector<2x16x16xf32>
    %39 = vector.shape_cast %38 : vector<2x16x16xf32> to vector<1x2x16x16xf32>
    %cst_48 = arith.constant dense<0.000000e+00> : vector<1xf32>
    %40 = vector.multi_reduction <add>, %39, %cst_48 [1, 2, 3] : vector<1x2x16x16xf32> to vector<1xf32>
    %41 = vector.shape_cast %40 : vector<1xf32> to vector<1x1x1x1xf32>
    %42 = vector.extract %41[0, 0, 0, 0] : f32 from vector<1x1x1x1xf32>
    %c0_i32 = arith.constant 0 : i32
    %c10_i32 = arith.constant 10 : i32
    %43 = arith.addi %c0_i32, %c10_i32 : i32
    %c1_i32 = arith.constant 1 : i32
    %44:7 = scf.for %arg9 = %c0_i32 to %43 step %c1_i32 iter_args(%arg10 = %34, %arg11 = %35, %arg12 = %26, %arg13 = %33, %arg14 = %26, %arg15 = %33, %arg16 = %42) -> (vector<2x16x16xf32>, vector<2x16x16xf32>, vector<2x16x16xf32>, vector<2x16x16xf32>, vector<2x16x16xf32>, vector<2x16x16xf32>, f32)  : i32 {
      %cst_57 = arith.constant 1.000000e-10 : f32
      %51 = arith.cmpf ogt, %arg16, %cst_57 : f32
      %52 = vector.shape_cast %arg14 : vector<2x16x16xf32> to vector<2x1x16x16xf32>
      %53 = vector.broadcast %52 : vector<2x1x16x16xf32> to vector<2x4x16x16xf32>
      %54 = arith.mulf %1, %53 : vector<2x4x16x16xf32>
      %55 = vector.shape_cast %arg15 : vector<2x16x16xf32> to vector<2x1x16x16xf32>
      %56 = vector.broadcast %55 : vector<2x1x16x16xf32> to vector<2x4x16x16xf32>
      %57 = arith.mulf %2, %56 : vector<2x4x16x16xf32>
      %58 = arith.subf %54, %57 : vector<2x4x16x16xf32>
      %59 = vector.shape_cast %58 : vector<2x4x16x16xf32> to vector<128x16xf32>
      %60 = vector.shape_cast %arg15 : vector<2x16x16xf32> to vector<2x1x16x16xf32>
      %61 = vector.broadcast %60 : vector<2x1x16x16xf32> to vector<2x4x16x16xf32>
      %62 = arith.mulf %1, %61 : vector<2x4x16x16xf32>
      %63 = vector.shape_cast %arg14 : vector<2x16x16xf32> to vector<2x1x16x16xf32>
      %64 = vector.broadcast %63 : vector<2x1x16x16xf32> to vector<2x4x16x16xf32>
      %65 = arith.mulf %2, %64 : vector<2x4x16x16xf32>
      %66 = arith.addf %62, %65 : vector<2x4x16x16xf32>
      %67 = vector.shape_cast %66 : vector<2x4x16x16xf32> to vector<128x16xf32>
      %cst_58 = arith.constant dense<0.000000e+00> : vector<128x16xf32>
      %68 = tpu.matmul %59, %5, %cst_58 {dimension_numbers = #tpu.dot_dimension_numbers<[1], [0], [0], [1], [0, 0, 1, 1], [], []>} : vector<128x16xf32>, vector<16x16xf32>, vector<128x16xf32> -> vector<128x16xf32>
      %cst_59 = arith.constant dense<0.000000e+00> : vector<128x16xf32>
      %69 = tpu.matmul %67, %7, %cst_59 {dimension_numbers = #tpu.dot_dimension_numbers<[1], [0], [0], [1], [0, 0, 1, 1], [], []>} : vector<128x16xf32>, vector<16x16xf32>, vector<128x16xf32> -> vector<128x16xf32>
      %70 = arith.addf %59, %67 : vector<128x16xf32>
      %cst_60 = arith.constant dense<0.000000e+00> : vector<128x16xf32>
      %71 = tpu.matmul %70, %9, %cst_60 {dimension_numbers = #tpu.dot_dimension_numbers<[1], [0], [0], [1], [0, 0, 1, 1], [], []>} : vector<128x16xf32>, vector<16x16xf32>, vector<128x16xf32> -> vector<128x16xf32>
      %72 = arith.subf %68, %69 : vector<128x16xf32>
      %73 = arith.subf %71, %68 : vector<128x16xf32>
      %74 = arith.subf %73, %69 : vector<128x16xf32>
      %75 = vector.shape_cast %72 : vector<128x16xf32> to vector<8x16x16xf32>
      %76 = tpu.transpose %75, [0, 2, 1] : vector<8x16x16xf32> -> vector<8x16x16xf32>
      %77 = vector.shape_cast %76 : vector<8x16x16xf32> to vector<128x16xf32>
      %78 = vector.shape_cast %74 : vector<128x16xf32> to vector<8x16x16xf32>
      %79 = tpu.transpose %78, [0, 2, 1] : vector<8x16x16xf32> -> vector<8x16x16xf32>
      %80 = vector.shape_cast %79 : vector<8x16x16xf32> to vector<128x16xf32>
      %cst_61 = arith.constant dense<0.000000e+00> : vector<128x16xf32>
      %81 = tpu.matmul %77, %13, %cst_61 {dimension_numbers = #tpu.dot_dimension_numbers<[1], [0], [0], [1], [0, 0, 1, 1], [], []>} : vector<128x16xf32>, vector<16x16xf32>, vector<128x16xf32> -> vector<128x16xf32>
      %cst_62 = arith.constant dense<0.000000e+00> : vector<128x16xf32>
      %82 = tpu.matmul %80, %15, %cst_62 {dimension_numbers = #tpu.dot_dimension_numbers<[1], [0], [0], [1], [0, 0, 1, 1], [], []>} : vector<128x16xf32>, vector<16x16xf32>, vector<128x16xf32> -> vector<128x16xf32>
      %83 = arith.addf %77, %80 : vector<128x16xf32>
      %cst_63 = arith.constant dense<0.000000e+00> : vector<128x16xf32>
      %84 = tpu.matmul %83, %17, %cst_63 {dimension_numbers = #tpu.dot_dimension_numbers<[1], [0], [0], [1], [0, 0, 1, 1], [], []>} : vector<128x16xf32>, vector<16x16xf32>, vector<128x16xf32> -> vector<128x16xf32>
      %85 = arith.subf %81, %82 : vector<128x16xf32>
      %86 = arith.subf %84, %81 : vector<128x16xf32>
      %87 = arith.subf %86, %82 : vector<128x16xf32>
      %88 = arith.mulf %85, %3 : vector<128x16xf32>
      %89 = arith.mulf %87, %3 : vector<128x16xf32>
      %cst_64 = arith.constant dense<0.000000e+00> : vector<128x16xf32>
      %90 = tpu.matmul %88, %13, %cst_64 {dimension_numbers = #tpu.dot_dimension_numbers<[1], [0], [0], [1], [0, 0, 1, 1], [], []>} : vector<128x16xf32>, vector<16x16xf32>, vector<128x16xf32> -> vector<128x16xf32>
      %cst_65 = arith.constant dense<0.000000e+00> : vector<128x16xf32>
      %91 = tpu.matmul %89, %15, %cst_65 {dimension_numbers = #tpu.dot_dimension_numbers<[1], [0], [0], [1], [0, 0, 1, 1], [], []>} : vector<128x16xf32>, vector<16x16xf32>, vector<128x16xf32> -> vector<128x16xf32>
      %92 = arith.addf %88, %89 : vector<128x16xf32>
      %cst_66 = arith.constant dense<0.000000e+00> : vector<128x16xf32>
      %93 = tpu.matmul %92, %19, %cst_66 {dimension_numbers = #tpu.dot_dimension_numbers<[1], [0], [0], [1], [0, 0, 1, 1], [], []>} : vector<128x16xf32>, vector<16x16xf32>, vector<128x16xf32> -> vector<128x16xf32>
      %94 = arith.addf %90, %91 : vector<128x16xf32>
      %95 = arith.subf %93, %90 : vector<128x16xf32>
      %96 = arith.addf %95, %91 : vector<128x16xf32>
      %97 = vector.shape_cast %94 : vector<128x16xf32> to vector<8x16x16xf32>
      %98 = tpu.transpose %97, [0, 2, 1] : vector<8x16x16xf32> -> vector<8x16x16xf32>
      %99 = vector.shape_cast %98 : vector<8x16x16xf32> to vector<128x16xf32>
      %100 = vector.shape_cast %96 : vector<128x16xf32> to vector<8x16x16xf32>
      %101 = tpu.transpose %100, [0, 2, 1] : vector<8x16x16xf32> -> vector<8x16x16xf32>
      %102 = vector.shape_cast %101 : vector<8x16x16xf32> to vector<128x16xf32>
      %cst_67 = arith.constant dense<0.000000e+00> : vector<128x16xf32>
      %103 = tpu.matmul %99, %5, %cst_67 {dimension_numbers = #tpu.dot_dimension_numbers<[1], [0], [0], [1], [0, 0, 1, 1], [], []>} : vector<128x16xf32>, vector<16x16xf32>, vector<128x16xf32> -> vector<128x16xf32>
      %cst_68 = arith.constant dense<0.000000e+00> : vector<128x16xf32>
      %104 = tpu.matmul %102, %7, %cst_68 {dimension_numbers = #tpu.dot_dimension_numbers<[1], [0], [0], [1], [0, 0, 1, 1], [], []>} : vector<128x16xf32>, vector<16x16xf32>, vector<128x16xf32> -> vector<128x16xf32>
      %105 = arith.addf %99, %102 : vector<128x16xf32>
      %cst_69 = arith.constant dense<0.000000e+00> : vector<128x16xf32>
      %106 = tpu.matmul %105, %11, %cst_69 {dimension_numbers = #tpu.dot_dimension_numbers<[1], [0], [0], [1], [0, 0, 1, 1], [], []>} : vector<128x16xf32>, vector<16x16xf32>, vector<128x16xf32> -> vector<128x16xf32>
      %107 = arith.addf %103, %104 : vector<128x16xf32>
      %108 = arith.subf %106, %103 : vector<128x16xf32>
      %109 = arith.addf %108, %104 : vector<128x16xf32>
      %110 = vector.shape_cast %107 : vector<128x16xf32> to vector<2x4x16x16xf32>
      %111 = vector.shape_cast %109 : vector<128x16xf32> to vector<2x4x16x16xf32>
      %112 = arith.mulf %1, %110 : vector<2x4x16x16xf32>
      %113 = arith.mulf %2, %111 : vector<2x4x16x16xf32>
      %114 = arith.addf %112, %113 : vector<2x4x16x16xf32>
      %cst_70 = arith.constant dense<0.000000e+00> : vector<2x16x16xf32>
      %115 = vector.multi_reduction <add>, %114, %cst_70 [1] : vector<2x4x16x16xf32> to vector<2x16x16xf32>
      %116 = arith.mulf %1, %111 : vector<2x4x16x16xf32>
      %117 = arith.mulf %2, %110 : vector<2x4x16x16xf32>
      %118 = arith.subf %116, %117 : vector<2x4x16x16xf32>
      %cst_71 = arith.constant dense<0.000000e+00> : vector<2x16x16xf32>
      %119 = vector.multi_reduction <add>, %118, %cst_71 [1] : vector<2x4x16x16xf32> to vector<2x16x16xf32>
      %120 = vector.broadcast %0 : f32 to vector<2x16x16xf32>
      %121 = arith.mulf %120, %arg14 : vector<2x16x16xf32>
      %122 = arith.addf %115, %121 : vector<2x16x16xf32>
      %123 = vector.broadcast %0 : f32 to vector<2x16x16xf32>
      %124 = arith.mulf %123, %arg15 : vector<2x16x16xf32>
      %125 = arith.addf %119, %124 : vector<2x16x16xf32>
      %126 = arith.mulf %arg14, %122 : vector<2x16x16xf32>
      %127 = arith.mulf %arg15, %125 : vector<2x16x16xf32>
      %128 = arith.addf %126, %127 : vector<2x16x16xf32>
      %129 = vector.shape_cast %128 : vector<2x16x16xf32> to vector<1x2x16x16xf32>
      %cst_72 = arith.constant dense<0.000000e+00> : vector<1xf32>
      %130 = vector.multi_reduction <add>, %129, %cst_72 [1, 2, 3] : vector<1x2x16x16xf32> to vector<1xf32>
      %131 = vector.shape_cast %130 : vector<1xf32> to vector<1x1x1x1xf32>
      %132 = vector.extract %131[0, 0, 0, 0] : f32 from vector<1x1x1x1xf32>
      %cst_73 = arith.constant 0.000000e+00 : f32
      %133 = arith.cmpf oeq, %132, %cst_73 : f32
      %cst_74 = arith.constant 1.000000e+00 : f32
      %134 = arith.select %133, %cst_74, %132 : f32
      %135 = arith.divf %arg16, %134 : f32
      %cst_75 = arith.constant 0.000000e+00 : f32
      %136 = arith.select %51, %135, %cst_75 : f32
      %137 = vector.broadcast %136 : f32 to vector<2x16x16xf32>
      %138 = arith.mulf %137, %arg14 : vector<2x16x16xf32>
      %139 = arith.addf %arg10, %138 : vector<2x16x16xf32>
      %140 = vector.broadcast %136 : f32 to vector<2x16x16xf32>
      %141 = arith.mulf %140, %arg15 : vector<2x16x16xf32>
      %142 = arith.addf %arg11, %141 : vector<2x16x16xf32>
      %143 = vector.broadcast %136 : f32 to vector<2x16x16xf32>
      %144 = arith.mulf %143, %122 : vector<2x16x16xf32>
      %145 = arith.subf %arg12, %144 : vector<2x16x16xf32>
      %146 = vector.broadcast %136 : f32 to vector<2x16x16xf32>
      %147 = arith.mulf %146, %125 : vector<2x16x16xf32>
      %148 = arith.subf %arg13, %147 : vector<2x16x16xf32>
      %149 = arith.mulf %145, %145 : vector<2x16x16xf32>
      %150 = arith.mulf %148, %148 : vector<2x16x16xf32>
      %151 = arith.addf %149, %150 : vector<2x16x16xf32>
      %152 = vector.shape_cast %151 : vector<2x16x16xf32> to vector<1x2x16x16xf32>
      %cst_76 = arith.constant dense<0.000000e+00> : vector<1xf32>
      %153 = vector.multi_reduction <add>, %152, %cst_76 [1, 2, 3] : vector<1x2x16x16xf32> to vector<1xf32>
      %154 = vector.shape_cast %153 : vector<1xf32> to vector<1x1x1x1xf32>
      %155 = vector.extract %154[0, 0, 0, 0] : f32 from vector<1x1x1x1xf32>
      %156 = arith.divf %155, %arg16 : f32
      %cst_77 = arith.constant 0.000000e+00 : f32
      %157 = arith.select %51, %156, %cst_77 : f32
      %158 = vector.broadcast %157 : f32 to vector<2x16x16xf32>
      %159 = arith.mulf %158, %arg14 : vector<2x16x16xf32>
      %160 = arith.addf %145, %159 : vector<2x16x16xf32>
      %161 = arith.select %51, %160, %arg14 : vector<2x16x16xf32>
      %162 = vector.broadcast %157 : f32 to vector<2x16x16xf32>
      %163 = arith.mulf %162, %arg15 : vector<2x16x16xf32>
      %164 = arith.addf %148, %163 : vector<2x16x16xf32>
      %165 = arith.select %51, %164, %arg15 : vector<2x16x16xf32>
      %166 = arith.select %51, %155, %arg16 : f32
      scf.yield %139, %142, %145, %148, %161, %165, %166 : vector<2x16x16xf32>, vector<2x16x16xf32>, vector<2x16x16xf32>, vector<2x16x16xf32>, vector<2x16x16xf32>, vector<2x16x16xf32>, f32
    }
    %c0_49 = arith.constant 0 : index
    %c0_50 = arith.constant 0 : index
    %c0_51 = arith.constant 0 : index
    %c0_52 = arith.constant 0 : index
    %45 = vector.load %arg8[%c0_49, %c0_50, %c0_51, %c0_52] : memref<2x2x16x16xf32, #tpu.memory_space<vmem>>, vector<1x2x16x16xf32>
    %46 = vector.shape_cast %45 : vector<1x2x16x16xf32> to vector<2x16x16xf32>
    %47 = vector.shape_cast %44#0 : vector<2x16x16xf32> to vector<1x2x16x16xf32>
    tpu.vector_store %arg8[%c0_49, %c0_50, %c0_51, %c0_52], %47 {strides = array<i32>} : memref<2x2x16x16xf32, #tpu.memory_space<vmem>>, vector<1x2x16x16xf32>,
    %c1_53 = arith.constant 1 : index
    %c0_54 = arith.constant 0 : index
    %c0_55 = arith.constant 0 : index
    %c0_56 = arith.constant 0 : index
    %48 = vector.load %arg8[%c1_53, %c0_54, %c0_55, %c0_56] : memref<2x2x16x16xf32, #tpu.memory_space<vmem>>, vector<1x2x16x16xf32>
    %49 = vector.shape_cast %48 : vector<1x2x16x16xf32> to vector<2x16x16xf32>
    %50 = vector.shape_cast %44#1 : vector<2x16x16xf32> to vector<1x2x16x16xf32>
    tpu.vector_store %arg8[%c1_53, %c0_54, %c0_55, %c0_56], %50 {strides = array<i32>} : memref<2x2x16x16xf32, #tpu.memory_space<vmem>>, vector<1x2x16x16xf32>,
    return
  }
}

</mosaic_0001>

<bundles_post_ra>
// kernel: tpu_custom_call.1
= control target key start
LH: loop header
LB: loop body
LE: loop exit
PB: predicated region body
PF: predicated region fallthrough
CT: control target
= control target key end

     0   :  { %14 = vsyncpa [#allocation4], 0  ;;  %s7587_s0 = inlined_call_operand.<no memory space> [shape: f32[1], index: 0, kind: input, shape index: {}]   ;;  %s7588_s1 = inlined_call_operand.hbm [shape: f32[2,2,16,16], index: 1, kind: input, shape index: {}]   ;;  %s7589_s2 = inlined_call_operand.hbm [shape: f32[2,2,16,16], index: 2, kind: input, shape index: {}]   ;;  %s7590_s3 = inlined_call_operand.vmem [shape: f32[2,4,16,16], index: 3, kind: input, shape index: {}]   ;;  %s7591_s4 = inlined_call_operand.hbm [shape: f32[2,4,16,16], index: 4, kind: input, shape index: {}]   ;;  %s7592_s5 = inlined_call_operand.vmem [shape: f32[128,16], index: 5, kind: input, shape index: {}]   ;;  %s7593_s6 = inlined_call_operand.hbm [shape: f32[4,16,16], index: 6, kind: input, shape index: {}]   ;;  %s7594_s7 = inlined_call_operand.hbm [shape: f32[4,16,16], index: 7, kind: input, shape index: {}]   ;;  %s7595_s8 = inlined_call_operand.hbm [shape: f32[2,2,16,16], index: 8, kind: output, shape index: {}]  }
   0x1   :  { %15 = vsyncpa [#allocation7], 0 }
   0x2   :  { %16 = vsyncpa [#allocation10], 0 }
   0x3   :  { %17 = vsyncpa [#allocation5], 0  ;;  %s5767_s27 = smov [#allocation6]   ;;  %s5768_s29 = smov [#allocation9]  }
   0x4   :  { %s37_s28 = sshll.u32 %s5767_s27, 4  ;;  %s65_s30 = sshll.u32 %s5768_s29, 4  ;;  %s38_s28 = int_to_ptr.vmem [resolvable:$true] %s37_s28  ;;  %s5820_s30 = int_to_ptr.vmem [resolvable:$true] %s65_s30 }
   0x5   :  { %s5419_s11 = scalar_lea.hbm %s7589_s2, 1024 }
   0x6   :  { %p5420_p0 = scmp.ne.s32.totalorder %s7589_s2, %s5419_s11  ;;  %p5423_p1 = scmp.lt.u32.totalorder %s5419_s11, %s7589_s2 }
   0x8   :  { %p5425_p2 = pnand %p5423_p1, %p5420_p0 }
   0xa   :  { %5428 = shalt.err (!%p5425_p2)
}
   0xb   :  { %s5429_s16 = scalar_lea.vmem %s38_s28, 1024  ;;  %p5434_p4 = scmp.lt.s32.totalorder %s38_s28, %s38_s28 }
   0xc   :  { %p5430_p3 = scmp.ne.s32.totalorder %s38_s28, %s5429_s16  ;;  %p5435_p5 = scmp.lt.s32.totalorder %s5429_s16, %s5429_s16 }
   0xe   :  { %p5436_p6 = por %p5435_p5, %p5434_p4 }
  0x10   :  { %p5437_p7 = pnand %p5436_p6, %p5430_p3 }
  0x12   :  { %5440 = shalt.err (!%p5437_p7)
}
  0x13   :  { %s5769_s17 = smov 128   ;;  %s5770_s18 = smov 8  }
  0x14   :  { %43 = dma.hbm_to_vmem [thread:$0]  %s7589_s2, 1024, %s38_s28, [#allocation7], %s5769_s17, %s5769_s17, %s5770_s18  }
  0x15   :  { %s5441_s23 = scalar_lea.hbm %s7593_s6, 1024 }
  0x16   :  { %p5442_p8 = scmp.ne.s32.totalorder %s7593_s6, %s5441_s23  ;;  %p5445_p9 = scmp.lt.u32.totalorder %s5441_s23, %s7593_s6 }
  0x18   :  { %p5447_p10 = pnand %p5445_p9, %p5442_p8 }
  0x1a   :  { %5450 = shalt.err (!%p5447_p10)
}
  0x1b   :  { %s5451_s29 = scalar_lea.vmem %s5820_s30, 1024  ;;  %p5456_p12 = scmp.lt.s32.totalorder %s5820_s30, %s5820_s30 }
  0x1c   :  { %p5452_p11 = scmp.ne.s32.totalorder %s5820_s30, %s5451_s29  ;;  %p5457_p13 = scmp.lt.s32.totalorder %s5451_s29, %s5451_s29 }
  0x1e   :  { %p5458_p0 = por %p5457_p13, %p5456_p12 }
  0x20   :  { %p5459_p1 = pnand %p5458_p0, %p5452_p11 }
  0x22   :  { %5462 = shalt.err (!%p5459_p1)
}
  0x23   :  { %71 = dma.hbm_to_vmem [thread:$0]  %s7593_s6, 1024, %s5820_s30, [#allocation10], %s5769_s17, %s5769_s17, %s5770_s18  }
  0x24   :  { %s5771_s9 = smov [#allocation3]   ;;  %s5772_s11 = smov [#allocation8]  }
  0x25   :  { %s25_s10 = sshll.u32 %s5771_s9, 4  ;;  %s51_s12 = sshll.u32 %s5772_s11, 4  ;;  %s26_s10 = int_to_ptr.vmem [resolvable:$true] %s25_s10  ;;  %s5857_s12 = int_to_ptr.vmem [resolvable:$true] %s51_s12 }
  0x26   :  { %s5463_s15 = scalar_lea.hbm %s7588_s1, 1024 }
  0x27   :  { %p5464_p2 = scmp.ne.s32.totalorder %s7588_s1, %s5463_s15  ;;  %p5467_p3 = scmp.lt.u32.totalorder %s5463_s15, %s7588_s1 }
  0x29   :  { %p5469_p4 = pnand %p5467_p3, %p5464_p2 }
  0x2b   :  { %5472 = shalt.err (!%p5469_p4)
}
  0x2c   :  { %s5473_s6 = scalar_lea.vmem %s26_s10, 1024  ;;  %p5478_p6 = scmp.lt.s32.totalorder %s26_s10, %s26_s10 }
  0x2d   :  { %p5474_p5 = scmp.ne.s32.totalorder %s26_s10, %s5473_s6  ;;  %p5479_p7 = scmp.lt.s32.totalorder %s5473_s6, %s5473_s6 }
  0x2f   :  { %p5480_p8 = por %p5479_p7, %p5478_p6 }
  0x31   :  { %p5481_p9 = pnand %p5480_p8, %p5474_p5 }
  0x33   :  { %5484 = shalt.err (!%p5481_p9)
}
  0x34   :  { %31 = dma.hbm_to_vmem [thread:$0]  %s7588_s1, 1024, %s26_s10, [#allocation4], %s5769_s17, %s5769_s17, %s5770_s18  }
  0x35   :  { %s5485_s25 = scalar_lea.hbm %s7591_s4, 2048 }
  0x36   :  { %p5486_p10 = scmp.ne.s32.totalorder %s7591_s4, %s5485_s25  ;;  %p5489_p11 = scmp.lt.u32.totalorder %s5485_s25, %s7591_s4 }
  0x38   :  { %p5491_p12 = pnand %p5489_p11, %p5486_p10 }
  0x3a   :  { %5494 = shalt.err (!%p5491_p12)
}
  0x3b   :  { %s5495_s28 = scalar_lea.vmem %s5857_s12, 2048  ;;  %p5500_p0 = scmp.lt.s32.totalorder %s5857_s12, %s5857_s12 }
  0x3c   :  { %p5496_p13 = scmp.ne.s32.totalorder %s5857_s12, %s5495_s28  ;;  %p5501_p1 = scmp.lt.s32.totalorder %s5495_s28, %s5495_s28 }
  0x3e   :  { %p5502_p2 = por %p5501_p1, %p5500_p0 }
  0x40   :  { %p5503_p3 = pnand %p5502_p2, %p5496_p13 }
  0x42   :  { %5506 = shalt.err (!%p5503_p3)
}
  0x43   :  { %57 = dma.hbm_to_vmem [thread:$0]  %s7591_s4, 2048, %s5857_s12, [#allocation7], %s5769_s17, %s5769_s17, %s5770_s18  }
  0x44   :  { %s5773_s10 = smov [#allocation11]   ;;  %s5507_s15 = scalar_lea.hbm %s7594_s7, 1024 }
  0x45   :  { %s77_s11 = sshll.u32 %s5773_s10, 4  ;;  %p5508_p4 = scmp.ne.s32.totalorder %s7594_s7, %s5507_s15  ;;  %s78_s11 = int_to_ptr.vmem [resolvable:$true] %s77_s11 }
  0x46   :  { %p5511_p5 = scmp.lt.u32.totalorder %s5507_s15, %s7594_s7 }
  0x48   :  { %p5513_p6 = pnand %p5511_p5, %p5508_p4 }
  0x4a   :  { %5516 = shalt.err (!%p5513_p6)
}
  0x4b   :  { %s5517_s6 = scalar_lea.vmem %s78_s11, 1024  ;;  %p5522_p8 = scmp.lt.s32.totalorder %s78_s11, %s78_s11 }
  0x4c   :  { %p5518_p7 = scmp.ne.s32.totalorder %s78_s11, %s5517_s6  ;;  %p5523_p9 = scmp.lt.s32.totalorder %s5517_s6, %s5517_s6 }
  0x4e   :  { %p5524_p10 = por %p5523_p9, %p5522_p8 }
  0x50   :  { %p5525_p11 = pnand %p5524_p10, %p5518_p7 }
  0x52   :  { %5528 = shalt.err (!%p5525_p11)
}
  0x53   :  { %83 = dma.hbm_to_vmem [thread:$0]  %s7594_s7, 1024, %s78_s11, [#allocation10], %s5769_s17, %s5769_s17, %s5770_s18  }
  0x54   :  { %5655 = dma.done.wait [#allocation4], 1024  }
  0x55   :  { %5656 = vsyncadd [#allocation4], 4294966272 }
  0x56   :  { %5657 = dma.done.wait [#allocation7], 3072  }
  0x57   :  { %5658 = vsyncadd [#allocation7], 4294964224 }
  0x58   :  { %5659 = dma.done.wait [#allocation10], 2048  }
  0x59   :  { %5660 = vsyncadd [#allocation10], 4294965248  ;;  %v5912_v0 = vld [vmem:[%s7590_s3] sm:$0xff]  ;;  %v5917_v1 = vld [vmem:[%s7590_s3 + $0x8] sm:$0xff]  ;;  %v6134_v63 = vstv %s7587_s0  ;;  %vm217_vm0 = vcmask 130048   ;;  %s6206_s10 = smov 0  }
  0x5a   :  { %7691 = vst [vmem:[#allocation17_spill] sm:$0xff] %v5912_v0  ;;  %7692 = vst [vmem:[#allocation18_spill] sm:$0xff] %v5917_v1  ;;  %v5922_v2 = vld [vmem:[%s7590_s3 + $0x10] sm:$0xff]  ;;  %v5927_v3 = vld [vmem:[%s7590_s3 + $0x18] sm:$0xff] }
  0x5b   :  { %7693 = vst [vmem:[#allocation19_spill] sm:$0xff] %v5922_v2  ;;  %7694 = vst [vmem:[#allocation20_spill] sm:$0xff] %v5927_v3  ;;  %v5932_v4 = vld [vmem:[%s7590_s3 + $0x20] sm:$0xff]  ;;  %v5937_v5 = vld [vmem:[%s7590_s3 + $0x28] sm:$0xff] }
  0x5c   :  { %7695 = vst [vmem:[#allocation21_spill] sm:$0xff] %v5932_v4  ;;  %7696 = vst [vmem:[#allocation22_spill] sm:$0xff] %v5937_v5  ;;  %v5942_v6 = vld [vmem:[%s7590_s3 + $0x30] sm:$0xff]  ;;  %v5947_v7 = vld [vmem:[%s7590_s3 + $0x38] sm:$0xff] }
  0x5d   :  { %7697 = vst [vmem:[#allocation23_spill] sm:$0xff] %v5942_v6  ;;  %7698 = vst [vmem:[#allocation24_spill] sm:$0xff] %v5947_v7  ;;  %v5952_v8 = vld [vmem:[%s7590_s3 + $0x40] sm:$0xff]  ;;  %v5957_v9 = vld [vmem:[%s7590_s3 + $0x48] sm:$0xff] }
  0x5e   :  { %7699 = vst [vmem:[#allocation25_spill] sm:$0xff] %v5952_v8  ;;  %7700 = vst [vmem:[#allocation26_spill] sm:$0xff] %v5957_v9  ;;  %v5962_v10 = vld [vmem:[%s7590_s3 + $0x50] sm:$0xff]  ;;  %v5967_v11 = vld [vmem:[%s7590_s3 + $0x58] sm:$0xff] }
  0x5f   :  { %7701 = vst [vmem:[#allocation27_spill] sm:$0xff] %v5962_v10  ;;  %7702 = vst [vmem:[#allocation28_spill] sm:$0xff] %v5967_v11  ;;  %v5972_v12 = vld [vmem:[%s7590_s3 + $0x60] sm:$0xff]  ;;  %v5977_v13 = vld [vmem:[%s7590_s3 + $0x68] sm:$0xff] }
  0x60   :  { %7703 = vst [vmem:[#allocation29_spill] sm:$0xff] %v5972_v12  ;;  %7704 = vst [vmem:[#allocation30_spill] sm:$0xff] %v5977_v13  ;;  %v5982_v14 = vld [vmem:[%s7590_s3 + $0x70] sm:$0xff]  ;;  %v5987_v15 = vld [vmem:[%s7590_s3 + $0x78] sm:$0xff] }
  0x61   :  { %7705 = vst [vmem:[#allocation31_spill] sm:$0xff] %v5982_v14  ;;  %7706 = vst [vmem:[#allocation32_spill] sm:$0xff] %v5987_v15  ;;  %v5989_v16 = vld [vmem:[#allocation8] sm:$0xff]  ;;  %v5991_v17 = vld [vmem:[#allocation8 + $0x8] sm:$0xff] }
  0x62   :  { %7707 = vst [vmem:[#allocation33_spill] sm:$0xff] %v5989_v16  ;;  %7708 = vst [vmem:[#allocation34_spill] sm:$0xff] %v5991_v17  ;;  %v5993_v18 = vld [vmem:[#allocation8 + $0x10] sm:$0xff]  ;;  %v5995_v19 = vld [vmem:[#allocation8 + $0x18] sm:$0xff] }
  0x63   :  { %7709 = vst [vmem:[#allocation35_spill] sm:$0xff] %v5993_v18  ;;  %7710 = vst [vmem:[#allocation36_spill] sm:$0xff] %v5995_v19  ;;  %v5997_v20 = vld [vmem:[#allocation8 + $0x20] sm:$0xff]  ;;  %v5999_v21 = vld [vmem:[#allocation8 + $0x28] sm:$0xff] }
  0x64   :  { %7711 = vst [vmem:[#allocation37_spill] sm:$0xff] %v5997_v20  ;;  %7712 = vst [vmem:[#allocation38_spill] sm:$0xff] %v5999_v21  ;;  %v6001_v22 = vld [vmem:[#allocation8 + $0x30] sm:$0xff]  ;;  %v6003_v23 = vld [vmem:[#allocation8 + $0x38] sm:$0xff] }
  0x65   :  { %7713 = vst [vmem:[#allocation39_spill] sm:$0xff] %v6001_v22  ;;  %v6005_v24 = vld [vmem:[#allocation8 + $0x40] sm:$0xff]  ;;  %v6007_v25 = vld [vmem:[#allocation8 + $0x48] sm:$0xff]  ;;  %v6009_v26 = vld [vmem:[#allocation8 + $0x50] sm:$0xff] }
  0x66   :  { %7714 = vst [vmem:[#allocation40_spill] sm:$0xff] %v6005_v24  ;;  %7715 = vst [vmem:[#allocation41_spill] sm:$0xff] %v6007_v25  ;;  %v6011_v27 = vld [vmem:[#allocation8 + $0x58] sm:$0xff]  ;;  %v6013_v28 = vld [vmem:[#allocation8 + $0x60] sm:$0xff] }
  0x67   :  { %7716 = vst [vmem:[#allocation42_spill] sm:$0xff] %v6009_v26  ;;  %7717 = vst [vmem:[#allocation43_spill] sm:$0xff] %v6011_v27  ;;  %v6015_v29 = vld [vmem:[#allocation8 + $0x68] sm:$0xff]  ;;  %v6017_v30 = vld [vmem:[#allocation8 + $0x70] sm:$0xff] }
  0x68   :  { %7718 = vst [vmem:[#allocation44_spill] sm:$0xff] %v6013_v28  ;;  %7719 = vst [vmem:[#allocation45_spill] sm:$0xff] %v6015_v29  ;;  %v6019_v31 = vld [vmem:[#allocation8 + $0x78] sm:$0xff]  ;;  %v6024_v32 = vld [vmem:[%s7592_s5] sm:$0xff] }
  0x69   :  { %7720 = vst [vmem:[#allocation46_spill] sm:$0xff] %v6017_v30  ;;  %7721 = vst [vmem:[#allocation47_spill] sm:$0xff] %v6019_v31  ;;  %v6029_v33 = vld [vmem:[%s7592_s5 + $0x8] sm:$0xff]  ;;  %v6034_v34 = vld [vmem:[%s7592_s5 + $0x10] sm:$0xff] }
  0x6a   :  { %7722 = vst [vmem:[#allocation48_spill] sm:$0xff] %v6024_v32  ;;  %7723 = vst [vmem:[#allocation49_spill] sm:$0xff] %v6029_v33  ;;  %v6039_v35 = vld [vmem:[%s7592_s5 + $0x18] sm:$0xff]  ;;  %v6044_v36 = vld [vmem:[%s7592_s5 + $0x20] sm:$0xff] }
  0x6b   :  { %7724 = vst [vmem:[#allocation50_spill] sm:$0xff] %v6034_v34  ;;  %7725 = vst [vmem:[#allocation51_spill] sm:$0xff] %v6039_v35  ;;  %v6049_v37 = vld [vmem:[%s7592_s5 + $0x28] sm:$0xff]  ;;  %v6054_v38 = vld [vmem:[%s7592_s5 + $0x30] sm:$0xff] }
  0x6c   :  { %7726 = vst [vmem:[#allocation52_spill] sm:$0xff] %v6044_v36  ;;  %7727 = vst [vmem:[#allocation53_spill] sm:$0xff] %v6049_v37  ;;  %v6059_v39 = vld [vmem:[%s7592_s5 + $0x38] sm:$0xff]  ;;  %v6064_v40 = vld [vmem:[%s7592_s5 + $0x40] sm:$0xff] }
  0x6d   :  { %7728 = vst [vmem:[#allocation54_spill] sm:$0xff] %v6054_v38  ;;  %7729 = vst [vmem:[#allocation55_spill] sm:$0xff] %v6059_v39  ;;  %v6069_v41 = vld [vmem:[%s7592_s5 + $0x48] sm:$0xff]  ;;  %v6074_v42 = vld [vmem:[%s7592_s5 + $0x50] sm:$0xff] }
  0x6e   :  { %7730 = vst [vmem:[#allocation56_spill] sm:$0xff] %v6064_v40  ;;  %7731 = vst [vmem:[#allocation57_spill] sm:$0xff] %v6069_v41  ;;  %v6079_v43 = vld [vmem:[%s7592_s5 + $0x58] sm:$0xff]  ;;  %v6084_v44 = vld [vmem:[%s7592_s5 + $0x60] sm:$0xff] }
  0x6f   :  { %7732 = vst [vmem:[#allocation58_spill] sm:$0xff] %v6074_v42  ;;  %7733 = vst [vmem:[#allocation59_spill] sm:$0xff] %v6079_v43  ;;  %v6089_v45 = vld [vmem:[%s7592_s5 + $0x68] sm:$0xff]  ;;  %v6094_v46 = vld [vmem:[%s7592_s5 + $0x70] sm:$0xff] }
  0x70   :  { %7734 = vst [vmem:[#allocation60_spill] sm:$0xff] %v6084_v44  ;;  %7735 = vst [vmem:[#allocation61_spill] sm:$0xff] %v6089_v45  ;;  %v6099_v47 = vld [vmem:[%s7592_s5 + $0x78] sm:$0xff]  ;;  %v6101_v48 = vld [vmem:[#allocation9] sm:$0xff] }
  0x71   :  { %7736 = vst [vmem:[#allocation62_spill] sm:$0xff] %v6094_v46  ;;  %7737 = vst [vmem:[#allocation63_spill] sm:$0xff] %v6099_v47  ;;  %v6103_v49 = vld [vmem:[#allocation9 + $0x8] sm:$0xff]  ;;  %v6105_v50 = vld [vmem:[#allocation9 + $0x10] sm:$0xff] }
  0x72   :  { %7738 = vst [vmem:[#allocation64_spill] sm:$0xff] %v6101_v48  ;;  %7739 = vst [vmem:[#allocation65_spill] sm:$0xff] %v6103_v49  ;;  %v6107_v51 = vld [vmem:[#allocation9 + $0x18] sm:$0xff]  ;;  %v6109_v52 = vld [vmem:[#allocation9 + $0x20] sm:$0xff] }
  0x73   :  { %7740 = vst [vmem:[#allocation66_spill] sm:$0xff] %v6105_v50  ;;  %7741 = vst [vmem:[#allocation67_spill] sm:$0xff] %v6107_v51  ;;  %v6111_v53 = vld [vmem:[#allocation9 + $0x28] sm:$0xff]  ;;  %v6113_v54 = vld [vmem:[#allocation9 + $0x30] sm:$0xff] }
  0x74   :  { %7742 = vst [vmem:[#allocation68_spill] sm:$0xff] %v6109_v52  ;;  %7743 = vst [vmem:[#allocation69_spill] sm:$0xff] %v6111_v53  ;;  %v6115_v55 = vld [vmem:[#allocation9 + $0x38] sm:$0xff]  ;;  %v6117_v56 = vld [vmem:[#allocation11] sm:$0xff] }
  0x75   :  { %7744 = vst [vmem:[#allocation70_spill] sm:$0xff] %v6113_v54  ;;  %7745 = vst [vmem:[#allocation71_spill] sm:$0xff] %v6115_v55  ;;  %v6119_v57 = vld [vmem:[#allocation11 + $0x8] sm:$0xff]  ;;  %v6121_v58 = vld [vmem:[#allocation11 + $0x10] sm:$0xff] }
  0x76   :  { %7746 = vst [vmem:[#allocation72_spill] sm:$0xff] %v6117_v56  ;;  %7747 = vst [vmem:[#allocation73_spill] sm:$0xff] %v6119_v57  ;;  %v6123_v59 = vld [vmem:[#allocation11 + $0x18] sm:$0xff]  ;;  %v6125_v60 = vld [vmem:[#allocation11 + $0x20] sm:$0xff] }
  0x77   :  { %7748 = vst [vmem:[#allocation74_spill] sm:$0xff] %v6121_v58  ;;  %7749 = vst [vmem:[#allocation75_spill] sm:$0xff] %v6123_v59  ;;  %v6127_v61 = vld [vmem:[#allocation11 + $0x28] sm:$0xff]  ;;  %v6129_v62 = vld [vmem:[#allocation11 + $0x30] sm:$0xff] }
  0x78   :  { %7750 = vst [vmem:[#allocation76_spill] sm:$0xff] %v6125_v60  ;;  %7751 = vst [vmem:[#allocation77_spill] sm:$0xff] %v6127_v61  ;;  %v6136_v55 = vld [vmem:[#allocation11 + $0x38] sm:$0xff]  ;;  %v170_v54 = vld [vmem:[#allocation6] sm:$0xff] }
  0x79   :  { %7752 = vst [vmem:[#allocation78_spill] sm:$0xff] %v6129_v62  ;;  %7753 = vst [vmem:[#allocation79_spill] sm:$0xff] %v6134_v63  ;;  %v171_v47 = vld [vmem:[#allocation6 + $0x8] sm:$0xff]  ;;  %v172_v46 = vld [vmem:[#allocation6 + $0x10] sm:$0xff] }
  0x7a   :  { %7754 = vst [vmem:[#allocation80_spill] sm:$0xff] %v6136_v55  ;;  %v173_v45 = vld [vmem:[#allocation6 + $0x18] sm:$0xff]  ;;  %v174_v44 = vld [vmem:[#allocation3] sm:$0xff]  ;;  %v175_v43 = vld [vmem:[#allocation3 + $0x8] sm:$0xff] }
  0x7b   :  { %v176_v42 = vld [vmem:[#allocation3 + $0x10] sm:$0xff]  ;;  %v177_v41 = vld [vmem:[#allocation3 + $0x18] sm:$0xff]  ;;  %v179_v40 = vmul.f32 %v6134_v63, %v174_v44  ;;  %v180_v39 = vmul.f32 %v6134_v63, %v175_v43  ;;  %v188_v36 = vld [vmem:[#allocation6 + $0x20] sm:$0xff] }
  0x7c   :  { %v181_v38 = vmul.f32 %v6134_v63, %v176_v42  ;;  %v182_v37 = vmul.f32 %v6134_v63, %v177_v41  ;;  %v189_v35 = vld [vmem:[#allocation6 + $0x28] sm:$0xff]  ;;  %v190_v33 = vld [vmem:[#allocation6 + $0x30] sm:$0xff]  ;;  %v193_v32 = vld [vmem:[#allocation3 + $0x20] sm:$0xff] }
  0x7d   :  { %v6142_v34 = vadd.f32 %v179_v40, %v170_v54   ;;  %v194_v55 = vld [vmem:[#allocation3 + $0x28] sm:$0xff]  ;;  %v184_v62 = vadd.f32 %v180_v39, %v171_v47   ;;  %v191_v59 = vld [vmem:[#allocation6 + $0x38] sm:$0xff]  ;;  %v195_v58 = vld [vmem:[#allocation3 + $0x30] sm:$0xff]  ;;  %v197_v44 = vmul.f32 %v193_v32, %v6134_v63 }
  0x7e   :  { %v185_v61 = vadd.f32 %v181_v38, %v172_v46   ;;  %v186_v60 = vadd.f32 %v182_v37, %v173_v45   ;;  %v196_v57 = vld [vmem:[#allocation3 + $0x38] sm:$0xff]  ;;  %v198_v43 = vmul.f32 %v194_v55, %v6134_v63  ;;  %v199_v42 = vmul.f32 %v195_v58, %v6134_v63 }
  0x7f   :  { %v200_v41 = vmul.f32 %v196_v57, %v6134_v63  ;;  %v201_v56 = vadd.f32 %v197_v44, %v188_v36   ;;  %v205_v40 = vmul.f32 %v6142_v34, %v6142_v34  ;;  %v206_v54 = vmul.f32 %v184_v62, %v184_v62 }
  0x80   :  { %v207_v31 = vmul.f32 %v185_v61, %v185_v61  ;;  %v202_v39 = vadd.f32 %v198_v43, %v189_v35   ;;  %v203_v38 = vadd.f32 %v199_v42, %v190_v33   ;;  %v208_v45 = vmul.f32 %v186_v60, %v186_v60 }
  0x81   :  { %v204_v37 = vadd.f32 %v200_v41, %v191_v59   ;;  %v209_v46 = vmul.f32 %v201_v56, %v201_v56 }
  0x82   :  { %v210_v47 = vmul.f32 %v202_v39, %v202_v39  ;;  %v211_v15 = vmul.f32 %v203_v38, %v203_v38 }
  0x83   :  { %v212_v32 = vmul.f32 %v204_v37, %v204_v37  ;;  %v213_v55 = vadd.f32 %v209_v46, %v205_v40  ;;  %v7760_v46 = vmov %v185_v61 }
  0x84   :  { %v214_v30 = vadd.f32 %v210_v47, %v206_v54  ;;  %v215_v58 = vadd.f32 %v211_v15, %v207_v31  ;;  %v7756_v31 = vmov %v203_v38  ;;  %v7762_v47 = vmov %v6142_v34 }
  0x85   :  { %v216_v14 = vadd.f32 %v212_v32, %v208_v45  ;;  %v218_v36 = vsel %vm217_vm0, %v213_v55, 0.0  ;;  %v7759_v45 = vmov %v186_v60  ;;  %v6190_v32 = vmov 0.0  }
  0x86   :  { %v219_v57 = vsel %vm217_vm0, %v214_v30, 0.0  ;;  %v221_v44 = vsel %vm217_vm0, %v215_v58, 0.0  ;;  %v7755_v30 = vmov %v204_v37  ;;  %v6192_v55 = vmov 0.0  }
  0x87   :  { %v220_v63 = vadd.f32 %v219_v57, %v218_v36  ;;  %v223_v33 = vsel %vm217_vm0, %v216_v14, 0.0  ;;  %v7757_v14 = vmov %v202_v39  ;;  %v6194_v58 = vmov 0.0  }
  0x88   :  { %v6196_v36 = vmov 0.0   ;;  %v6198_v57 = vmov 0.0  }
  0x89   :  { %v222_v35 = vadd.f32 %v221_v44, %v220_v63  ;;  %v7758_v63 = vmov %v201_v56  ;;  %v6200_v44 = vmov 0.0  }
  0x8b   :  { %v224_v59 = vadd.f32 %v223_v33, %v222_v35  ;;  %v6202_v33 = vmov 0.0   ;;  %v6204_v35 = vmov 0.0  }
  0x8d   :  { %225 = vadd.xlane.f32.xlu0 %v224_v59 }
 0x11a   :  { %v226_v43 = vpop.xlane.xlu0 %225 }
 0x11b   :  { %v227_v42 = vrot.slane %v226_v43, 4 }
 0x11d   :  { %v228_v41 = vadd.f32 %v227_v42, %v226_v43 }
 0x11f   :  { %v229_v29 = vrot.slane %v228_v41, 2 }
 0x121   :  { %v230_v40 = vadd.f32 %v229_v29, %v228_v41  ;;  %v7761_v29 = vmov %v184_v62 }
 0x123   :  { %v231_v54 = vrot.slane %v230_v40, 1 }
 0x125   :  { %v232_v15 = vadd.f32 %v231_v54, %v230_v40 }
 0x127   :  { %5188 = vpush %v232_v15 }
 0x158   :  { %s5189_s0 = spop %5188  }
 0x159 LB: > { %v7763_v21 = vld [vmem:[#allocation38_spill] sm:$0xff]  ;;  %v7764_v20 = vld [vmem:[#allocation37_spill] sm:$0xff]  ;;  %v7765_v19 = vld [vmem:[#allocation36_spill] sm:$0xff]  ;;  %7789 = vst [vmem:[#allocation81_spill] sm:$0xff] %v5669_v30  ;;  %p265_p13 = scmp.gt.f32.partialorder %s5665_s0, 1e-10  ;;  %s5765_s10 = sphi %s6206_s10, %s239_s10   ;;  %v5761_v35 = vphi %v6204_v35, %v7932_v35   ;;  %v5757_v33 = vphi %v6202_v33, %v7931_v33   ;;  %v5753_v44 = vphi %v6200_v44, %v7930_v44   ;;  %v5749_v57 = vphi %v6198_v57, %v7929_v57   ;;  %v5745_v36 = vphi %v6196_v36, %v7928_v36   ;;  %v5741_v58 = vphi %v6194_v58, %v7927_v58   ;;  %v5737_v55 = vphi %v6192_v55, %v7926_v55   ;;  %v5733_v32 = vphi %v6190_v32, %v7925_v32   ;;  %v5729_v34 = vphi %v6142_v34, %v7383_v34   ;;  %v5725_v62 = vphi %v184_v62, %v7924_v62   ;;  %v5721_v61 = vphi %v185_v61, %v7923_v61   ;;  %v5717_v60 = vphi %v186_v60, %v7922_v60   ;;  %v5713_v56 = vphi %v201_v56, %v7395_v56   ;;  %v5709_v39 = vphi %v202_v39, %v7398_v39   ;;  %v5705_v38 = vphi %v203_v38, %v7401_v38   ;;  %v5701_v37 = vphi %v204_v37, %v7404_v37   ;;  %v5697_v47 = vphi %v7762_v47, %v4271_v47   ;;  %v5693_v29 = vphi %v7761_v29, %v7921_v29   ;;  %v5689_v46 = vphi %v7760_v46, %v4273_v46   ;;  %v5685_v45 = vphi %v7759_v45, %v4274_v45   ;;  %v5681_v63 = vphi %v7758_v63, %v7920_v63   ;;  %v5677_v14 = vphi %v7757_v14, %v4284_v14   ;;  %v5673_v31 = vphi %v7756_v31, %v4285_v31   ;;  %v5669_v30 = vphi %v7755_v30, %v4286_v30   ;;  %s5665_s0 = sphi %s5189_s0, %s7919_s0  }
 0x15a   : > { %v7766_v18 = vld [vmem:[#allocation35_spill] sm:$0xff]  ;;  %v7767_v17 = vld [vmem:[#allocation34_spill] sm:$0xff]  ;;  %v7768_v7 = vld [vmem:[#allocation24_spill] sm:$0xff]  ;;  %7790 = vst [vmem:[#allocation82_spill] sm:$0xff] %v5673_v31  ;;  %s239_s10 = sadd.s32 1, %s5765_s10  }
 0x15b   : > { %v7769_v16 = vld [vmem:[#allocation33_spill] sm:$0xff]  ;;  %v7770_v5 = vld [vmem:[#allocation22_spill] sm:$0xff]  ;;  %v7772_v3 = vld [vmem:[#allocation20_spill] sm:$0xff]  ;;  %7791 = vst [vmem:[#allocation83_spill] sm:$0xff] %v5677_v14  ;;  %s4268_s15 = scalar_select %p265_p13, 1, 0 }
 0x15c   : > { %v7771_v4 = vld [vmem:[#allocation21_spill] sm:$0xff]  ;;  %v7773_v2 = vld [vmem:[#allocation19_spill] sm:$0xff]  ;;  %v7774_v1 = vld [vmem:[#allocation18_spill] sm:$0xff]  ;;  %7792 = vst [vmem:[#allocation84_spill] sm:$0xff] %v5681_v63  ;;  %v282_v40 = vmul.f32 %v5681_v63, %v7769_v16  ;;  %v330_v15 = vmul.f32 %v5697_v47, %v7769_v16  ;;  %p7481_p0 = scmp.ge.s32.totalorder %s239_s10, 10  }
 0x15d   : > { %v7775_v0 = vld [vmem:[#allocation17_spill] sm:$0xff]  ;;  %v7776_v6 = vld [vmem:[#allocation23_spill] sm:$0xff]  ;;  %v7778_v13 = vld [vmem:[#allocation30_spill] sm:$0xff]  ;;  %7793 = vst [vmem:[#allocation85_spill] sm:$0xff] %v5685_v45  ;;  %s5774_s4 = smov (%p7481_p0), [#allocation12]  }
 0x15e   : > { %v7777_v22 = vld [vmem:[#allocation39_spill] sm:$0xff]  ;;  %v7779_v9 = vld [vmem:[#allocation26_spill] sm:$0xff]  ;;  %v7780_v25 = vld [vmem:[#allocation41_spill] sm:$0xff]  ;;  %7794 = vst [vmem:[#allocation86_spill] sm:$0xff] %v5689_v46  ;;  %v266_v41 = vmul.f32 %v5697_v47, %v7775_v0  ;;  %v314_v54 = vmul.f32 %v5681_v63, %v7775_v0  ;;  %s4302_s12 = sshll.u32 (%p7481_p0), %s5774_s4, 4  ;;  %s4303_s12 = int_to_ptr.vmem [resolvable:$true] %s4302_s12 }
 0x15f   : > { %v7781_v11 = vld [vmem:[#allocation28_spill] sm:$0xff]  ;;  %v7782_v27 = vld [vmem:[#allocation43_spill] sm:$0xff]  ;;  %v7784_v12 = vld [vmem:[#allocation29_spill] sm:$0xff]  ;;  %7795 = vst [vmem:[#allocation87_spill] sm:$0xff] %v5693_v29  ;;  %s5529_s30 = scalar_lea.vmem (%p7481_p0), %s4303_s12, 1024  ;;  %p5534_p2 = scmp.lt.s32.totalorder (%p7481_p0), %s4303_s12, %s4303_s12 }
 0x160   : > { %v7783_v28 = vld [vmem:[#allocation44_spill] sm:$0xff]  ;;  %v7785_v8 = vld [vmem:[#allocation25_spill] sm:$0xff]  ;;  %v7787_v10 = vld [vmem:[#allocation27_spill] sm:$0xff]  ;;  %7796 = vst [vmem:[#allocation88_spill] sm:$0xff] %v5697_v47  ;;  %p5530_p1 = scmp.ne.s32.totalorder (%p7481_p0), %s4303_s12, %s5529_s30  ;;  %p5535_p3 = scmp.lt.s32.totalorder (%p7481_p0), %s5529_s30, %s5529_s30 }
 0x161   : > { %v7786_v24 = vld [vmem:[#allocation40_spill] sm:$0xff]  ;;  %v7788_v26 = vld [vmem:[#allocation42_spill] sm:$0xff]  ;;  %7797 = vst [vmem:[#allocation89_spill] sm:$0xff] %v5701_v37  ;;  %7798 = vst [vmem:[#allocation90_spill] sm:$0xff] %v5705_v38  ;;  %v331_v37 = vmul.f32 %v5693_v29, %v7767_v17  ;;  %v284_v38 = vmul.f32 %v5681_v63, %v7766_v18 }
 0x162   : > { %7799 = vst [vmem:[#allocation91_spill] sm:$0xff] %v5709_v39  ;;  %7800 = vst [vmem:[#allocation92_spill] sm:$0xff] %v5713_v56  ;;  %v7813_v48 = vld [vmem:[#allocation64_spill] sm:$0xff]  ;;  %v7814_v49 = vld [vmem:[#allocation65_spill] sm:$0xff]  ;;  %v332_v39 = vmul.f32 %v5697_v47, %v7766_v18  ;;  %p5536_p4 = por (%p7481_p0), %p5535_p3, %p5534_p2 }
 0x163   : > { %7801 = vst [vmem:[#allocation93_spill] sm:$0xff] %v5717_v60  ;;  %7802 = vst [vmem:[#allocation94_spill] sm:$0xff] %v5721_v61  ;;  %v6288_v59 = vpack.c.bf16 %v7814_v49, %v7813_v48  ;;  %v7815_v50 = vld [vmem:[#allocation66_spill] sm:$0xff]  ;;  %v7816_v51 = vld [vmem:[#allocation67_spill] sm:$0xff]  ;;  %v268_v48 = vmul.f32 %v5697_v47, %v7773_v2  ;;  %v6310_v49 = vsub.f32 %v266_v41, %v282_v40 }
 0x164   : > { %7803 = vst [vmem:[#allocation95_spill] sm:$0xff] %v5725_v62  ;;  %7804 = vst [vmem:[#allocation96_spill] sm:$0xff] %v5729_v34  ;;  %v6292_v43 = vpack.c.bf16 %v7816_v51, %v7815_v50  ;;  %v7817_v52 = vld [vmem:[#allocation68_spill] sm:$0xff]  ;;  %v7818_v53 = vld [vmem:[#allocation69_spill] sm:$0xff]  ;;  %v267_v50 = vmul.f32 %v5693_v29, %v7774_v1  ;;  %v283_v51 = vmul.f32 %v5677_v14, %v7767_v17  ;;  %p5537_p5 = pnand (%p7481_p0), %p5536_p4, %p5530_p1 }
 0x165   : > { %7805 = vst [vmem:[#allocation97_spill] sm:$0xff] %v5733_v32  ;;  %7806 = vst [vmem:[#allocation98_spill] sm:$0xff] %v5737_v55  ;;  %v5148_v42 = vpack.c.bf16 %v7818_v53, %v7817_v52  ;;  %5141 = vmatprep.subr.bf16.mxu0 %v6288_v59  ;;  %v315_v52 = vmul.f32 %v5677_v14, %v7774_v1  ;;  %v6318_v53 = vadd.f32 %v330_v15, %v314_v54 }
 0x166   : > { %7807 = vst [vmem:[#allocation99_spill] sm:$0xff] %v5741_v58  ;;  %7808 = vst [vmem:[#allocation100_spill] sm:$0xff] %v5745_v36  ;;  %5145 = vmatprep.subr.bf16.mxu1 %v6292_v43  ;;  %5143 = vmatpush3.bf16.msra.mxu0 %v6288_v59  ;;  %v316_v41 = vmul.f32 %v5681_v63, %v7773_v2  ;;  %v6328_v40 = vsub.f32 %v267_v50, %v283_v51 }
 0x167   : > { %7809 = vst [vmem:[#allocation101_spill] sm:$0xff] %v5749_v57  ;;  %7810 = vst [vmem:[#allocation102_spill] sm:$0xff] %v5753_v44  ;;  %5147 = vmatpush3.bf16.msra.mxu1 %v6292_v43  ;;  %5149 = vmatprep.subr.bf16.mxu0 %v5148_v42  ;;  %v269_v54 = vmul.f32 %v5693_v29, %v7772_v3  ;;  %v285_v15 = vmul.f32 %v5677_v14, %v7765_v19 }
 0x168   : > { %7811 = vst [vmem:[#allocation103_spill] sm:$0xff] %v5757_v33  ;;  %7812 = vst [vmem:[#allocation104_spill] sm:$0xff] %v5761_v35  ;;  %4808 = vmatprep.mubr.msk.f32.mxu0 %vm217_vm0, %v6310_v49  ;;  %4836 = vmatprep.mubr.msk.f32.mxu1 %vm217_vm0, %v6318_v53  ;;  %v6338_v56 = vadd.f32 %v331_v37, %v315_v52  ;;  %v6340_v60 = vsub.f32 %v268_v48, %v284_v38 }
 0x169   : > { %v317_v50 = vmul.f32 %v5677_v14, %v7772_v3  ;;  %4809 = vmatmul.mubr.msk.f32.vlgmr.msra.gmra.mrb[0].mxu0 %vm217_vm0, %v6328_v40  ;;  %v6346_v51 = vadd.f32 %v332_v39, %v316_v41  ;;  %v6348_v61 = vsub.f32 %v269_v54, %v285_v15  ;;  %v333_v62 = vmul.f32 %v5693_v29, %v7765_v19 }
 0x16a   : > { %v270_v34 = vmul.f32 %v5697_v47, %v7771_v4  ;;  %4837 = vmatmul.mubr.msk.f32.vlgmr.msra.gmra.mrb[0].mxu1 %vm217_vm0, %v6338_v56  ;;  %5151 = vmatpush3.bf16.msra.mxu0 %v5148_v42  ;;  %v286_v48 = vmul.f32 %v5681_v63, %v7764_v20  ;;  %v318_v52 = vmul.f32 %v5681_v63, %v7771_v4 }
 0x16b   : > { %4811 = vmatprep.mubr.msk.f32.mxu0 %vm217_vm0, %v6340_v60  ;;  %4839 = vmatprep.mubr.msk.f32.mxu1 %vm217_vm0, %v6346_v51  ;;  %v6364_v39 = vadd.f32 %v333_v62, %v317_v50  ;;  %v334_v38 = vmul.f32 %v5697_v47, %v7764_v20  ;;  %v271_v37 = vmul.f32 %v5693_v29, %v7770_v5 }
 0x16c   : > { %v6370_v42 = vsub.f32 %v270_v34, %v286_v48  ;;  %v287_v41 = vmul.f32 %v5677_v14, %v7763_v21  ;;  %v319_v54 = vmul.f32 %v5677_v14, %v7770_v5  ;;  %v335_v15 = vmul.f32 %v5693_v29, %v7763_v21 }
 0x16d   : > { %4812 = vmatmul.mubr.msk.f32.gmra.mrb[2].mxu0 %vm217_vm0, %v6348_v61  ;;  %v6380_v62 = vadd.f32 %v334_v38, %v318_v52  ;;  %v272_v50 = vmul.f32 %v5697_v47, %v7776_v6  ;;  %v288_v34 = vmul.f32 %v5681_v63, %v7777_v22  ;;  %v320_v48 = vmul.f32 %v5681_v63, %v7776_v6 }
 0x16e   : > { %4840 = vmatmul.mubr.msk.f32.gmra.mrb[2].mxu1 %vm217_vm0, %v6364_v39  ;;  %4814 = vmatprep.mubr.msk.f32.mxu0 %vm217_vm0, %v6370_v42  ;;  %v6392_v32 = vsub.f32 %v271_v37, %v287_v41  ;;  %v6394_v55 = vadd.f32 %v335_v15, %v319_v54  ;;  %v336_v52 = vmul.f32 %v5697_v47, %v7777_v22 }
 0x16f   : > { %4842 = vmatprep.mubr.msk.f32.mxu1 %vm217_vm0, %v6380_v62  ;;  %v6400_v38 = vsub.f32 %v272_v50, %v288_v34  ;;  %v273_v58 = vmul.f32 %v5693_v29, %v7768_v7  ;;  %v289_v36 = vmul.f32 %v5677_v14, %v6003_v23  ;;  %v321_v37 = vmul.f32 %v5677_v14, %v7768_v7 }
 0x170   : > { %v6408_v41 = vadd.f32 %v336_v52, %v320_v48  ;;  %v337_v54 = vmul.f32 %v5693_v29, %v6003_v23  ;;  %v274_v15 = vmul.f32 %v5689_v46, %v7785_v8  ;;  %v290_v34 = vmul.f32 %v5673_v31, %v7786_v24 }
 0x171   : > { %4815 = vmatmul.mubr.msk.f32.gmra.mrb[4].mxu0 %vm217_vm0, %v6392_v32  ;;  %v6416_v50 = vsub.f32 %v273_v58, %v289_v36  ;;  %v322_v57 = vmul.f32 %v5673_v31, %v7785_v8  ;;  %v338_v48 = vmul.f32 %v5689_v46, %v7786_v24  ;;  %v276_v58 = vmul.f32 %v5689_v46, %v7787_v10 }
 0x172   : > { %4843 = vmatmul.mubr.msk.f32.gmra.mrb[4].mxu1 %vm217_vm0, %v6394_v55  ;;  %4817 = vmatprep.mubr.msk.f32.mxu0 %vm217_vm0, %v6400_v38  ;;  %v6428_v52 = vadd.f32 %v337_v54, %v321_v37  ;;  %v6434_v36 = vsub.f32 %v274_v15, %v290_v34  ;;  %v275_v33 = vmul.f32 %v5685_v45, %v7779_v9 }
 0x173   : > { %4845 = vmatprep.mubr.msk.f32.mxu1 %vm217_vm0, %v6408_v41  ;;  %v6436_v44 = vadd.f32 %v338_v48, %v322_v57  ;;  %v291_v35 = vmul.f32 %v5669_v30, %v7780_v25  ;;  %v323_v37 = vmul.f32 %v5669_v30, %v7779_v9  ;;  %v339_v54 = vmul.f32 %v5685_v45, %v7780_v25 }
 0x174   : > { %v292_v15 = vmul.f32 %v5673_v31, %v7788_v26  ;;  %v324_v57 = vmul.f32 %v5673_v31, %v7787_v10  ;;  %v340_v34 = vmul.f32 %v5689_v46, %v7788_v26  ;;  %v277_v48 = vmul.f32 %v5685_v45, %v7781_v11 }
 0x175   : > { %4818 = vmatmul.mubr.msk.f32.gmra.mrb[6].mxu0 %vm217_vm0, %v6416_v50  ;;  %v6460_v63 = vsub.f32 %v275_v33, %v291_v35  ;;  %v6462_v47 = vadd.f32 %v339_v54, %v323_v37  ;;  %v293_v14 = vmul.f32 %v5669_v30, %v7782_v27  ;;  %v325_v29 = vmul.f32 %v5669_v30, %v7781_v11 }
 0x176   : > { %4846 = vmatmul.mubr.msk.f32.gmra.mrb[6].mxu1 %vm217_vm0, %v6428_v52  ;;  %4820 = vmatprep.mubr.msk.f32.mxu0 %vm217_vm0, %v6434_v36  ;;  %v6468_v26 = vsub.f32 %v276_v58, %v292_v15  ;;  %v356_v10 = vadd.f32 %v340_v34, %v324_v57  ;;  %v341_v24 = vmul.f32 %v5685_v45, %v7782_v27 }
 0x177   : > { %4848 = vmatprep.mubr.msk.f32.mxu1 %vm217_vm0, %v6436_v44  ;;  %v309_v8 = vsub.f32 %v277_v48, %v293_v14  ;;  %v278_v33 = vmul.f32 %v5689_v46, %v7784_v12  ;;  %v294_v35 = vmul.f32 %v5673_v31, %v7783_v28  ;;  %v326_v37 = vmul.f32 %v5673_v31, %v7784_v12  ;;  %v7819_v14 = vld [vmem:[#allocation45_spill] sm:$0xff] }
 0x178   : > { %v357_v58 = vadd.f32 %v341_v24, %v325_v29  ;;  %v342_v54 = vmul.f32 %v5689_v46, %v7783_v28  ;;  %v279_v15 = vmul.f32 %v5685_v45, %v7778_v13  ;;  %v7820_v48 = vmov %v7819_v14  ;;  %v7821_v28 = vld [vmem:[#allocation31_spill] sm:$0xff] }
 0x179   : > { %4821 = vmatmul.mubr.msk.f32.gmra.mrb[8].mxu0 %vm217_vm0, %v6460_v63  ;;  %v295_v57 = vmul.f32 %v5669_v30, %v7819_v14  ;;  %v310_v34 = vsub.f32 %v278_v33, %v294_v35  ;;  %v327_v12 = vmul.f32 %v5669_v30, %v7778_v13  ;;  %v343_v24 = vmul.f32 %v5685_v45, %v7820_v48  ;;  %v7822_v14 = vld [vmem:[#allocation46_spill] sm:$0xff]  ;;  %v7824_v48 = vld [vmem:[#allocation32_spill] sm:$0xff] }
 0x17a   : > { %4849 = vmatmul.mubr.msk.f32.gmra.mrb[8].mxu1 %vm217_vm0, %v6462_v47  ;;  %4823 = vmatprep.mubr.msk.f32.mxu0 %vm217_vm0, %v6468_v26  ;;  %v358_v29 = vadd.f32 %v342_v54, %v326_v37  ;;  %v280_v27 = vmul.f32 %v5689_v46, %v7821_v28  ;;  %v7823_v11 = vmov %v7822_v14  ;;  %v296_v25 = vmul.f32 %v5673_v31, %v7822_v14  ;;  %v7825_v37 = vld [vmem:[#allocation47_spill] sm:$0xff] }
 0x17b   : > { %4851 = vmatprep.mubr.msk.f32.mxu1 %vm217_vm0, %v356_v10  ;;  %v328_v9 = vmul.f32 %v5673_v31, %v7821_v28  ;;  %v344_v33 = vmul.f32 %v5689_v46, %v7823_v11  ;;  %v311_v35 = vsub.f32 %v279_v15, %v295_v57  ;;  %v359_v13 = vadd.f32 %v343_v24, %v327_v12 }
 0x17c   : > { %v281_v22 = vmul.f32 %v5685_v45, %v7824_v48  ;;  %v7826_v54 = vmov %v7825_v37  ;;  %v297_v6 = vmul.f32 %v5669_v30, %v7825_v37  ;;  %v312_v14 = vsub.f32 %v280_v27, %v296_v25  ;;  %v7829_v37 = vld [vmem:[#allocation74_spill] sm:$0xff] }
 0x17d   : > { %4824 = vmatmul.mubr.msk.f32.gmra.mrb[10].mxu0 %vm217_vm0, %v309_v8  ;;  %v329_v31 = vmul.f32 %v5669_v30, %v7824_v48  ;;  %v345_v46 = vmul.f32 %v5685_v45, %v7826_v54  ;;  %v360_v12 = vadd.f32 %v344_v33, %v328_v9  ;;  %v748_v57 = vadd.f32 %v6318_v53, %v6310_v49 }
 0x17e   : > { %4852 = vmatmul.mubr.msk.f32.gmra.mrb[10].mxu1 %vm217_vm0, %v357_v58  ;;  %4826 = vmatprep.mubr.msk.f32.mxu0 %vm217_vm0, %v310_v34  ;;  %v313_v15 = vsub.f32 %v281_v22, %v297_v6  ;;  %v749_v27 = vadd.f32 %v6338_v56, %v6328_v40  ;;  %v750_v6 = vadd.f32 %v6346_v51, %v6340_v60 }
 0x17f   : > { %4854 = vmatprep.mubr.msk.f32.mxu1 %vm217_vm0, %v358_v29  ;;  %v361_v25 = vadd.f32 %v345_v46, %v329_v31  ;;  %v751_v9 = vadd.f32 %v6364_v39, %v6348_v61  ;;  %v752_v22 = vadd.f32 %v6380_v62, %v6370_v42  ;;  %v753_v49 = vadd.f32 %v6394_v55, %v6392_v32 }
 0x180   : > { %v754_v53 = vadd.f32 %v6408_v41, %v6400_v38  ;;  %v755_v56 = vadd.f32 %v6428_v52, %v6416_v50  ;;  %v756_v60 = vadd.f32 %v6436_v44, %v6434_v36  ;;  %v757_v61 = vadd.f32 %v6462_v47, %v6460_v63 }
 0x181   : > { %4827 = vmatmul.mubr.msk.f32.gmra.mrb[12].mxu0 %vm217_vm0, %v311_v35  ;;  %v758_v31 = vadd.f32 %v356_v10, %v6468_v26  ;;  %v759_v46 = vadd.f32 %v357_v58, %v309_v8  ;;  %v760_v32 = vadd.f32 %v358_v29, %v310_v34  ;;  %v761_v55 = vadd.f32 %v359_v13, %v311_v35  ;;  %v7827_v10 = vld [vmem:[#allocation72_spill] sm:$0xff]  ;;  %v7828_v26 = vld [vmem:[#allocation73_spill] sm:$0xff] }
 0x182   : > { %4855 = vmatmul.mubr.msk.f32.gmra.mrb[12].mxu1 %vm217_vm0, %v359_v13  ;;  %4829 = vmatprep.mubr.msk.f32.mxu0 %vm217_vm0, %v312_v14  ;;  %v762_v44 = vadd.f32 %v360_v12, %v312_v14  ;;  %v763_v40 = vadd.f32 %v361_v25, %v313_v15  ;;  %v6562_v63 = vpack.c.bf16 %v7828_v26, %v7827_v10  ;;  %v7830_v14 = vld [vmem:[#allocation75_spill] sm:$0xff] }
 0x183   : > { %4857 = vmatprep.mubr.msk.f32.mxu1 %vm217_vm0, %v360_v12  ;;  %v6604_v12 = vpack.c.bf16 %v7830_v14, %v7829_v37 }
 0x184   : > { %5153 = vmatprep.subr.bf16.mxu1 %v6562_v63 }
 0x185   : > { %4830 = vmatmul.mubr.msk.f32.gmra.mrb[14].mxu0 %vm217_vm0, %v313_v15  ;;  %5155 = vmatpush3.bf16.msra.mxu1 %v6562_v63  ;;  %v7831_v15 = vld [vmem:[#allocation76_spill] sm:$0xff] }
 0x186   : > { %4858 = vmatmul.mubr.msk.f32.gmra.mrb[14].mxu1 %vm217_vm0, %v361_v25  ;;  %4864 = vmatprep.mubr.msk.f32.mxu0 %vm217_vm0, %v748_v57  ;;  %v7832_v57 = vld [vmem:[#allocation77_spill] sm:$0xff] }
 0x187   : > { %v6608_v25 = vpack.c.bf16 %v7832_v57, %v7831_v15  ;;  %5157 = vmatprep.subr.bf16.mxu0 %v6604_v12 }
 0x189   : > { %4865 = vmatmul.mubr.msk.f32.vlgmr.msra.gmra.mrb[16].mxu0 %vm217_vm0, %v749_v27  ;;  %5161 = vmatprep.subr.bf16.mxu1 %v6608_v25 }
 0x18a   : > { %4867 = vmatprep.mubr.msk.f32.mxu0 %vm217_vm0, %v750_v6  ;;  %5159 = vmatpush3.bf16.msra.mxu0 %v6604_v12 }
 0x18b   : > { %5165 = vmatprep.subr.bf16.mxu0 %v6562_v63 }
 0x18d   : > { %4868 = vmatmul.mubr.msk.f32.gmra.mrb[18].mxu0 %vm217_vm0, %v751_v9 }
 0x18e   : > { %4870 = vmatprep.mubr.msk.f32.mxu0 %vm217_vm0, %v752_v22 }
 0x191   : > { %4871 = vmatmul.mubr.msk.f32.gmra.mrb[20].mxu0 %vm217_vm0, %v753_v49 }
 0x192   : > { %4873 = vmatprep.mubr.msk.f32.mxu0 %vm217_vm0, %v754_v53 }
 0x195   : > { %4874 = vmatmul.mubr.msk.f32.gmra.mrb[22].mxu0 %vm217_vm0, %v755_v56 }
 0x196   : > { %4876 = vmatprep.mubr.msk.f32.mxu0 %vm217_vm0, %v756_v60 }
 0x199   : > { %4877 = vmatmul.mubr.msk.f32.gmra.mrb[24].mxu0 %vm217_vm0, %v757_v61 }
 0x19a   : > { %4879 = vmatprep.mubr.msk.f32.mxu0 %vm217_vm0, %v758_v31 }
 0x19d   : > { %4880 = vmatmul.mubr.msk.f32.gmra.mrb[26].mxu0 %vm217_vm0, %v759_v46 }
 0x19e   : > { %4882 = vmatprep.mubr.msk.f32.mxu0 %vm217_vm0, %v760_v32 }
 0x1a1   : > { %4883 = vmatmul.mubr.msk.f32.gmra.mrb[28].mxu0 %vm217_vm0, %v761_v55 }
 0x1a2   : > { %4885 = vmatprep.mubr.msk.f32.mxu0 %vm217_vm0, %v762_v44 }
 0x1a5   : > { %4886 = vmatmul.mubr.msk.f32.gmra.mrb[30].mxu0 %vm217_vm0, %v763_v40 }
 0x23c   : > { %v6566_v8 = vpop.f32.mrb[0].mxu0 }
 0x23d   : > { %v6568_v13 = vpop.f32.mrb[0].mxu1  ;;  %v6570_v47 = vpop.f32.mrb[1].mxu0 }
 0x23e   : > { %v6572_v51 = vpop.f32.mrb[1].mxu1  ;;  %v958_v39 = vsub.f32 %v6566_v8, %v6568_v13 }
 0x23f   : > { %v957_v42 = vsub.f32 %v6570_v47, %v6572_v51 }
 0x240   : > { %v6578_v62 = vpop.f32.mrb[2].mxu0 }
 0x241   : > { %v6580_v38 = vpop.f32.mrb[2].mxu1  ;;  %1005 = vxpose.xlu0.b32.start [1/2] (short) (narrow) %v957_v42, 16  ;;  %v6582_v41 = vpop.f32.mrb[3].mxu0 }
 0x242   : > { %v6584_v50 = vpop.f32.mrb[3].mxu1  ;;  %v960_v52 = vsub.f32 %v6578_v62, %v6580_v38 }
 0x243   : > { %v959_v36 = vsub.f32 %v6582_v41, %v6584_v50 }
 0x244   : > { %v6590_v58 = vpop.f32.mrb[4].mxu0 }
 0x245   : > { %v6592_v34 = vpop.f32.mrb[4].mxu1  ;;  %1006 = vxpose.xlu0.b32.end [2/2] (short) (narrow) %v958_v39, 16  ;;  %1037 = vxpose.xlu1.b32.start [1/2] (short) (narrow) %v959_v36, 16  ;;  %v6594_v24 = vpop.f32.mrb[5].mxu0 }
 0x246   : > { %v962_v29 = vsub.f32 %v6590_v58, %v6592_v34  ;;  %v6598_v33 = vpop.f32.mrb[5].mxu1 }
 0x247   : > { %v961_v35 = vsub.f32 %v6594_v24, %v6598_v33 }
 0x248   : > { %v6610_v27 = vpop.f32.mrb[6].mxu0 }
 0x249   : > { %v6612_v6 = vpop.f32.mrb[6].mxu1  ;;  %1038 = vxpose.xlu1.b32.end [2/2] (short) (narrow) %v960_v52, 16  ;;  %1069 = vxpose.xlu0.b32.start [1/2] (short) (narrow) %v961_v35, 16  ;;  %v6614_v9 = vpop.f32.mrb[7].mxu0 }
 0x24a   : > { %v964_v22 = vsub.f32 %v6610_v27, %v6612_v6  ;;  %v6618_v49 = vpop.f32.mrb[7].mxu1 }
 0x24b   : > { %v963_v53 = vsub.f32 %v6614_v9, %v6618_v49 }
 0x24c   : > { %v6625_v56 = vpop.f32.mrb[8].mxu0 }
 0x24d   : > { %1070 = vxpose.xlu0.b32.end [2/2] (short) (narrow) %v962_v29, 16  ;;  %1101 = vxpose.xlu1.b32.start [1/2] (short) (narrow) %v963_v53, 16  ;;  %v6628_v60 = vpop.f32.mrb[8].mxu1  ;;  %v6630_v61 = vpop.f32.mrb[9].mxu0 }
 0x24e   : > { %v966_v31 = vsub.f32 %v6625_v56, %v6628_v60  ;;  %v6634_v46 = vpop.f32.mrb[9].mxu1 }
 0x24f   : > { %v965_v32 = vsub.f32 %v6630_v61, %v6634_v46 }
 0x250   : > { %v6638_v55 = vpop.f32.mrb[10].mxu0 }
 0x251   : > { %1102 = vxpose.xlu1.b32.end [2/2] (short) (narrow) %v964_v22, 16  ;;  %v6640_v44 = vpop.f32.mrb[10].mxu1  ;;  %1133 = vxpose.xlu0.b32.start [1/2] (short) (narrow) %v965_v32, 16  ;;  %v6642_v40 = vpop.f32.mrb[11].mxu0 }
 0x252   : > { %v968_v10 = vsub.f32 %v6638_v55, %v6640_v44  ;;  %v6646_v26 = vpop.f32.mrb[11].mxu1 }
 0x253   : > { %v967_v39 = vsub.f32 %v6642_v40, %v6646_v26 }
 0x254   : > { %v6650_v42 = vpop.f32.mrb[12].mxu0 }
 0x255   : > { %v6652_v52 = vpop.f32.mrb[12].mxu1  ;;  %1134 = vxpose.xlu0.b32.end [2/2] (short) (narrow) %v966_v31, 16  ;;  %1165 = vxpose.xlu1.b32.start [1/2] (short) (narrow) %v967_v39, 16  ;;  %v6654_v36 = vpop.f32.mrb[13].mxu0 }
 0x256   : > { %v970_v29 = vsub.f32 %v6650_v42, %v6652_v52  ;;  %v6658_v35 = vpop.f32.mrb[13].mxu1 }
 0x257   : > { %v969_v37 = vsub.f32 %v6654_v36, %v6658_v35 }
 0x258   : > { %v6662_v14 = vpop.f32.mrb[14].mxu0 }
 0x259   : > { %v6664_v15 = vpop.f32.mrb[14].mxu1  ;;  %1166 = vxpose.xlu1.b32.end [2/2] (short) (narrow) %v968_v10, 16  ;;  %1197 = vxpose.xlu0.b32.start [1/2] (short) (narrow) %v969_v37, 16  ;;  %v6666_v57 = vpop.f32.mrb[15].mxu0 }
 0x25a   : > { %v972_v22 = vsub.f32 %v6662_v14, %v6664_v15  ;;  %v6670_v53 = vpop.f32.mrb[15].mxu1 }
 0x25b   : > { %v971_v31 = vsub.f32 %v6666_v57, %v6670_v53 }
 0x25c   : > { %v4866_v32 = vpop.f32.mrb[16].mxu0 }
 0x25d   : > { %1198 = vxpose.xlu0.b32.end [2/2] (short) (narrow) %v970_v29, 16  ;;  %1229 = vxpose.xlu1.b32.start [1/2] (short) (narrow) %v971_v31, 16  ;;  %v974_v39 = vsub.f32 %v4866_v32, %v6566_v8  ;;  %v878_v30 = vpop.f32.mrb[17].mxu0 }
 0x25e   : > { %v973_v45 = vsub.f32 %v878_v30, %v6570_v47 }
 0x25f   : > { %v990_v10 = vsub.f32 %v974_v39, %v6568_v13 }
 0x260   : > { %v4869_v37 = vpop.f32.mrb[18].mxu0  ;;  %v989_v11 = vsub.f32 %v973_v45, %v6572_v51 }
 0x261   : > { %1230 = vxpose.xlu1.b32.end [2/2] (short) (narrow) %v972_v22, 16  ;;  %v976_v28 = vsub.f32 %v4869_v37, %v6578_v62  ;;  %v888_v54 = vpop.f32.mrb[19].mxu0 }
 0x262   : > { %v975_v48 = vsub.f32 %v888_v54, %v6582_v41  ;;  %1261 = vxpose.xlu0.b32.start [1/2] (short) (narrow) %v989_v11, 16 }
 0x263   : > { %v992_v29 = vsub.f32 %v976_v28, %v6580_v38 }
 0x264   : > { %v4872_v31 = vpop.f32.mrb[20].mxu0  ;;  %v991_v8 = vsub.f32 %v975_v48, %v6584_v50 }
 0x265   : > { %v978_v32 = vsub.f32 %v4872_v31, %v6590_v58  ;;  %v898_v30 = vpop.f32.mrb[21].mxu0 }
 0x266   : > { %v977_v13 = vsub.f32 %v898_v30, %v6594_v24  ;;  %1262 = vxpose.xlu0.b32.end [2/2] (short) (narrow) %v990_v10, 16  ;;  %1293 = vxpose.xlu1.b32.start [1/2] (short) (narrow) %v991_v8, 16 }
 0x267   : > { %v994_v45 = vsub.f32 %v978_v32, %v6592_v34 }
 0x268   : > { %v4875_v47 = vpop.f32.mrb[22].mxu0  ;;  %v993_v51 = vsub.f32 %v977_v13, %v6598_v33 }
 0x269   : > { %v980_v54 = vsub.f32 %v4875_v47, %v6610_v27  ;;  %v908_v11 = vpop.f32.mrb[23].mxu0 }
 0x26a   : > { %v979_v28 = vsub.f32 %v908_v11, %v6614_v9  ;;  %1294 = vxpose.xlu1.b32.end [2/2] (short) (narrow) %v992_v29, 16  ;;  %1325 = vxpose.xlu0.b32.start [1/2] (short) (narrow) %v993_v51, 16 }
 0x26b   : > { %v996_v48 = vsub.f32 %v980_v54, %v6612_v6 }
 0x26c   : > { %v4878_v62 = vpop.f32.mrb[24].mxu0  ;;  %v995_v38 = vsub.f32 %v979_v28, %v6618_v49 }
 0x26d   : > { %v982_v41 = vsub.f32 %v4878_v62, %v6625_v56  ;;  %v918_v50 = vpop.f32.mrb[25].mxu0 }
 0x26e   : > { %v981_v58 = vsub.f32 %v918_v50, %v6630_v61  ;;  %1326 = vxpose.xlu0.b32.end [2/2] (short) (narrow) %v994_v45, 16  ;;  %1357 = vxpose.xlu1.b32.start [1/2] (short) (narrow) %v995_v38, 16 }
 0x26f   : > { %v998_v34 = vsub.f32 %v982_v41, %v6628_v60 }
 0x270   : > { %v4881_v24 = vpop.f32.mrb[26].mxu0  ;;  %v997_v33 = vsub.f32 %v981_v58, %v6634_v46 }
 0x271   : > { %v984_v27 = vsub.f32 %v4881_v24, %v6638_v55  ;;  %v928_v9 = vpop.f32.mrb[27].mxu0 }
 0x272   : > { %v983_v6 = vsub.f32 %v928_v9, %v6642_v40  ;;  %1358 = vxpose.xlu1.b32.end [2/2] (short) (narrow) %v996_v48, 16  ;;  %1389 = vxpose.xlu0.b32.start [1/2] (short) (narrow) %v997_v33, 16 }
 0x273   : > { %v1000_v49 = vsub.f32 %v984_v27, %v6640_v44 }
 0x274   : > { %v4884_v56 = vpop.f32.mrb[28].mxu0  ;;  %v999_v22 = vsub.f32 %v983_v6, %v6646_v26 }
 0x275   : > { %v986_v61 = vsub.f32 %v4884_v56, %v6650_v42  ;;  %v938_v39 = vpop.f32.mrb[29].mxu0 }
 0x276   : > { %v985_v60 = vsub.f32 %v938_v39, %v6654_v36  ;;  %1390 = vxpose.xlu0.b32.end [2/2] (short) (narrow) %v998_v34, 16  ;;  %1421 = vxpose.xlu1.b32.start [1/2] (short) (narrow) %v999_v22, 16 }
 0x277   : > { %v1002_v46 = vsub.f32 %v986_v61, %v6652_v52 }
 0x278   : > { %v4887_v55 = vpop.f32.mrb[30].mxu0  ;;  %v1001_v10 = vsub.f32 %v985_v60, %v6658_v35 }
 0x279   : > { %v988_v40 = vsub.f32 %v4887_v55, %v6662_v14  ;;  %v948_v37 = vpop.f32.mrb[31].mxu0 }
 0x27a   : > { %v987_v44 = vsub.f32 %v948_v37, %v6666_v57  ;;  %1422 = vxpose.xlu1.b32.end [2/2] (short) (narrow) %v1000_v49, 16  ;;  %1453 = vxpose.xlu0.b32.start [1/2] (short) (narrow) %v1001_v10, 16 }
 0x27b   : > { %v1004_v26 = vsub.f32 %v988_v40, %v6664_v15 }
 0x27c   : > { %v1003_v42 = vsub.f32 %v987_v44, %v6670_v53 }
 0x27e   : > { %1454 = vxpose.xlu0.b32.end [2/2] (short) (narrow) %v1002_v46, 16  ;;  %1485 = vxpose.xlu1.b32.start [1/2] (short) (narrow) %v1003_v42, 16 }
 0x282   : > { %1486 = vxpose.xlu1.b32.end [2/2] (short) (narrow) %v1004_v26, 16 }
 0x2c1   : > { %v1021_v36 = vpop.trf.xlu0 }
 0x2c2   : > { %4892 = vmatprep.mubr.msk.f32.mxu1 %vm217_vm0, %v1021_v36 }
 0x2c5   : > { %v1022_v52 = vpop.trf.xlu0  ;;  %v1053_v29 = vpop.trf.xlu1 }
 0x2c6   : > { %4893 = vmatmul.mubr.msk.f32.vlgmr.msra.gmra.mrb[16].mxu1 %vm217_vm0, %v1022_v52 }
 0x2c7   : > { %4895 = vmatprep.mubr.msk.f32.mxu1 %vm217_vm0, %v1053_v29  ;;  %5163 = vmatpush3.bf16.msra.mxu1 %v6608_v25 }
 0x2c8   : > { %5169 = vmatprep.subr.bf16.mxu1 %v6604_v12 }
 0x2c9   : > { %v1054_v35 = vpop.trf.xlu1  ;;  %v1085_v14 = vpop.trf.xlu0 }
 0x2ca   : > { %4896 = vmatmul.mubr.msk.f32.gmra.mrb[18].mxu1 %vm217_vm0, %v1054_v35 }
 0x2cb   : > { %4898 = vmatprep.mubr.msk.f32.mxu1 %vm217_vm0, %v1085_v14 }
 0x2cd   : > { %v1086_v15 = vpop.trf.xlu0  ;;  %v1117_v57 = vpop.trf.xlu1 }
 0x2ce   : > { %4899 = vmatmul.mubr.msk.f32.gmra.mrb[20].mxu1 %vm217_vm0, %v1086_v15 }
 0x2cf   : > { %4901 = vmatprep.mubr.msk.f32.mxu1 %vm217_vm0, %v1117_v57 }
 0x2d1   : > { %v1118_v53 = vpop.trf.xlu1  ;;  %v1149_v31 = vpop.trf.xlu0 }
 0x2d2   : > { %4902 = vmatmul.mubr.msk.f32.gmra.mrb[22].mxu1 %vm217_vm0, %v1118_v53 }
 0x2d3   : > { %4904 = vmatprep.mubr.msk.f32.mxu1 %vm217_vm0, %v1149_v31 }
 0x2d5   : > { %v1150_v25 = vpop.trf.xlu0  ;;  %v1181_v8 = vpop.trf.xlu1 }
 0x2d6   : > { %4905 = vmatmul.mubr.msk.f32.gmra.mrb[24].mxu1 %vm217_vm0, %v1150_v25 }
 0x2d7   : > { %4907 = vmatprep.mubr.msk.f32.mxu1 %vm217_vm0, %v1181_v8 }
 0x2d9   : > { %v1182_v32 = vpop.trf.xlu1  ;;  %v1213_v30 = vpop.trf.xlu0 }
 0x2da   : > { %4908 = vmatmul.mubr.msk.f32.gmra.mrb[26].mxu1 %vm217_vm0, %v1182_v32 }
 0x2db   : > { %4910 = vmatprep.mubr.msk.f32.mxu1 %vm217_vm0, %v1213_v30 }
 0x2dd   : > { %v6721_v13 = vpop.trf.xlu0  ;;  %v6723_v45 = vpop.trf.xlu1 }
 0x2de   : > { %4911 = vmatmul.mubr.msk.f32.gmra.mrb[28].mxu1 %vm217_vm0, %v6721_v13 }
 0x2df   : > { %4913 = vmatprep.mubr.msk.f32.mxu1 %vm217_vm0, %v6723_v45 }
 0x2e1   : > { %v6729_v47 = vpop.trf.xlu1 }
 0x2e2   : > { %4914 = vmatmul.mubr.msk.f32.gmra.mrb[30].mxu1 %vm217_vm0, %v6729_v47  ;;  %v1277_v51 = vpop.trf.xlu0 }
 0x2e3   : > { %v1903_v54 = vadd.f32 %v1277_v51, %v1021_v36  ;;  %4920 = vmatprep.mubr.msk.f32.mxu0 %vm217_vm0, %v1277_v51  ;;  %v7833_v36 = vld [vmem:[#allocation78_spill] sm:$0xff] }
 0x2e5   : > { %4948 = vmatprep.mubr.msk.f32.mxu1 %vm217_vm0, %v1903_v54 }
 0x2e6   : > { %v1278_v11 = vpop.trf.xlu0  ;;  %v1309_v28 = vpop.trf.xlu1 }
 0x2e7   : > { %v1904_v48 = vadd.f32 %v1278_v11, %v1022_v52  ;;  %v1905_v62 = vadd.f32 %v1309_v28, %v1053_v29  ;;  %4921 = vmatmul.mubr.msk.f32.vlgmr.msra.gmra.mrb[32].mxu0 %vm217_vm0, %v1278_v11  ;;  %v7834_v52 = vld [vmem:[#allocation80_spill] sm:$0xff] }
 0x2e8   : > { %4923 = vmatprep.mubr.msk.f32.mxu0 %vm217_vm0, %v1309_v28  ;;  %5167 = vmatpush3.bf16.msra.mxu0 %v6562_v63  ;;  %v5172_v29 = vpack.c.bf16 %v7834_v52, %v7833_v36  ;;  %v7839_v36 = vld [vmem:[#allocation51_spill] sm:$0xff] }
 0x2e9   : > { %4949 = vmatmul.mubr.msk.f32.vlgmr.msra.gmra.mrb[32].mxu1 %vm217_vm0, %v1904_v48  ;;  %v7840_v52 = vmov %v7839_v36 }
 0x2ea   : > { %4951 = vmatprep.mubr.msk.f32.mxu1 %vm217_vm0, %v1905_v62  ;;  %v1310_v38 = vpop.trf.xlu1  ;;  %v1341_v41 = vpop.trf.xlu0  ;;  %5171 = vmatpush3.bf16.msra.mxu1 %v6604_v12 }
 0x2eb   : > { %v1906_v50 = vadd.f32 %v1310_v38, %v1054_v35  ;;  %v1907_v58 = vadd.f32 %v1341_v41, %v1085_v14  ;;  %4924 = vmatmul.mubr.msk.f32.gmra.mrb[34].mxu0 %vm217_vm0, %v1310_v38  ;;  %5177 = vmatprep.subr.bf16.mxu1 %v6288_v59 }
 0x2ec   : > { %4926 = vmatprep.mubr.msk.f32.mxu0 %vm217_vm0, %v1341_v41  ;;  %5173 = vmatprep.subr.bf16.mxu0 %v5172_v29 }
 0x2ed   : > { %4952 = vmatmul.mubr.msk.f32.gmra.mrb[34].mxu1 %vm217_vm0, %v1906_v50 }
 0x2ee   : > { %4954 = vmatprep.mubr.msk.f32.mxu1 %vm217_vm0, %v1907_v58  ;;  %v1342_v63 = vpop.trf.xlu0  ;;  %v1373_v34 = vpop.trf.xlu1 }
 0x2ef   : > { %v1908_v24 = vadd.f32 %v1342_v63, %v1086_v15  ;;  %v1909_v33 = vadd.f32 %v1373_v34, %v1117_v57  ;;  %4927 = vmatmul.mubr.msk.f32.gmra.mrb[36].mxu0 %vm217_vm0, %v1342_v63  ;;  %v7835_v63 = vld [vmem:[#allocation48_spill] sm:$0xff] }
 0x2f0   : > { %4929 = vmatprep.mubr.msk.f32.mxu0 %vm217_vm0, %v1373_v34 }
 0x2f1   : > { %4955 = vmatmul.mubr.msk.f32.gmra.mrb[36].mxu1 %vm217_vm0, %v1908_v24  ;;  %v7836_v24 = vmov %v7835_v63 }
 0x2f2   : > { %4957 = vmatprep.mubr.msk.f32.mxu1 %vm217_vm0, %v1909_v33  ;;  %v1374_v12 = vpop.trf.xlu1  ;;  %v1405_v27 = vpop.trf.xlu0 }
 0x2f3   : > { %v1910_v9 = vadd.f32 %v1374_v12, %v1118_v53  ;;  %v1911_v6 = vadd.f32 %v1405_v27, %v1149_v31  ;;  %4930 = vmatmul.mubr.msk.f32.gmra.mrb[38].mxu0 %vm217_vm0, %v1374_v12 }
 0x2f4   : > { %4932 = vmatprep.mubr.msk.f32.mxu0 %vm217_vm0, %v1405_v27  ;;  %v7837_v27 = vld [vmem:[#allocation49_spill] sm:$0xff] }
 0x2f5   : > { %4958 = vmatmul.mubr.msk.f32.gmra.mrb[38].mxu1 %vm217_vm0, %v1910_v9 }
 0x2f6   : > { %4960 = vmatprep.mubr.msk.f32.mxu1 %vm217_vm0, %v1911_v6  ;;  %v1406_v49 = vpop.trf.xlu0  ;;  %v1437_v56 = vpop.trf.xlu1 }
 0x2f7   : > { %v1912_v22 = vadd.f32 %v1406_v49, %v1150_v25  ;;  %v1913_v61 = vadd.f32 %v1437_v56, %v1181_v8  ;;  %4933 = vmatmul.mubr.msk.f32.gmra.mrb[40].mxu0 %vm217_vm0, %v1406_v49 }
 0x2f8   : > { %4935 = vmatprep.mubr.msk.f32.mxu0 %vm217_vm0, %v1437_v56 }
 0x2f9   : > { %4961 = vmatmul.mubr.msk.f32.gmra.mrb[40].mxu1 %vm217_vm0, %v1912_v22 }
 0x2fa   : > { %4963 = vmatprep.mubr.msk.f32.mxu1 %vm217_vm0, %v1913_v61  ;;  %v1438_v39 = vpop.trf.xlu1  ;;  %v1469_v60 = vpop.trf.xlu0 }
 0x2fb   : > { %v1914_v46 = vadd.f32 %v1438_v39, %v1182_v32  ;;  %v1915_v55 = vadd.f32 %v1469_v60, %v1213_v30  ;;  %4936 = vmatmul.mubr.msk.f32.gmra.mrb[42].mxu0 %vm217_vm0, %v1438_v39 }
 0x2fc   : > { %4938 = vmatprep.mubr.msk.f32.mxu0 %vm217_vm0, %v1469_v60 }
 0x2fd   : > { %4964 = vmatmul.mubr.msk.f32.gmra.mrb[42].mxu1 %vm217_vm0, %v1914_v46 }
 0x2fe   : > { %4966 = vmatprep.mubr.msk.f32.mxu1 %vm217_vm0, %v1915_v55  ;;  %v1470_v10 = vpop.trf.xlu0  ;;  %v1501_v40 = vpop.trf.xlu1 }
 0x2ff   : > { %v1916_v37 = vadd.f32 %v1470_v10, %v6721_v13  ;;  %v1917_v44 = vadd.f32 %v1501_v40, %v6723_v45  ;;  %4939 = vmatmul.mubr.msk.f32.gmra.mrb[44].mxu0 %vm217_vm0, %v1470_v10 }
 0x300   : > { %4941 = vmatprep.mubr.msk.f32.mxu0 %vm217_vm0, %v1501_v40  ;;  %v7838_v40 = vld [vmem:[#allocation50_spill] sm:$0xff] }
 0x301   : > { %4967 = vmatmul.mubr.msk.f32.gmra.mrb[44].mxu1 %vm217_vm0, %v1916_v37 }
 0x302   : > { %4969 = vmatprep.mubr.msk.f32.mxu1 %vm217_vm0, %v1917_v44  ;;  %v1502_v26 = vpop.trf.xlu1 }
 0x303   : > { %v1918_v42 = vadd.f32 %v1502_v26, %v6729_v47  ;;  %4942 = vmatmul.mubr.msk.f32.gmra.mrb[46].mxu0 %vm217_vm0, %v1502_v26 }
 0x305   : > { %4970 = vmatmul.mubr.msk.f32.gmra.mrb[46].mxu1 %vm217_vm0, %v1918_v42 }
 0x399   : > { %v4894_v35 = vpop.f32.mrb[16].mxu1 }
 0x39a   : > { %v1631_v14 = vpop.f32.mrb[17].mxu1 }
 0x39d   : > { %v4897_v15 = vpop.f32.mrb[18].mxu1 }
 0x39e   : > { %v1641_v57 = vpop.f32.mrb[19].mxu1 }
 0x3a1   : > { %v6773_v53 = vpop.f32.mrb[20].mxu1 }
 0x3a2   : > { %v6775_v31 = vpop.f32.mrb[21].mxu1 }
 0x3a5   : > { %v6777_v25 = vpop.f32.mrb[22].mxu1 }
 0x3a6   : > { %v6779_v8 = vpop.f32.mrb[23].mxu1 }
 0x3a9   : > { %v6781_v32 = vpop.f32.mrb[24].mxu1 }
 0x3aa   : > { %v6783_v30 = vpop.f32.mrb[25].mxu1 }
 0x3ad   : > { %v6785_v13 = vpop.f32.mrb[26].mxu1 }
 0x3ae   : > { %v6787_v45 = vpop.f32.mrb[27].mxu1 }
 0x3b1   : > { %v6789_v47 = vpop.f32.mrb[28].mxu1 }
 0x3b2   : > { %v6791_v51 = vpop.f32.mrb[29].mxu1 }
 0x3b5   : > { %v6793_v54 = vpop.f32.mrb[30].mxu1 }
 0x3b6   : > { %v6795_v11 = vpop.f32.mrb[31].mxu1 }
 0x3ba   : > { %v4922_v28 = vpop.f32.mrb[32].mxu0 }
 0x3bb   : > { %v2113_v48 = vsub.f32 %v4894_v35, %v4922_v28  ;;  %v1824_v62 = vpop.f32.mrb[33].mxu0 }
 0x3bc   : > { %v2112_v38 = vsub.f32 %v1631_v14, %v1824_v62  ;;  %v4950_v41 = vpop.f32.mrb[32].mxu1 }
 0x3bd   : > { %v2129_v50 = vsub.f32 %v4950_v41, %v4894_v35  ;;  %v2033_v58 = vpop.f32.mrb[33].mxu1  ;;  %v2161_v9 = vmul.f32 %v2113_v48, %v7837_v27 }
 0x3be   : > { %v2160_v34 = vmul.f32 %v2112_v38, %v7835_v63  ;;  %v2128_v33 = vsub.f32 %v2033_v58, %v1631_v14  ;;  %v4925_v12 = vpop.f32.mrb[34].mxu0  ;;  %v7841_v63 = vld [vmem:[#allocation52_spill] sm:$0xff] }
 0x3bf   : > { %v2145_v6 = vsub.f32 %v2129_v50, %v4922_v28  ;;  %v2115_v49 = vsub.f32 %v4897_v15, %v4925_v12  ;;  %v1834_v56 = vpop.f32.mrb[35].mxu0 }
 0x3c0   : > { %v2144_v22 = vsub.f32 %v2128_v33, %v1824_v62  ;;  %v2114_v61 = vsub.f32 %v1641_v57, %v1834_v56  ;;  %v4953_v39 = vpop.f32.mrb[34].mxu1  ;;  %4976 = vmatprep.mubr.msk.f32.mxu0 %vm217_vm0, %v2160_v34 }
 0x3c1   : > { %v2177_v60 = vmul.f32 %v2145_v6, %v7837_v27  ;;  %v2131_v46 = vsub.f32 %v4953_v39, %v4897_v15  ;;  %v2043_v55 = vpop.f32.mrb[35].mxu1  ;;  %4977 = vmatmul.mubr.msk.f32.vlgmr.msra.gmra.mrb[48].mxu0 %vm217_vm0, %v2161_v9  ;;  %v2163_v35 = vmul.f32 %v2115_v49, %v7839_v36  ;;  %v7845_v36 = vld [vmem:[#allocation54_spill] sm:$0xff] }
 0x3c2   : > { %v2176_v10 = vmul.f32 %v2144_v22, %v7836_v24  ;;  %v2162_v37 = vmul.f32 %v2114_v61, %v7838_v40  ;;  %v2130_v44 = vsub.f32 %v2043_v55, %v1641_v57  ;;  %v4928_v26 = vpop.f32.mrb[36].mxu0  ;;  %5175 = vmatpush3.bf16.msra.mxu0 %v5172_v29 }
 0x3c3   : > { %v6804_v42 = vadd.f32 %v2177_v60, %v2161_v9  ;;  %v2147_v14 = vsub.f32 %v2131_v46, %v4925_v12  ;;  %v2117_v28 = vsub.f32 %v6773_v53, %v4928_v26  ;;  %v1844_v48 = vpop.f32.mrb[37].mxu0  ;;  %5181 = vmatprep.subr.bf16.mxu0 %v6292_v43  ;;  %v7842_v12 = vmov %v7841_v63 }
 0x3c4   : > { %v2146_v15 = vsub.f32 %v2130_v44, %v1834_v56  ;;  %v2116_v62 = vsub.f32 %v6775_v31, %v1844_v48  ;;  %v4956_v38 = vpop.f32.mrb[36].mxu1  ;;  %4979 = vmatprep.mubr.msk.f32.mxu0 %vm217_vm0, %v2162_v37  ;;  %5004 = vmatprep.mubr.msk.f32.mxu1 %vm217_vm0, %v2176_v10  ;;  %v6812_v57 = vadd.f32 %v2176_v10, %v2160_v34  ;;  %v7843_v34 = vld [vmem:[#allocation53_spill] sm:$0xff] }
 0x3c5   : > { %v2179_v29 = vmul.f32 %v2147_v14, %v7840_v52  ;;  %v2133_v41 = vsub.f32 %v4956_v38, %v6773_v53  ;;  %v2053_v50 = vpop.f32.mrb[37].mxu1  ;;  %4980 = vmatmul.mubr.msk.f32.gmra.mrb[50].mxu0 %vm217_vm0, %v2163_v35  ;;  %5005 = vmatmul.mubr.msk.f32.vlgmr.msra.gmra.mrb[48].mxu1 %vm217_vm0, %v2177_v60  ;;  %v7844_v49 = vmov %v7843_v34  ;;  %v2165_v56 = vmul.f32 %v2117_v28, %v7843_v34 }
 0x3c6   : > { %v2178_v58 = vmul.f32 %v2146_v15, %v7838_v40  ;;  %v2164_v33 = vmul.f32 %v2116_v62, %v7841_v63  ;;  %v2132_v9 = vsub.f32 %v2053_v50, %v6775_v31  ;;  %v4931_v6 = vpop.f32.mrb[38].mxu0  ;;  %5179 = vmatpush3.bf16.msra.mxu1 %v6288_v59  ;;  %v7846_v28 = vmov %v7845_v36  ;;  %v7847_v15 = vld [vmem:[#allocation55_spill] sm:$0xff] }
 0x3c7   : > { %v2149_v22 = vsub.f32 %v2133_v41, %v4928_v26  ;;  %v2119_v61 = vsub.f32 %v6777_v25, %v4931_v6  ;;  %v1854_v53 = vpop.f32.mrb[39].mxu0  ;;  %v6824_v39 = vadd.f32 %v2179_v29, %v2163_v35 }
 0x3c8   : > { %v2148_v46 = vsub.f32 %v2132_v9, %v1844_v48  ;;  %v2118_v60 = vsub.f32 %v6779_v8, %v1854_v53  ;;  %v4959_v55 = vpop.f32.mrb[38].mxu1  ;;  %4982 = vmatprep.mubr.msk.f32.mxu0 %vm217_vm0, %v2164_v33  ;;  %5007 = vmatprep.mubr.msk.f32.mxu1 %vm217_vm0, %v2178_v58  ;;  %v6829_v31 = vadd.f32 %v2178_v58, %v2162_v37 }
 0x3c9   : > { %v2181_v59 = vmul.f32 %v2149_v22, %v7844_v49  ;;  %v2135_v10 = vsub.f32 %v4959_v55, %v6777_v25  ;;  %v2063_v44 = vpop.f32.mrb[39].mxu1  ;;  %4983 = vmatmul.mubr.msk.f32.gmra.mrb[52].mxu0 %vm217_vm0, %v2165_v56  ;;  %5008 = vmatmul.mubr.msk.f32.gmra.mrb[50].mxu1 %vm217_vm0, %v2179_v29  ;;  %v2167_v62 = vmul.f32 %v2119_v61, %v7847_v15 }
 0x3ca   : > { %v2180_v26 = vmul.f32 %v2148_v46, %v7842_v12  ;;  %v2166_v35 = vmul.f32 %v2118_v60, %v7845_v36  ;;  %v2134_v14 = vsub.f32 %v2063_v44, %v6779_v8  ;;  %v4934_v48 = vpop.f32.mrb[40].mxu0  ;;  %v7850_v60 = vld [vmem:[#allocation57_spill] sm:$0xff] }
 0x3cb   : > { %v2151_v37 = vsub.f32 %v2135_v10, %v4931_v6  ;;  %v2121_v38 = vsub.f32 %v6781_v32, %v4934_v48  ;;  %v1864_v41 = vpop.f32.mrb[41].mxu0  ;;  %v6840_v50 = vadd.f32 %v2181_v59, %v2165_v56  ;;  %v7848_v56 = vld [vmem:[#allocation56_spill] sm:$0xff]  ;;  %v7851_v10 = vmov %v7850_v60 }
 0x3cc   : > { %v2150_v25 = vsub.f32 %v2134_v14, %v1854_v53  ;;  %v2120_v58 = vsub.f32 %v6783_v30, %v1864_v41  ;;  %v4962_v63 = vpop.f32.mrb[40].mxu1  ;;  %4985 = vmatprep.mubr.msk.f32.mxu0 %vm217_vm0, %v2166_v35  ;;  %5010 = vmatprep.mubr.msk.f32.mxu1 %vm217_vm0, %v2180_v26  ;;  %v6845_v29 = vadd.f32 %v2180_v26, %v2164_v33 }
 0x3cd   : > { %v2183_v8 = vmul.f32 %v2151_v37, %v7847_v15  ;;  %v2137_v9 = vsub.f32 %v4962_v63, %v6781_v32  ;;  %v2073_v6 = vpop.f32.mrb[41].mxu1  ;;  %4986 = vmatmul.mubr.msk.f32.gmra.mrb[54].mxu0 %vm217_vm0, %v2167_v62  ;;  %5011 = vmatmul.mubr.msk.f32.gmra.mrb[52].mxu1 %vm217_vm0, %v2181_v59  ;;  %v7849_v22 = vmov %v7848_v56  ;;  %v2169_v55 = vmul.f32 %v2121_v38, %v7850_v60 }
 0x3ce   : > { %v2182_v34 = vmul.f32 %v2150_v25, %v7846_v28  ;;  %v2168_v61 = vmul.f32 %v2120_v58, %v7848_v56  ;;  %v2136_v53 = vsub.f32 %v2073_v6, %v6783_v30  ;;  %v4937_v46 = vpop.f32.mrb[42].mxu0 }
 0x3cf   : > { %v2153_v33 = vsub.f32 %v2137_v9, %v4934_v48  ;;  %v2123_v44 = vsub.f32 %v6785_v13, %v4937_v46  ;;  %v1874_v26 = vpop.f32.mrb[43].mxu0  ;;  %v6856_v36 = vadd.f32 %v2183_v8, %v2167_v62  ;;  %v7853_v9 = vld [vmem:[#allocation59_spill] sm:$0xff] }
 0x3d0   : > { %v2152_v32 = vsub.f32 %v2136_v53, %v1864_v41  ;;  %v2122_v14 = vsub.f32 %v6787_v45, %v1874_v26  ;;  %v4965_v37 = vpop.f32.mrb[42].mxu1  ;;  %4988 = vmatprep.mubr.msk.f32.mxu0 %vm217_vm0, %v2168_v61  ;;  %5013 = vmatprep.mubr.msk.f32.mxu1 %vm217_vm0, %v2182_v34  ;;  %v6861_v59 = vadd.f32 %v2182_v34, %v2166_v35  ;;  %v7852_v41 = vld [vmem:[#allocation58_spill] sm:$0xff] }
 0x3d1   : > { %v2185_v30 = vmul.f32 %v2153_v33, %v7851_v10  ;;  %v2139_v38 = vsub.f32 %v4965_v37, %v6785_v13  ;;  %v2083_v48 = vpop.f32.mrb[43].mxu1  ;;  %4989 = vmatmul.mubr.msk.f32.gmra.mrb[56].mxu0 %vm217_vm0, %v2169_v55  ;;  %5014 = vmatmul.mubr.msk.f32.gmra.mrb[54].mxu1 %vm217_vm0, %v2183_v8  ;;  %v2171_v6 = vmul.f32 %v2123_v44, %v7853_v9 }
 0x3d2   : > { %v2184_v62 = vmul.f32 %v2152_v32, %v7849_v22  ;;  %v2170_v25 = vmul.f32 %v2122_v14, %v7852_v41  ;;  %v2138_v58 = vsub.f32 %v2083_v48, %v6787_v45  ;;  %v4940_v63 = vpop.f32.mrb[44].mxu0  ;;  %v7856_v48 = vld [vmem:[#allocation61_spill] sm:$0xff] }
 0x3d3   : > { %v2155_v35 = vsub.f32 %v2139_v38, %v4937_v46  ;;  %v2125_v34 = vsub.f32 %v6789_v47, %v4940_v63  ;;  %v1884_v56 = vpop.f32.mrb[45].mxu0  ;;  %v2587_v53 = vadd.f32 %v2185_v30, %v2169_v55  ;;  %v7854_v55 = vld [vmem:[#allocation60_spill] sm:$0xff] }
 0x3d4   : > { %v2154_v13 = vsub.f32 %v2138_v58, %v1874_v26  ;;  %v2124_v60 = vsub.f32 %v6791_v51, %v1884_v56  ;;  %v4968_v33 = vpop.f32.mrb[44].mxu1  ;;  %4991 = vmatprep.mubr.msk.f32.mxu0 %vm217_vm0, %v2170_v25  ;;  %5016 = vmatprep.mubr.msk.f32.mxu1 %vm217_vm0, %v2184_v62  ;;  %v2586_v8 = vadd.f32 %v2184_v62, %v2168_v61 }
 0x3d5   : > { %v2187_v32 = vmul.f32 %v2155_v35, %v7853_v9  ;;  %v2141_v45 = vsub.f32 %v4968_v33, %v6789_v47  ;;  %v2093_v14 = vpop.f32.mrb[45].mxu1  ;;  %4992 = vmatmul.mubr.msk.f32.gmra.mrb[58].mxu0 %vm217_vm0, %v2171_v6  ;;  %5017 = vmatmul.mubr.msk.f32.gmra.mrb[56].mxu1 %vm217_vm0, %v2185_v30  ;;  %v7855_v26 = vmov %v7854_v55  ;;  %v2173_v58 = vmul.f32 %v2125_v34, %v7856_v48 }
 0x3d6   : > { %v2186_v46 = vmul.f32 %v2154_v13, %v7852_v41  ;;  %v2172_v44 = vmul.f32 %v2124_v60, %v7854_v55  ;;  %v2140_v37 = vsub.f32 %v2093_v14, %v6791_v51  ;;  %v4943_v38 = vpop.f32.mrb[46].mxu0 }
 0x3d7   : > { %v2157_v10 = vsub.f32 %v2141_v45, %v4940_v63  ;;  %v2127_v61 = vsub.f32 %v6793_v54, %v4943_v38  ;;  %v1894_v62 = vpop.f32.mrb[47].mxu0  ;;  %v2589_v35 = vadd.f32 %v2187_v32, %v2171_v6  ;;  %v7857_v6 = vld [vmem:[#allocation62_spill] sm:$0xff]  ;;  %v7858_v45 = vld [vmem:[#allocation63_spill] sm:$0xff] }
 0x3d8   : > { %v2156_v47 = vsub.f32 %v2140_v37, %v1884_v56  ;;  %v2126_v33 = vsub.f32 %v6795_v11, %v1894_v62  ;;  %v4971_v9 = vpop.f32.mrb[46].mxu1  ;;  %4994 = vmatprep.mubr.msk.f32.mxu0 %vm217_vm0, %v2172_v44  ;;  %5019 = vmatprep.mubr.msk.f32.mxu1 %vm217_vm0, %v2186_v46  ;;  %v2588_v30 = vadd.f32 %v2186_v46, %v2170_v25 }
 0x3d9   : > { %v2189_v13 = vmul.f32 %v2157_v10, %v7856_v48  ;;  %v2143_v51 = vsub.f32 %v4971_v9, %v6793_v54  ;;  %v2103_v60 = vpop.f32.mrb[47].mxu1  ;;  %4995 = vmatmul.mubr.msk.f32.gmra.mrb[60].mxu0 %vm217_vm0, %v2173_v58  ;;  %5020 = vmatmul.mubr.msk.f32.gmra.mrb[58].mxu1 %vm217_vm0, %v2187_v32  ;;  %v7859_v12 = vmov %v7858_v45  ;;  %v2175_v14 = vmul.f32 %v2127_v61, %v7858_v45 }
 0x3da   : > { %v2188_v63 = vmul.f32 %v2156_v47, %v7855_v26  ;;  %v2174_v34 = vmul.f32 %v2126_v33, %v7857_v6  ;;  %v2142_v56 = vsub.f32 %v2103_v60, %v6795_v11 }
 0x3db   : > { %v2159_v55 = vsub.f32 %v2143_v51, %v4943_v38  ;;  %v2591_v37 = vadd.f32 %v2189_v13, %v2173_v58 }
 0x3dc   : > { %v2158_v25 = vsub.f32 %v2142_v56, %v1894_v62  ;;  %4997 = vmatprep.mubr.msk.f32.mxu0 %vm217_vm0, %v2174_v34  ;;  %5022 = vmatprep.mubr.msk.f32.mxu1 %vm217_vm0, %v2188_v63  ;;  %v2590_v54 = vadd.f32 %v2188_v63, %v2172_v44 }
 0x3dd   : > { %v2191_v10 = vmul.f32 %v2159_v55, %v7859_v12  ;;  %4998 = vmatmul.mubr.msk.f32.gmra.mrb[62].mxu0 %vm217_vm0, %v2175_v14  ;;  %5023 = vmatmul.mubr.msk.f32.gmra.mrb[60].mxu1 %vm217_vm0, %v2189_v13  ;;  %v7861_v13 = vld [vmem:[#allocation71_spill] sm:$0xff] }
 0x3de   : > { %v2190_v9 = vmul.f32 %v2158_v25, %v7857_v6  ;;  %5032 = vmatprep.mubr.msk.f32.mxu0 %vm217_vm0, %v6812_v57 }
 0x3df   : > { %v2593_v11 = vadd.f32 %v2191_v10, %v2175_v14 }
 0x3e0   : > { %5025 = vmatprep.mubr.msk.f32.mxu1 %vm217_vm0, %v2190_v9  ;;  %v2592_v32 = vadd.f32 %v2190_v9, %v2174_v34 }
 0x3e1   : > { %5026 = vmatmul.mubr.msk.f32.gmra.mrb[62].mxu1 %vm217_vm0, %v2191_v10  ;;  %5033 = vmatmul.mubr.msk.f32.vlgmr.msra.gmra.mrb[64].mxu0 %vm217_vm0, %v6804_v42 }
 0x3e2   : > { %5035 = vmatprep.mubr.msk.f32.mxu0 %vm217_vm0, %v6829_v31  ;;  %5183 = vmatpush3.bf16.msra.mxu0 %v6292_v43 }
 0x3e5   : > { %5036 = vmatmul.mubr.msk.f32.gmra.mrb[66].mxu0 %vm217_vm0, %v6824_v39 }
 0x3e6   : > { %5038 = vmatprep.mubr.msk.f32.mxu0 %vm217_vm0, %v6845_v29 }
 0x3e9   : > { %5039 = vmatmul.mubr.msk.f32.gmra.mrb[68].mxu0 %vm217_vm0, %v6840_v50 }
 0x3ea   : > { %5041 = vmatprep.mubr.msk.f32.mxu0 %vm217_vm0, %v6861_v59 }
 0x3ed   : > { %5042 = vmatmul.mubr.msk.f32.gmra.mrb[70].mxu0 %vm217_vm0, %v6856_v36 }
 0x3ee   : > { %5044 = vmatprep.mubr.msk.f32.mxu0 %vm217_vm0, %v2586_v8 }
 0x3f1   : > { %5045 = vmatmul.mubr.msk.f32.gmra.mrb[72].mxu0 %vm217_vm0, %v2587_v53 }
 0x3f2   : > { %5047 = vmatprep.mubr.msk.f32.mxu0 %vm217_vm0, %v2588_v30  ;;  %v7860_v30 = vld [vmem:[#allocation70_spill] sm:$0xff] }
 0x3f3   : > { %v6970_v51 = vpack.c.bf16 %v7861_v13, %v7860_v30 }
 0x3f5   : > { %5048 = vmatmul.mubr.msk.f32.gmra.mrb[74].mxu0 %vm217_vm0, %v2589_v35  ;;  %5185 = vmatprep.subr.bf16.mxu1 %v6970_v51 }
 0x3f6   : > { %5050 = vmatprep.mubr.msk.f32.mxu0 %vm217_vm0, %v2590_v54 }
 0x3f9   : > { %5051 = vmatmul.mubr.msk.f32.gmra.mrb[76].mxu0 %vm217_vm0, %v2591_v37 }
 0x3fa   : > { %5053 = vmatprep.mubr.msk.f32.mxu0 %vm217_vm0, %v2592_v32 }
 0x3fd   : > { %5054 = vmatmul.mubr.msk.f32.gmra.mrb[78].mxu0 %vm217_vm0, %v2593_v11 }
 0x494   : > { %v6928_v43 = vpop.f32.mrb[48].mxu0 }
 0x495   : > { %v6930_v42 = vpop.f32.mrb[49].mxu0 }
 0x498   : > { %v6932_v57 = vpop.f32.mrb[50].mxu0  ;;  %v6934_v39 = vpop.f32.mrb[48].mxu1 }
 0x499   : > { %v2788_v31 = vadd.f32 %v6934_v39, %v6928_v43  ;;  %v6938_v50 = vpop.f32.mrb[51].mxu0  ;;  %v6940_v29 = vpop.f32.mrb[49].mxu1 }
 0x49a   : > { %v2787_v36 = vadd.f32 %v6940_v29, %v6930_v42 }
 0x49c   : > { %v6944_v59 = vpop.f32.mrb[52].mxu0  ;;  %2835 = vxpose.xlu0.b32.start [1/2] (short) (narrow) %v2787_v36, 16  ;;  %v6946_v53 = vpop.f32.mrb[50].mxu1 }
 0x49d   : > { %v2790_v8 = vadd.f32 %v6946_v53, %v6932_v57  ;;  %v6950_v46 = vpop.f32.mrb[53].mxu0  ;;  %v6952_v44 = vpop.f32.mrb[51].mxu1 }
 0x49e   : > { %v2789_v38 = vadd.f32 %v6952_v44, %v6938_v50 }
 0x4a0   : > { %v6956_v58 = vpop.f32.mrb[54].mxu0  ;;  %2836 = vxpose.xlu0.b32.end [2/2] (short) (narrow) %v2788_v31, 16  ;;  %2867 = vxpose.xlu1.b32.start [1/2] (short) (narrow) %v2789_v38, 16  ;;  %v6958_v61 = vpop.f32.mrb[52].mxu1 }
 0x4a1   : > { %v2792_v62 = vadd.f32 %v6958_v61, %v6944_v59  ;;  %v6962_v35 = vpop.f32.mrb[55].mxu0  ;;  %v6964_v47 = vpop.f32.mrb[53].mxu1 }
 0x4a2   : > { %v2791_v33 = vadd.f32 %v6964_v47, %v6950_v46 }
 0x4a4   : > { %v6972_v60 = vpop.f32.mrb[56].mxu0  ;;  %2868 = vxpose.xlu1.b32.end [2/2] (short) (narrow) %v2790_v8, 16  ;;  %2899 = vxpose.xlu0.b32.start [1/2] (short) (narrow) %v2791_v33, 16  ;;  %v6974_v63 = vpop.f32.mrb[54].mxu1 }
 0x4a5   : > { %v2794_v34 = vadd.f32 %v6974_v63, %v6956_v58  ;;  %v6978_v56 = vpop.f32.mrb[57].mxu0  ;;  %v6980_v45 = vpop.f32.mrb[55].mxu1 }
 0x4a6   : > { %v2793_v14 = vadd.f32 %v6980_v45, %v6962_v35 }
 0x4a8   : > { %v6985_v55 = vpop.f32.mrb[58].mxu0  ;;  %2900 = vxpose.xlu0.b32.end [2/2] (short) (narrow) %v2792_v62, 16  ;;  %2931 = vxpose.xlu1.b32.start [1/2] (short) (narrow) %v2793_v14, 16  ;;  %v6987_v37 = vpop.f32.mrb[56].mxu1 }
 0x4a9   : > { %v2796_v25 = vadd.f32 %v6987_v37, %v6972_v60  ;;  %v6991_v54 = vpop.f32.mrb[59].mxu0  ;;  %v6993_v10 = vpop.f32.mrb[57].mxu1 }
 0x4aa   : > { %v2795_v9 = vadd.f32 %v6993_v10, %v6978_v56 }
 0x4ac   : > { %v6997_v11 = vpop.f32.mrb[60].mxu0  ;;  %2932 = vxpose.xlu1.b32.end [2/2] (short) (narrow) %v2794_v34, 16  ;;  %2963 = vxpose.xlu0.b32.start [1/2] (short) (narrow) %v2795_v9, 16  ;;  %v6999_v32 = vpop.f32.mrb[58].mxu1 }
 0x4ad   : > { %v2798_v31 = vadd.f32 %v6999_v32, %v6985_v55  ;;  %v7003_v36 = vpop.f32.mrb[61].mxu0  ;;  %v7005_v8 = vpop.f32.mrb[59].mxu1 }
 0x4ae   : > { %v2797_v38 = vadd.f32 %v7005_v8, %v6991_v54 }
 0x4b0   : > { %v7009_v62 = vpop.f32.mrb[62].mxu0  ;;  %2964 = vxpose.xlu0.b32.end [2/2] (short) (narrow) %v2796_v25, 16  ;;  %2995 = vxpose.xlu1.b32.start [1/2] (short) (narrow) %v2797_v38, 16  ;;  %v7011_v33 = vpop.f32.mrb[60].mxu1 }
 0x4b1   : > { %v2800_v30 = vadd.f32 %v7011_v33, %v6997_v11  ;;  %v7015_v13 = vpop.f32.mrb[63].mxu0  ;;  %v7017_v34 = vpop.f32.mrb[61].mxu1 }
 0x4b2   : > { %v2799_v14 = vadd.f32 %v7017_v34, %v7003_v36 }
 0x4b4   : > { %v5034_v9 = vpop.f32.mrb[64].mxu0  ;;  %2996 = vxpose.xlu1.b32.end [2/2] (short) (narrow) %v2798_v31, 16  ;;  %3027 = vxpose.xlu0.b32.start [1/2] (short) (narrow) %v2799_v14, 16  ;;  %v7021_v6 = vpop.f32.mrb[62].mxu1 }
 0x4b5   : > { %v2804_v25 = vsub.f32 %v5034_v9, %v6928_v43  ;;  %v2802_v38 = vadd.f32 %v7021_v6, %v7009_v62  ;;  %v7026_v12 = vpop.f32.mrb[63].mxu1  ;;  %v2708_v15 = vpop.f32.mrb[65].mxu0 }
 0x4b6   : > { %v2803_v22 = vsub.f32 %v2708_v15, %v6930_v42  ;;  %v2801_v24 = vadd.f32 %v7026_v12, %v7015_v13 }
 0x4b7   : > { %v2820_v26 = vadd.f32 %v6934_v39, %v2804_v25 }
 0x4b8   : > { %v5037_v27 = vpop.f32.mrb[66].mxu0  ;;  %3028 = vxpose.xlu0.b32.end [2/2] (short) (narrow) %v2800_v30, 16  ;;  %3059 = vxpose.xlu1.b32.start [1/2] (short) (narrow) %v2801_v24, 16  ;;  %v2819_v31 = vadd.f32 %v2803_v22, %v6940_v29 }
 0x4b9   : > { %v2806_v43 = vsub.f32 %v5037_v27, %v6932_v57  ;;  %v2718_v14 = vpop.f32.mrb[67].mxu0 }
 0x4ba   : > { %v2805_v9 = vsub.f32 %v2718_v14, %v6938_v50 }
 0x4bb   : > { %v2822_v28 = vadd.f32 %v6946_v53, %v2806_v43 }
 0x4bc   : > { %v5040_v40 = vpop.f32.mrb[68].mxu0  ;;  %3091 = vxpose.xlu0.b32.start [1/2] (short) (narrow) %v2819_v31, 16  ;;  %3060 = vxpose.xlu1.b32.end [2/2] (short) (narrow) %v2802_v38, 16  ;;  %v2821_v15 = vadd.f32 %v2805_v9, %v6952_v44 }
 0x4bd   : > { %v2808_v42 = vsub.f32 %v5040_v40, %v6944_v59  ;;  %v2728_v39 = vpop.f32.mrb[69].mxu0 }
 0x4be   : > { %v2807_v30 = vsub.f32 %v2728_v39, %v6950_v46 }
 0x4bf   : > { %v2824_v24 = vadd.f32 %v6958_v61, %v2808_v42 }
 0x4c0   : > { %v5043_v22 = vpop.f32.mrb[70].mxu0  ;;  %3092 = vxpose.xlu0.b32.end [2/2] (short) (narrow) %v2820_v26, 16  ;;  %3123 = vxpose.xlu1.b32.start [1/2] (short) (narrow) %v2821_v15, 16  ;;  %v2823_v27 = vadd.f32 %v2807_v30, %v6964_v47 }
 0x4c1   : > { %v2810_v57 = vsub.f32 %v5043_v22, %v6956_v58  ;;  %v2738_v50 = vpop.f32.mrb[71].mxu0 }
 0x4c2   : > { %v2809_v29 = vsub.f32 %v2738_v50, %v6962_v35 }
 0x4c3   : > { %v2826_v53 = vadd.f32 %v6974_v63, %v2810_v57 }
 0x4c4   : > { %v5046_v44 = vpop.f32.mrb[72].mxu0  ;;  %3155 = vxpose.xlu0.b32.start [1/2] (short) (narrow) %v2823_v27, 16  ;;  %3124 = vxpose.xlu1.b32.end [2/2] (short) (narrow) %v2822_v28, 16  ;;  %v2825_v40 = vadd.f32 %v2809_v29, %v6980_v45 }
 0x4c5   : > { %v2812_v59 = vsub.f32 %v5046_v44, %v6972_v60  ;;  %v2748_v46 = vpop.f32.mrb[73].mxu0 }
 0x4c6   : > { %v2811_v26 = vsub.f32 %v2748_v46, %v6978_v56 }
 0x4c7   : > { %v2828_v61 = vadd.f32 %v6987_v37, %v2812_v59 }
 0x4c8   : > { %v5049_v47 = vpop.f32.mrb[74].mxu0  ;;  %3156 = vxpose.xlu0.b32.end [2/2] (short) (narrow) %v2824_v24, 16  ;;  %3187 = vxpose.xlu1.b32.start [1/2] (short) (narrow) %v2825_v40, 16  ;;  %v2827_v58 = vadd.f32 %v2811_v26, %v6993_v10 }
 0x4c9   : > { %v2814_v35 = vsub.f32 %v5049_v47, %v6985_v55  ;;  %v2758_v63 = vpop.f32.mrb[75].mxu0 }
 0x4ca   : > { %v2813_v25 = vsub.f32 %v2758_v63, %v6991_v54 }
 0x4cb   : > { %v2830_v28 = vadd.f32 %v6999_v32, %v2814_v35 }
 0x4cc   : > { %v5052_v45 = vpop.f32.mrb[76].mxu0  ;;  %3219 = vxpose.xlu0.b32.start [1/2] (short) (narrow) %v2827_v58, 16  ;;  %3188 = vxpose.xlu1.b32.end [2/2] (short) (narrow) %v2826_v53, 16  ;;  %v2829_v60 = vadd.f32 %v2813_v25, %v7005_v8 }
 0x4cd   : > { %v2816_v56 = vsub.f32 %v5052_v45, %v6997_v11  ;;  %v2768_v37 = vpop.f32.mrb[77].mxu0 }
 0x4ce   : > { %v2815_v38 = vsub.f32 %v2768_v37, %v7003_v36 }
 0x4cf   : > { %v2832_v31 = vadd.f32 %v7011_v33, %v2816_v56 }
 0x4d0   : > { %3220 = vxpose.xlu0.b32.end [2/2] (short) (narrow) %v2828_v61, 16  ;;  %v5055_v10 = vpop.f32.mrb[78].mxu0  ;;  %3251 = vxpose.xlu1.b32.start [1/2] (short) (narrow) %v2829_v60, 16  ;;  %v2831_v55 = vadd.f32 %v2815_v38, %v7017_v34 }
 0x4d1   : > { %v2818_v54 = vsub.f32 %v5055_v10, %v7009_v62  ;;  %v2778_v32 = vpop.f32.mrb[79].mxu0 }
 0x4d2   : > { %v2817_v43 = vsub.f32 %v2778_v32, %v7015_v13 }
 0x4d3   : > { %v2834_v14 = vadd.f32 %v7021_v6, %v2818_v54 }
 0x4d4   : > { %3283 = vxpose.xlu0.b32.start [1/2] (short) (narrow) %v2831_v55, 16  ;;  %3252 = vxpose.xlu1.b32.end [2/2] (short) (narrow) %v2830_v28, 16  ;;  %v2833_v11 = vadd.f32 %v2817_v43, %v7026_v12 }
 0x4d8   : > { %3284 = vxpose.xlu0.b32.end [2/2] (short) (narrow) %v2832_v31, 16  ;;  %3315 = vxpose.xlu1.b32.start [1/2] (short) (narrow) %v2833_v11, 16 }
 0x4dc   : > { %3316 = vxpose.xlu1.b32.end [2/2] (short) (narrow) %v2834_v14, 16 }
 0x51c   : > { %v2851_v36 = vpop.trf.xlu0 }
 0x51d   : > { %5060 = vmatprep.mubr.msk.f32.mxu1 %vm217_vm0, %v2851_v36 }
 0x520   : > { %v2852_v8 = vpop.trf.xlu0  ;;  %v2883_v33 = vpop.trf.xlu1 }
 0x521   : > { %5061 = vmatmul.mubr.msk.f32.vlgmr.msra.gmra.mrb[64].mxu1 %vm217_vm0, %v2852_v8 }
 0x522   : > { %5063 = vmatprep.mubr.msk.f32.mxu1 %vm217_vm0, %v2883_v33  ;;  %5187 = vmatpush3.bf16.msra.mxu1 %v6970_v51 }
 0x524   : > { %v2884_v62 = vpop.trf.xlu1  ;;  %v2915_v6 = vpop.trf.xlu0 }
 0x525   : > { %5064 = vmatmul.mubr.msk.f32.gmra.mrb[66].mxu1 %vm217_vm0, %v2884_v62 }
 0x526   : > { %5066 = vmatprep.mubr.msk.f32.mxu1 %vm217_vm0, %v2915_v6 }
 0x528   : > { %v2916_v12 = vpop.trf.xlu0  ;;  %v2947_v13 = vpop.trf.xlu1 }
 0x529   : > { %5067 = vmatmul.mubr.msk.f32.gmra.mrb[68].mxu1 %vm217_vm0, %v2916_v12 }
 0x52a   : > { %5069 = vmatprep.mubr.msk.f32.mxu1 %vm217_vm0, %v2947_v13 }
 0x52c   : > { %v2948_v34 = vpop.trf.xlu1  ;;  %v2979_v9 = vpop.trf.xlu0 }
 0x52d   : > { %5070 = vmatmul.mubr.msk.f32.gmra.mrb[70].mxu1 %vm217_vm0, %v2948_v34 }
 0x52e   : > { %5072 = vmatprep.mubr.msk.f32.mxu1 %vm217_vm0, %v2979_v9 }
 0x530   : > { %v2980_v15 = vpop.trf.xlu0  ;;  %v3011_v51 = vpop.trf.xlu1 }
 0x531   : > { %5073 = vmatmul.mubr.msk.f32.gmra.mrb[72].mxu1 %vm217_vm0, %v2980_v15 }
 0x532   : > { %5075 = vmatprep.mubr.msk.f32.mxu1 %vm217_vm0, %v3011_v51 }
 0x534   : > { %v3012_v42 = vpop.trf.xlu1  ;;  %v3043_v39 = vpop.trf.xlu0 }
 0x535   : > { %5076 = vmatmul.mubr.msk.f32.gmra.mrb[74].mxu1 %vm217_vm0, %v3012_v42 }
 0x536   : > { %5078 = vmatprep.mubr.msk.f32.mxu1 %vm217_vm0, %v3043_v39 }
 0x538   : > { %v3044_v30 = vpop.trf.xlu0  ;;  %v3075_v24 = vpop.trf.xlu1 }
 0x539   : > { %5079 = vmatmul.mubr.msk.f32.gmra.mrb[76].mxu1 %vm217_vm0, %v3044_v30 }
 0x53a   : > { %5081 = vmatprep.mubr.msk.f32.mxu1 %vm217_vm0, %v3075_v24 }
 0x53c   : > { %v3107_v22 = vpop.trf.xlu0  ;;  %v3076_v27 = vpop.trf.xlu1 }
 0x53d   : > { %v3733_v57 = vadd.f32 %v3107_v22, %v2851_v36  ;;  %5082 = vmatmul.mubr.msk.f32.gmra.mrb[78].mxu1 %vm217_vm0, %v3076_v27  ;;  %5088 = vmatprep.mubr.msk.f32.mxu0 %vm217_vm0, %v3107_v22 }
 0x53f   : > { %5116 = vmatprep.mubr.msk.f32.mxu1 %vm217_vm0, %v3733_v57 }
 0x540   : > { %v3108_v50 = vpop.trf.xlu0  ;;  %v3139_v29 = vpop.trf.xlu1 }
 0x541   : > { %v3734_v53 = vadd.f32 %v3108_v50, %v2852_v8  ;;  %v3735_v44 = vadd.f32 %v3139_v29, %v2883_v33  ;;  %5089 = vmatmul.mubr.msk.f32.vlgmr.msra.gmra.mrb[80].mxu0 %vm217_vm0, %v3108_v50 }
 0x542   : > { %5091 = vmatprep.mubr.msk.f32.mxu0 %vm217_vm0, %v3139_v29 }
 0x543   : > { %5117 = vmatmul.mubr.msk.f32.vlgmr.msra.gmra.mrb[80].mxu1 %vm217_vm0, %v3734_v53 }
 0x544   : > { %v3171_v40 = vpop.trf.xlu0  ;;  %5119 = vmatprep.mubr.msk.f32.mxu1 %vm217_vm0, %v3735_v44  ;;  %v3140_v59 = vpop.trf.xlu1 }
 0x545   : > { %v3737_v46 = vadd.f32 %v3171_v40, %v2915_v6  ;;  %v3736_v26 = vadd.f32 %v3140_v59, %v2884_v62  ;;  %5092 = vmatmul.mubr.msk.f32.gmra.mrb[82].mxu0 %vm217_vm0, %v3140_v59 }
 0x546   : > { %5094 = vmatprep.mubr.msk.f32.mxu0 %vm217_vm0, %v3171_v40 }
 0x547   : > { %5120 = vmatmul.mubr.msk.f32.gmra.mrb[82].mxu1 %vm217_vm0, %v3736_v26 }
 0x548   : > { %v3172_v61 = vpop.trf.xlu0  ;;  %5122 = vmatprep.mubr.msk.f32.mxu1 %vm217_vm0, %v3737_v46  ;;  %v3203_v47 = vpop.trf.xlu1 }
 0x549   : > { %v3738_v58 = vadd.f32 %v3172_v61, %v2916_v12  ;;  %v3739_v35 = vadd.f32 %v3203_v47, %v2947_v13  ;;  %5095 = vmatmul.mubr.msk.f32.gmra.mrb[84].mxu0 %vm217_vm0, %v3172_v61 }
 0x54a   : > { %5097 = vmatprep.mubr.msk.f32.mxu0 %vm217_vm0, %v3203_v47 }
 0x54b   : > { %5123 = vmatmul.mubr.msk.f32.gmra.mrb[84].mxu1 %vm217_vm0, %v3738_v58 }
 0x54c   : > { %v3235_v63 = vpop.trf.xlu0  ;;  %5125 = vmatprep.mubr.msk.f32.mxu1 %vm217_vm0, %v3739_v35  ;;  %v3204_v25 = vpop.trf.xlu1 }
 0x54d   : > { %v3741_v28 = vadd.f32 %v3235_v63, %v2979_v9  ;;  %v3740_v45 = vadd.f32 %v3204_v25, %v2948_v34  ;;  %5098 = vmatmul.mubr.msk.f32.gmra.mrb[86].mxu0 %vm217_vm0, %v3204_v25 }
 0x54e   : > { %5100 = vmatprep.mubr.msk.f32.mxu0 %vm217_vm0, %v3235_v63 }
 0x54f   : > { %5126 = vmatmul.mubr.msk.f32.gmra.mrb[86].mxu1 %vm217_vm0, %v3740_v45 }
 0x550   : > { %v3236_v60 = vpop.trf.xlu0  ;;  %5128 = vmatprep.mubr.msk.f32.mxu1 %vm217_vm0, %v3741_v28  ;;  %v3267_v56 = vpop.trf.xlu1 }
 0x551   : > { %v3742_v37 = vadd.f32 %v3236_v60, %v2980_v15  ;;  %v3743_v38 = vadd.f32 %v3267_v56, %v3011_v51  ;;  %5101 = vmatmul.mubr.msk.f32.gmra.mrb[88].mxu0 %vm217_vm0, %v3236_v60 }
 0x552   : > { %5103 = vmatprep.mubr.msk.f32.mxu0 %vm217_vm0, %v3267_v56 }
 0x553   : > { %5129 = vmatmul.mubr.msk.f32.gmra.mrb[88].mxu1 %vm217_vm0, %v3742_v37 }
 0x554   : > { %v3299_v31 = vpop.trf.xlu0  ;;  %5131 = vmatprep.mubr.msk.f32.mxu1 %vm217_vm0, %v3743_v38  ;;  %v3268_v10 = vpop.trf.xlu1 }
 0x555   : > { %v3745_v55 = vadd.f32 %v3299_v31, %v3043_v39  ;;  %v3744_v54 = vadd.f32 %v3268_v10, %v3012_v42  ;;  %5104 = vmatmul.mubr.msk.f32.gmra.mrb[90].mxu0 %vm217_vm0, %v3268_v10 }
 0x556   : > { %5106 = vmatprep.mubr.msk.f32.mxu0 %vm217_vm0, %v3299_v31 }
 0x557   : > { %5132 = vmatmul.mubr.msk.f32.gmra.mrb[90].mxu1 %vm217_vm0, %v3744_v54 }
 0x558   : > { %v3300_v32 = vpop.trf.xlu0  ;;  %5134 = vmatprep.mubr.msk.f32.mxu1 %vm217_vm0, %v3745_v55  ;;  %v3331_v43 = vpop.trf.xlu1 }
 0x559   : > { %v3746_v14 = vadd.f32 %v3300_v32, %v3044_v30  ;;  %v3747_v11 = vadd.f32 %v3331_v43, %v3075_v24  ;;  %5107 = vmatmul.mubr.msk.f32.gmra.mrb[92].mxu0 %vm217_vm0, %v3300_v32 }
 0x55a   : > { %5109 = vmatprep.mubr.msk.f32.mxu0 %vm217_vm0, %v3331_v43 }
 0x55b   : > { %5135 = vmatmul.mubr.msk.f32.gmra.mrb[92].mxu1 %vm217_vm0, %v3746_v14 }
 0x55c   : > { %5137 = vmatprep.mubr.msk.f32.mxu1 %vm217_vm0, %v3747_v11  ;;  %v3332_v36 = vpop.trf.xlu1 }
 0x55d   : > { %v3748_v8 = vadd.f32 %v3332_v36, %v3076_v27  ;;  %5110 = vmatmul.mubr.msk.f32.gmra.mrb[94].mxu0 %vm217_vm0, %v3332_v36 }
 0x55f   : > { %5138 = vmatmul.mubr.msk.f32.gmra.mrb[94].mxu1 %vm217_vm0, %v3748_v8 }
 0x5f4   : > { %v5062_v33 = vpop.f32.mrb[64].mxu1 }
 0x5f5   : > { %v3461_v62 = vpop.f32.mrb[65].mxu1 }
 0x5f8   : > { %v5065_v6 = vpop.f32.mrb[66].mxu1 }
 0x5f9   : > { %v3471_v12 = vpop.f32.mrb[67].mxu1 }
 0x5fc   : > { %v7110_v13 = vpop.f32.mrb[68].mxu1 }
 0x5fd   : > { %v7112_v34 = vpop.f32.mrb[69].mxu1 }
 0x600   : > { %v7114_v9 = vpop.f32.mrb[70].mxu1 }
 0x601   : > { %v7116_v15 = vpop.f32.mrb[71].mxu1 }
 0x604   : > { %v7118_v51 = vpop.f32.mrb[72].mxu1 }
 0x605   : > { %v7120_v42 = vpop.f32.mrb[73].mxu1 }
 0x608   : > { %v7122_v39 = vpop.f32.mrb[74].mxu1 }
 0x609   : > { %v7124_v30 = vpop.f32.mrb[75].mxu1 }
 0x60c   : > { %v7126_v24 = vpop.f32.mrb[76].mxu1 }
 0x60d   : > { %v7128_v22 = vpop.f32.mrb[77].mxu1 }
 0x610   : > { %v7130_v27 = vpop.f32.mrb[78].mxu1 }
 0x611   : > { %v7132_v57 = vpop.f32.mrb[79].mxu1 }
 0x614   : > { %v5090_v50 = vpop.f32.mrb[80].mxu0 }
 0x615   : > { %v3943_v29 = vadd.f32 %v5090_v50, %v5062_v33  ;;  %v3654_v53 = vpop.f32.mrb[81].mxu0 }
 0x616   : > { %v3942_v44 = vadd.f32 %v3654_v53, %v3461_v62  ;;  %v5118_v40 = vpop.f32.mrb[80].mxu1 }
 0x617   : > { %v3959_v59 = vsub.f32 %v5118_v40, %v5062_v33  ;;  %v3863_v46 = vpop.f32.mrb[81].mxu1  ;;  %v3991_v47 = vmul.f32 %v3943_v29, %v7774_v1  ;;  %v4083_v58 = vmul.f32 %v3943_v29, %v7767_v17 }
 0x618   : > { %v3958_v26 = vsub.f32 %v3863_v46, %v3461_v62  ;;  %v5093_v61 = vpop.f32.mrb[82].mxu0  ;;  %v3990_v28 = vmul.f32 %v3942_v44, %v7775_v0  ;;  %v4082_v45 = vmul.f32 %v3942_v44, %v7769_v16 }
 0x619   : > { %v3975_v35 = vadd.f32 %v5090_v50, %v3959_v59  ;;  %v3945_v63 = vadd.f32 %v5093_v61, %v5065_v6  ;;  %v3664_v25 = vpop.f32.mrb[83].mxu0 }
 0x61a   : > { %v3974_v60 = vadd.f32 %v3958_v26, %v3654_v53  ;;  %v3944_v56 = vadd.f32 %v3664_v25, %v3471_v12  ;;  %v5121_v37 = vpop.f32.mrb[82].mxu1 }
 0x61b   : > { %v4007_v38 = vmul.f32 %v3975_v35, %v7767_v17  ;;  %v4067_v31 = vmul.f32 %v3975_v35, %v7774_v1  ;;  %v3993_v10 = vmul.f32 %v3945_v63, %v7772_v3  ;;  %v4085_v55 = vmul.f32 %v3945_v63, %v7765_v19  ;;  %v3873_v54 = vpop.f32.mrb[83].mxu1  ;;  %v7880_v17 = vld [vmem:[#allocation29_spill] sm:$0xff] }
 0x61c   : > { %v4006_v32 = vmul.f32 %v3974_v60, %v7769_v16  ;;  %v4066_v43 = vmul.f32 %v3974_v60, %v7775_v0  ;;  %v3992_v14 = vmul.f32 %v3944_v56, %v7773_v2  ;;  %v4084_v11 = vmul.f32 %v3944_v56, %v7766_v18  ;;  %v5096_v36 = vpop.f32.mrb[84].mxu0 }
 0x61d   : > { %v4023_v8 = vadd.f32 %v4007_v38, %v3991_v47  ;;  %v4099_v33 = vsub.f32 %v4067_v31, %v4083_v58  ;;  %v3961_v62 = vsub.f32 %v5121_v37, %v5065_v6  ;;  %v3960_v50 = vsub.f32 %v3873_v54, %v3471_v12  ;;  %v3674_v29 = vpop.f32.mrb[85].mxu0 }
 0x61e   : > { %v4022_v53 = vadd.f32 %v4006_v32, %v3990_v28  ;;  %v4098_v44 = vsub.f32 %v4066_v43, %v4082_v45  ;;  %v3947_v40 = vadd.f32 %v5096_v36, %v7110_v13  ;;  %v3946_v59 = vadd.f32 %v3674_v29, %v7112_v34  ;;  %v5124_v46 = vpop.f32.mrb[84].mxu1 }
 0x61f   : > { %v4045_v26 = vsel %vm217_vm0, %v4023_v8, 0.0  ;;  %v4121_v35 = vsel %vm217_vm0, %v4099_v33, 0.0  ;;  %v3977_v63 = vadd.f32 %v5093_v61, %v3961_v62  ;;  %v3976_v60 = vadd.f32 %v3960_v50, %v3664_v25  ;;  %v3883_v56 = vpop.f32.mrb[85].mxu1 }
 0x620   : > { %v4038_v47 = vsel %vm217_vm0, %v4022_v53, 0.0  ;;  %v4114_v6 = vsel %vm217_vm0, %v4098_v44, 0.0  ;;  %v3995_v12 = vmul.f32 %v3947_v40, %v7770_v5  ;;  %v4087_v58 = vmul.f32 %v3947_v40, %v7763_v21  ;;  %v5099_v28 = vpop.f32.mrb[86].mxu0 }
 0x621   : > { %v4009_v45 = vmul.f32 %v3977_v63, %v7765_v19  ;;  %v4069_v37 = vmul.f32 %v3977_v63, %v7772_v3  ;;  %v4008_v38 = vmul.f32 %v3976_v60, %v7766_v18  ;;  %v4068_v31 = vmul.f32 %v3976_v60, %v7773_v2  ;;  %v3684_v61 = vpop.f32.mrb[87].mxu0  ;;  %v7865_v3 = vld [vmem:[#allocation41_spill] sm:$0xff]  ;;  %v7881_v19 = vld [vmem:[#allocation44_spill] sm:$0xff] }
 0x622   : > { %v3994_v25 = vmul.f32 %v3946_v59, %v7771_v4  ;;  %v4086_v54 = vmul.f32 %v3946_v59, %v7764_v20  ;;  %v3963_v32 = vsub.f32 %v5124_v46, %v7110_v13  ;;  %v3962_v43 = vsub.f32 %v3883_v56, %v7112_v34  ;;  %v5127_v8 = vpop.f32.mrb[86].mxu1 }
 0x623   : > { %v4025_v33 = vadd.f32 %v4009_v45, %v3993_v10  ;;  %v4101_v62 = vsub.f32 %v4069_v37, %v4085_v55  ;;  %v4024_v50 = vadd.f32 %v4008_v38, %v3992_v14  ;;  %v4100_v53 = vsub.f32 %v4068_v31, %v4084_v11  ;;  %v3893_v44 = vpop.f32.mrb[87].mxu1 }
 0x624   : > { %v3979_v40 = vadd.f32 %v5096_v36, %v3963_v32  ;;  %v3978_v63 = vadd.f32 %v3962_v43, %v3674_v29  ;;  %v3949_v0 = vadd.f32 %v5099_v28, %v7114_v9  ;;  %v3948_v60 = vadd.f32 %v3684_v61, %v7116_v15  ;;  %v5102_v1 = vpop.f32.mrb[88].mxu0  ;;  %v7862_v43 = vld [vmem:[#allocation23_spill] sm:$0xff] }
 0x625   : > { %v4046_v2 = vsel %vm217_vm0, %v4025_v33, 0.0  ;;  %v4122_v59 = vsel %vm217_vm0, %v4101_v62, 0.0  ;;  %v4039_v13 = vsel %vm217_vm0, %v4024_v50, 0.0  ;;  %v4115_v34 = vsel %vm217_vm0, %v4100_v53, 0.0  ;;  %v3694_v10 = vpop.f32.mrb[89].mxu0 }
 0x626   : > { %v4047_v55 = vadd.f32 %v4046_v2, %v4045_v26  ;;  %v4123_v14 = vadd.f32 %v4122_v59, %v4121_v35  ;;  %v4040_v11 = vadd.f32 %v4039_v13, %v4038_v47  ;;  %v4116_v46 = vadd.f32 %v4115_v34, %v4114_v6  ;;  %v5130_v36 = vpop.f32.mrb[88].mxu1  ;;  %v7863_v2 = vld [vmem:[#allocation39_spill] sm:$0xff] }
 0x627   : > { %v4011_v29 = vmul.f32 %v3979_v40, %v7763_v21  ;;  %v4071_v56 = vmul.f32 %v3979_v40, %v7770_v5  ;;  %v4010_v45 = vmul.f32 %v3978_v63, %v7764_v20  ;;  %v4070_v37 = vmul.f32 %v3978_v63, %v7771_v4  ;;  %v3903_v38 = vpop.f32.mrb[89].mxu1  ;;  %v7867_v5 = vld [vmem:[#allocation40_spill] sm:$0xff] }
 0x628   : > { %v3997_v31 = vmul.f32 %v3949_v0, %v7768_v7  ;;  %v4089_v32 = vmul.f32 %v3949_v0, %v6003_v23  ;;  %v3996_v33 = vmul.f32 %v3948_v60, %v7862_v43  ;;  %v4088_v26 = vmul.f32 %v3948_v60, %v7863_v2  ;;  %v7176_v35 = vpop.f32.mrb[90].mxu0 }
 0x629   : > { %v4027_v47 = vadd.f32 %v4011_v29, %v3995_v12  ;;  %v4103_v6 = vsub.f32 %v4071_v56, %v4087_v58  ;;  %v4026_v62 = vadd.f32 %v4010_v45, %v3994_v25  ;;  %v4102_v50 = vsub.f32 %v4070_v37, %v4086_v54  ;;  %v7178_v53 = vpop.f32.mrb[91].mxu0  ;;  %v7864_v45 = vld [vmem:[#allocation26_spill] sm:$0xff] }
 0x62a   : > { %v3965_v40 = vsub.f32 %v5127_v8, %v7114_v9  ;;  %v3964_v63 = vsub.f32 %v3893_v44, %v7116_v15  ;;  %v3951_v59 = vadd.f32 %v5102_v1, %v7118_v51  ;;  %v3950_v0 = vadd.f32 %v3694_v10, %v7120_v42  ;;  %v7184_v13 = vpop.f32.mrb[90].mxu1 }
 0x62b   : > { %v4048_v60 = vsel %vm217_vm0, %v4027_v47, 0.0  ;;  %v4124_v34 = vsel %vm217_vm0, %v4103_v6, 0.0  ;;  %v4041_v12 = vsel %vm217_vm0, %v4026_v62, 0.0  ;;  %v4117_v58 = vsel %vm217_vm0, %v4102_v50, 0.0  ;;  %v7190_v25 = vpop.f32.mrb[91].mxu1  ;;  %v7866_v6 = vld [vmem:[#allocation25_spill] sm:$0xff] }
 0x62c   : > { %v4049_v54 = vadd.f32 %v4048_v60, %v4047_v55  ;;  %v4125_v9 = vadd.f32 %v4124_v34, %v4123_v14  ;;  %v4042_v8 = vadd.f32 %v4041_v12, %v4040_v11  ;;  %v4118_v15 = vadd.f32 %v4117_v58, %v4116_v46  ;;  %v7192_v44 = vpop.f32.mrb[92].mxu0 }
 0x62d   : > { %v3981_v29 = vadd.f32 %v5099_v28, %v3965_v40  ;;  %v3980_v56 = vadd.f32 %v3964_v63, %v3684_v61  ;;  %v3999_v37 = vmul.f32 %v3951_v59, %v7864_v45  ;;  %v4091_v47 = vmul.f32 %v3951_v59, %v7865_v3  ;;  %v7196_v4 = vpop.f32.mrb[93].mxu0 }
 0x62e   : > { %v3998_v62 = vmul.f32 %v3950_v0, %v7866_v6  ;;  %v4090_v50 = vmul.f32 %v3950_v0, %v7867_v5  ;;  %v3967_v16 = vsub.f32 %v5130_v36, %v7118_v51  ;;  %v3966_v55 = vsub.f32 %v3903_v38, %v7120_v42  ;;  %v5136_v14 = vpop.f32.mrb[92].mxu1 }
 0x62f   : > { %v4013_v11 = vmul.f32 %v3981_v29, %v6003_v23  ;;  %v4073_v28 = vmul.f32 %v3981_v29, %v7768_v7  ;;  %v4012_v61 = vmul.f32 %v3980_v56, %v7863_v2  ;;  %v4072_v46 = vmul.f32 %v3980_v56, %v7862_v43  ;;  %v3923_v40 = vpop.f32.mrb[93].mxu1 }
 0x630   : > { %v3983_v63 = vadd.f32 %v5102_v1, %v3967_v16  ;;  %v3982_v59 = vadd.f32 %v3966_v55, %v3694_v10  ;;  %v3953_v60 = vadd.f32 %v7176_v35, %v7122_v39  ;;  %v3952_v51 = vadd.f32 %v7178_v53, %v7124_v30  ;;  %v7210_v36 = vpop.f32.mrb[94].mxu0 }
 0x631   : > { %v4029_v42 = vadd.f32 %v4013_v11, %v3997_v31  ;;  %v4105_v38 = vsub.f32 %v4073_v28, %v4089_v32  ;;  %v4028_v0 = vadd.f32 %v4012_v61, %v3996_v33  ;;  %v4104_v34 = vsub.f32 %v4072_v46, %v4088_v26  ;;  %v7212_v12 = vpop.f32.mrb[95].mxu0  ;;  %v7868_v28 = vld [vmem:[#allocation79_spill] sm:$0xff] }
 0x632   : > { %v4015_v2 = vmul.f32 %v3983_v63, %v7865_v3  ;;  %v4075_v43 = vmul.f32 %v3983_v63, %v7864_v45  ;;  %v4014_v1 = vmul.f32 %v3982_v59, %v7867_v5  ;;  %v4074_v16 = vmul.f32 %v3982_v59, %v7866_v6  ;;  %v7218_v10 = vpop.f32.mrb[94].mxu1  ;;  %v7869_v61 = vld [vmem:[#allocation87_spill] sm:$0xff] }
 0x633   : > { %v4050_v58 = vsel %vm217_vm0, %v4029_v42, 0.0  ;;  %v4126_v29 = vsel %vm217_vm0, %v4105_v38, 0.0  ;;  %v4043_v31 = vsel %vm217_vm0, %v4028_v0, 0.0  ;;  %v4119_v32 = vsel %vm217_vm0, %v4104_v34, 0.0  ;;  %v7224_v33 = vpop.f32.mrb[95].mxu1  ;;  %v7870_v63 = vld [vmem:[#allocation83_spill] sm:$0xff] }
 0x634   : > { %v7226_v26 = vadd.f32 %v4050_v58, %v4049_v54  ;;  %v7228_v3 = vadd.f32 %v4126_v29, %v4125_v9  ;;  %v7230_v56 = vadd.f32 %v4043_v31, %v4042_v8  ;;  %v7232_v5 = vadd.f32 %v4119_v32, %v4118_v15  ;;  %v7871_v42 = vld [vmem:[#allocation88_spill] sm:$0xff]  ;;  %v7874_v0 = vld [vmem:[#allocation43_spill] sm:$0xff] }
 0x635   : > { %v4031_v45 = vadd.f32 %v4015_v2, %v3999_v37  ;;  %v4107_v6 = vsub.f32 %v4075_v43, %v4091_v47  ;;  %v4030_v55 = vadd.f32 %v4014_v1, %v3998_v62  ;;  %v4106_v11 = vsub.f32 %v4074_v16, %v4090_v50  ;;  %v7872_v9 = vld [vmem:[#allocation84_spill] sm:$0xff]  ;;  %v7875_v2 = vld [vmem:[#allocation27_spill] sm:$0xff]  ;;  %v7876_v1 = vld [vmem:[#allocation42_spill] sm:$0xff] }
 0x636   : > { %v4143_v46 = vmul.f32 %v7869_v61, %v7868_v28  ;;  %v4151_v59 = vmul.f32 %v7870_v63, %v7868_v28  ;;  %v4142_v54 = vmul.f32 %v7871_v42, %v7868_v28  ;;  %v4150_v38 = vmul.f32 %v7872_v9, %v7868_v28  ;;  %v7873_v62 = vld [vmem:[#allocation28_spill] sm:$0xff] }
 0x637   : > { %v4059_v8 = vsel %vm217_vm0, %v4031_v45, 0.0  ;;  %v4135_v15 = vsel %vm217_vm0, %v4107_v6, 0.0  ;;  %v4052_v37 = vsel %vm217_vm0, %v4030_v55, 0.0  ;;  %v4128_v47 = vsel %vm217_vm0, %v4106_v11, 0.0  ;;  %v7878_v55 = vld [vmem:[#allocation45_spill] sm:$0xff] }
 0x638   : > { %v4001_v50 = vmul.f32 %v3953_v60, %v7873_v62  ;;  %v4093_v34 = vmul.f32 %v3953_v60, %v7874_v0  ;;  %v4000_v43 = vmul.f32 %v3952_v51, %v7875_v2  ;;  %v4092_v16 = vmul.f32 %v3952_v51, %v7876_v1 }
 0x639   : > { %v3969_v58 = vsub.f32 %v7184_v13, %v7122_v39  ;;  %v3968_v29 = vsub.f32 %v7190_v25, %v7124_v30  ;;  %v3955_v31 = vadd.f32 %v7192_v44, %v7126_v24  ;;  %v3954_v32 = vadd.f32 %v7196_v4, %v7128_v22  ;;  %v7877_v13 = vld [vmem:[#allocation30_spill] sm:$0xff] }
 0x63a   : > { %v3971_v45 = vsub.f32 %v5136_v14, %v7126_v24  ;;  %v3970_v60 = vsub.f32 %v3923_v40, %v7128_v22  ;;  %v3957_v6 = vadd.f32 %v7210_v36, %v7130_v27  ;;  %v3956_v51 = vadd.f32 %v7212_v12, %v7132_v57 }
 0x63b   : > { %v3985_v39 = vadd.f32 %v7176_v35, %v3969_v58  ;;  %v3984_v30 = vadd.f32 %v3968_v29, %v7178_v53  ;;  %v4003_v25 = vmul.f32 %v3955_v31, %v7877_v13  ;;  %v7879_v11 = vmov %v7878_v55 }
 0x63c   : > { %v4095_v7 = vmul.f32 %v3955_v31, %v7878_v55  ;;  %v4002_v18 = vmul.f32 %v3954_v32, %v7880_v17  ;;  %v4094_v24 = vmul.f32 %v3954_v32, %v7881_v19  ;;  %v3987_v22 = vadd.f32 %v7192_v44, %v3971_v45 }
 0x63d   : > { %v3986_v14 = vadd.f32 %v3970_v60, %v7196_v4  ;;  %v4017_v40 = vmul.f32 %v3985_v39, %v7874_v0  ;;  %v4077_v20 = vmul.f32 %v3985_v39, %v7873_v62  ;;  %v4016_v35 = vmul.f32 %v3984_v30, %v7876_v1 }
 0x63e   : > { %v4076_v53 = vmul.f32 %v3984_v30, %v7875_v2  ;;  %v4019_v58 = vmul.f32 %v3987_v22, %v7879_v11  ;;  %v4079_v29 = vmul.f32 %v3987_v22, %v7877_v13 }
 0x63f   : > { %v4018_v31 = vmul.f32 %v3986_v14, %v7881_v19  ;;  %v4078_v32 = vmul.f32 %v3986_v14, %v7880_v17  ;;  %v4033_v55 = vadd.f32 %v4017_v40, %v4001_v50  ;;  %v4109_v44 = vsub.f32 %v4077_v20, %v4093_v34  ;;  %v7882_v14 = vld [vmem:[#allocation32_spill] sm:$0xff] }
 0x640   : > { %v4032_v45 = vadd.f32 %v4016_v35, %v4000_v43  ;;  %v4108_v4 = vsub.f32 %v4076_v53, %v4092_v16  ;;  %v4035_v60 = vadd.f32 %v4019_v58, %v4003_v25  ;;  %v4111_v0 = vsub.f32 %v4079_v29, %v4095_v7  ;;  %v7884_v53 = vld [vmem:[#allocation47_spill] sm:$0xff]  ;;  %v7889_v29 = vld [vmem:[#allocation85_spill] sm:$0xff] }
 0x641   : > { %v4034_v21 = vadd.f32 %v4018_v31, %v4002_v18  ;;  %v4110_v62 = vsub.f32 %v4078_v32, %v4094_v24  ;;  %v4060_v1 = vsel %vm217_vm0, %v4033_v55, 0.0  ;;  %v4136_v2 = vsel %vm217_vm0, %v4109_v44, 0.0 }
 0x642   : > { %v4053_v39 = vsel %vm217_vm0, %v4032_v45, 0.0  ;;  %v4129_v30 = vsel %vm217_vm0, %v4108_v4, 0.0  ;;  %v4061_v13 = vadd.f32 %v4060_v1, %v4059_v8  ;;  %v4137_v19 = vadd.f32 %v4136_v2, %v4135_v15 }
 0x643   : > { %v4054_v22 = vadd.f32 %v4053_v39, %v4052_v37  ;;  %v4130_v17 = vadd.f32 %v4129_v30, %v4128_v47  ;;  %v4062_v20 = vsel %vm217_vm0, %v4035_v60, 0.0  ;;  %v4138_v50 = vsel %vm217_vm0, %v4111_v0, 0.0  ;;  %v7890_v60 = vld [vmem:[#allocation82_spill] sm:$0xff] }
 0x644   : > { %v4055_v7 = vsel %vm217_vm0, %v4034_v21, 0.0  ;;  %v4131_v18 = vsel %vm217_vm0, %v4110_v62, 0.0  ;;  %v4063_v34 = vadd.f32 %v4062_v20, %v4061_v13  ;;  %v4139_v43 = vadd.f32 %v4138_v50, %v4137_v19  ;;  %v7891_v62 = vld [vmem:[#allocation81_spill] sm:$0xff] }
 0x645   : > { %v4056_v16 = vadd.f32 %v4055_v7, %v4054_v22  ;;  %v4132_v25 = vadd.f32 %v4131_v18, %v4130_v17  ;;  %v7289_v24 = vadd.f32 %v4143_v46, %v7226_v26  ;;  %v7292_v8 = vadd.f32 %v4151_v59, %v7228_v3  ;;  %v7885_v46 = vld [vmem:[#allocation31_spill] sm:$0xff]  ;;  %v7887_v3 = vld [vmem:[#allocation46_spill] sm:$0xff] }
 0x646   : > { %v7295_v15 = vadd.f32 %v4142_v54, %v7230_v56  ;;  %v7298_v37 = vadd.f32 %v4150_v38, %v7232_v5  ;;  %v3973_v21 = vsub.f32 %v7218_v10, %v7130_v27  ;;  %v3972_v47 = vsub.f32 %v7224_v33, %v7132_v57 }
 0x647   : > { %v7883_v40 = vmov %v7882_v14  ;;  %v4005_v35 = vmul.f32 %v3957_v6, %v7882_v14  ;;  %v4097_v26 = vmul.f32 %v3957_v6, %v7884_v53  ;;  %v7886_v4 = vmov %v7885_v46  ;;  %v7888_v6 = vld [vmem:[#allocation86_spill] sm:$0xff] }
 0x648   : > { %v4004_v58 = vmul.f32 %v3956_v51, %v7885_v46  ;;  %v4096_v59 = vmul.f32 %v3956_v51, %v7887_v3  ;;  %v3989_v56 = vadd.f32 %v7210_v36, %v3973_v21  ;;  %v3988_v54 = vadd.f32 %v3972_v47, %v7212_v12 }
 0x649   : > { %v4158_v5 = vmul.f32 %v7871_v42, %v7295_v15  ;;  %v4159_v27 = vmul.f32 %v7869_v61, %v7289_v24  ;;  %v4162_v57 = vmul.f32 %v7872_v9, %v7298_v37  ;;  %v4163_v10 = vmul.f32 %v7870_v63, %v7292_v8 }
 0x64a   : > { %v4021_v33 = vmul.f32 %v3989_v56, %v7884_v53  ;;  %v4081_v38 = vmul.f32 %v3989_v56, %v7883_v40  ;;  %v4020_v36 = vmul.f32 %v3988_v54, %v7887_v3  ;;  %v4080_v12 = vmul.f32 %v3988_v54, %v7886_v4 }
 0x64b   : > { %v4144_v51 = vmul.f32 %v7888_v6, %v7868_v28  ;;  %v4145_v31 = vmul.f32 %v7889_v29, %v7868_v28  ;;  %v4152_v0 = vmul.f32 %v7890_v60, %v7868_v28  ;;  %v4153_v1 = vmul.f32 %v7891_v62, %v7868_v28 }
 0x64c   : > { %v4037_v32 = vadd.f32 %v4021_v33, %v4005_v35  ;;  %v4113_v55 = vsub.f32 %v4081_v38, %v4097_v26  ;;  %v4036_v44 = vadd.f32 %v4020_v36, %v4004_v58  ;;  %v4112_v45 = vsub.f32 %v4080_v12, %v4096_v59 }
 0x64d   : > { %v4166_v2 = vadd.f32 %v4162_v57, %v4158_v5  ;;  %v4167_v39 = vadd.f32 %v4163_v10, %v4159_v27 }
 0x64e   : > { %v4064_v30 = vsel %vm217_vm0, %v4037_v32, 0.0  ;;  %v4140_v13 = vsel %vm217_vm0, %v4113_v55, 0.0  ;;  %v4057_v19 = vsel %vm217_vm0, %v4036_v44, 0.0  ;;  %v4133_v22 = vsel %vm217_vm0, %v4112_v45, 0.0 }
 0x64f   : > { %v4065_v17 = vadd.f32 %v4064_v30, %v4063_v34  ;;  %v4141_v20 = vadd.f32 %v4140_v13, %v4139_v43  ;;  %v4058_v50 = vadd.f32 %v4057_v19, %v4056_v16  ;;  %v4134_v7 = vadd.f32 %v4133_v22, %v4132_v25  ;;  %v7892_v19 = vld [vmem:[#allocation104_spill] sm:$0xff] }
 0x650   : > { %v4170_v35 = vsel %vm217_vm0, %v4166_v2, 0.0  ;;  %v4171_v26 = vsel %vm217_vm0, %v4167_v39, 0.0 }
 0x651   : > { %v4148_v18 = vadd.f32 %v4144_v51, %v4058_v50  ;;  %v4149_v21 = vadd.f32 %v4145_v31, %v4065_v17  ;;  %v4156_v47 = vadd.f32 %v4152_v0, %v4134_v7  ;;  %v4157_v14 = vadd.f32 %v4153_v1, %v4141_v20  ;;  %v7894_v17 = vld [vmem:[#allocation103_spill] sm:$0xff]  ;;  %v7896_v50 = vld [vmem:[#allocation102_spill] sm:$0xff] }
 0x652   : > { %v4172_v16 = vadd.f32 %v4171_v26, %v4170_v35  ;;  %v7898_v26 = vld [vmem:[#allocation101_spill] sm:$0xff] }
 0x653   : > { %v4160_v46 = vmul.f32 %v7888_v6, %v4148_v18  ;;  %v4161_v58 = vmul.f32 %v7889_v29, %v4149_v21  ;;  %v4164_v59 = vmul.f32 %v7890_v60, %v4156_v47  ;;  %v4165_v56 = vmul.f32 %v7891_v62, %v4157_v14 }
 0x655   : > { %v4168_v34 = vadd.f32 %v4164_v59, %v4160_v46  ;;  %v4169_v43 = vadd.f32 %v4165_v56, %v4161_v58  ;;  %v7900_v46 = vld [vmem:[#allocation100_spill] sm:$0xff]  ;;  %v7902_v58 = vld [vmem:[#allocation99_spill] sm:$0xff]  ;;  %v7904_v56 = vld [vmem:[#allocation98_spill] sm:$0xff] }
 0x657   : > { %v4173_v25 = vsel %vm217_vm0, %v4168_v34, 0.0  ;;  %v4175_v5 = vsel %vm217_vm0, %v4169_v43, 0.0 }
 0x658   : > { %v4174_v54 = vadd.f32 %v4173_v25, %v4172_v16 }
 0x65a   : > { %v4176_v27 = vadd.f32 %v4175_v5, %v4174_v54  ;;  %v7906_v54 = vld [vmem:[#allocation97_spill] sm:$0xff] }
 0x65c   : > { %4177 = vadd.xlane.f32.xlu0 %v4176_v27 }
 0x6e9   : > { %v4178_v57 = vpop.xlane.xlu0 %4177 }
 0x6ea   : > { %v4179_v10 = vrot.slane %v4178_v57, 4 }
 0x6ec   : > { %v4180_v33 = vadd.f32 %v4179_v10, %v4178_v57 }
 0x6ee   : > { %v4181_v38 = vrot.slane %v4180_v33, 2 }
 0x6f0   : > { %v4182_v36 = vadd.f32 %v4181_v38, %v4180_v33 }
 0x6f2   : > { %v4183_v12 = vrot.slane %v4182_v36, 1 }
 0x6f4   : > { %v4184_v51 = vadd.f32 %v4183_v12, %v4182_v36 }
 0x6f6   : > { %5190 = vpush %v4184_v51  ;;  %v7908_v51 = vld [vmem:[#allocation96_spill] sm:$0xff] }
 0x727   : > { %s5191_s11 = spop %5190 }
 0x728   : > { %p4186_p12 = scmp.eq.f32.partialorder %s5191_s11, 0.0 }
 0x72a   : > { %s7934_s11 = smov (%p4186_p12, %s5191_s11), 1.0 }
 0x72b   : > { %v4188_v31 = vstv %s7934_s11 }
 0x72c   : > { %5415 = vrcp.f32 %v4188_v31  ;;  %v7909_v31 = vld [vmem:[#allocation95_spill] sm:$0xff] }
 0x736   : > { %v5416_v32 = vpop.eup %5415 }
 0x737   : > { %5192 = vpush %v5416_v32 }
 0x768   : > { %s5193_s13 = spop %5192 }
 0x769   : > { %s4191_s14 = smul.f32 %s5665_s0, %s5193_s13 }
 0x76b   : > { %s7936_s14 = smov (!%p265_p13, %s4191_s14), 0.0 }
 0x76c   : > { %v4193_v55 = vstv %s7936_s14 }
 0x76d   : > { %v4194_v44 = vmul.f32 %v7871_v42, %v4193_v55  ;;  %v4195_v45 = vmul.f32 %v7869_v61, %v4193_v55  ;;  %v4196_v0 = vmul.f32 %v7888_v6, %v4193_v55  ;;  %v4197_v1 = vmul.f32 %v7889_v29, %v4193_v55 }
 0x76e   : > { %v4202_v2 = vmul.f32 %v7872_v9, %v4193_v55  ;;  %v4203_v39 = vmul.f32 %v7870_v63, %v4193_v55  ;;  %v4204_v30 = vmul.f32 %v7890_v60, %v4193_v55  ;;  %v4205_v13 = vmul.f32 %v7891_v62, %v4193_v55 }
 0x76f   : > { %v7355_v35 = vadd.f32 %v7892_v19, %v4194_v44   ;;  %v7358_v33 = vadd.f32 %v7894_v17, %v4195_v45   ;;  %v7361_v44 = vadd.f32 %v7896_v50, %v4196_v0   ;;  %v7364_v57 = vadd.f32 %v7898_v26, %v4197_v1   ;;  %v7910_v45 = vld [vmem:[#allocation94_spill] sm:$0xff] }
 0x770   : > { %v7367_v36 = vadd.f32 %v7900_v46, %v4202_v2   ;;  %v7370_v58 = vadd.f32 %v7902_v58, %v4203_v39   ;;  %v7373_v34 = vadd.f32 %v7904_v56, %v4204_v30   ;;  %v7376_v32 = vadd.f32 %v7906_v54, %v4205_v13  }
 0x771   : > { %v7893_v22 = vmov %v7355_v35  ;;  %v7895_v20 = vmov %v7358_v33  ;;  %v7897_v7 = vmov %v7361_v44  ;;  %v7899_v59 = vmov %v7364_v57 }
 0x772   : > { %v7901_v43 = vmov %v7367_v36  ;;  %v7903_v16 = vmov %v7370_v58  ;;  %v7905_v25 = vmov %v7373_v34  ;;  %v7907_v5 = vmov %v7376_v32  ;;  %4288 = vst.msk [vmem:[#allocation12] sm:$0xff] (%p7481_p0), %vm217_vm0, %v7893_v22  ;;  %4289 = vst.msk [vmem:[#allocation12 + $0x8] sm:$0xff] (%p7481_p0), %vm217_vm0, %v7895_v20 }
 0x773   : > { %v4210_v35 = vmul.f32 %v4193_v55, %v7295_v15  ;;  %v4211_v27 = vmul.f32 %v4193_v55, %v7289_v24  ;;  %v4212_v10 = vmul.f32 %v4193_v55, %v4148_v18  ;;  %v4213_v33 = vmul.f32 %v4193_v55, %v4149_v21  ;;  %v7911_v15 = vld [vmem:[#allocation93_spill] sm:$0xff]  ;;  %v7912_v24 = vld [vmem:[#allocation92_spill] sm:$0xff]  ;;  %4290 = vst.msk [vmem:[#allocation12 + $0x10] sm:$0xff] (%p7481_p0), %vm217_vm0, %v7897_v7 }
 0x774   : > { %v4218_v57 = vmul.f32 %v4193_v55, %v7298_v37  ;;  %v4219_v38 = vmul.f32 %v4193_v55, %v7292_v8  ;;  %v4220_v36 = vmul.f32 %v4193_v55, %v4156_v47  ;;  %v4221_v12 = vmul.f32 %v4193_v55, %v4157_v14  ;;  %v7913_v37 = vld [vmem:[#allocation91_spill] sm:$0xff]  ;;  %v7914_v8 = vld [vmem:[#allocation90_spill] sm:$0xff]  ;;  %v7915_v18 = vld [vmem:[#allocation89_spill] sm:$0xff]  ;;  %4291 = vst.msk [vmem:[#allocation12 + $0x18] sm:$0xff] (%p7481_p0), %vm217_vm0, %v7899_v59 }
 0x775   : > { %v7383_v34 = vsub.f32 %v7908_v51, %v4210_v35   ;;  %v7386_v44 = vsub.f32 %v7909_v31, %v4211_v27   ;;  %v7389_v32 = vsub.f32 %v7910_v45, %v4212_v10   ;;  %v7392_v0 = vsub.f32 %v7911_v15, %v4213_v33   ;;  %4293 = vst.msk [vmem:[#allocation12 + $0x20] sm:$0xff] (%p7481_p0), %vm217_vm0, %v7901_v43 }
 0x776   : > { %v7395_v56 = vsub.f32 %v7912_v24, %v4218_v57   ;;  %v7398_v39 = vsub.f32 %v7913_v37, %v4219_v38   ;;  %v7401_v38 = vsub.f32 %v7914_v8, %v4220_v36   ;;  %v7404_v37 = vsub.f32 %v7915_v18, %v4221_v12   ;;  %4294 = vst.msk [vmem:[#allocation12 + $0x28] sm:$0xff] (%p7481_p0), %vm217_vm0, %v7903_v16 }
 0x777   : > { %v4226_v21 = vmul.f32 %v7383_v34, %v7383_v34  ;;  %v4227_v47 = vmul.f32 %v7386_v44, %v7386_v44  ;;  %v4228_v14 = vmul.f32 %v7389_v32, %v7389_v32  ;;  %v4229_v55 = vmul.f32 %v7392_v0, %v7392_v0  ;;  %4295 = vst.msk [vmem:[#allocation12 + $0x30] sm:$0xff] (%p7481_p0), %vm217_vm0, %v7905_v25 }
 0x778   : > { %v4230_v1 = vmul.f32 %v7395_v56, %v7395_v56  ;;  %v4231_v2 = vmul.f32 %v7398_v39, %v7398_v39  ;;  %v4232_v30 = vmul.f32 %v7401_v38, %v7401_v38  ;;  %v4233_v13 = vmul.f32 %v7404_v37, %v7404_v37  ;;  %4296 = vst.msk [vmem:[#allocation12 + $0x38] sm:$0xff] (%p7481_p0), %vm217_vm0, %v7907_v5 }
 0x779   : > { %v4254_v57 = vstv %s5665_s0  ;;  %v4269_v18 = vstv %s4268_s15 }
 0x77a   : > { %v4234_v19 = vadd.f32 %v4230_v1, %v4226_v21  ;;  %v4235_v17 = vadd.f32 %v4231_v2, %v4227_v47  ;;  %v4236_v50 = vadd.f32 %v4232_v30, %v4228_v14  ;;  %v4237_v26 = vadd.f32 %v4233_v13, %v4229_v55 }
 0x77b   : > { %5417 = vrcp.f32 %v4254_v57  ;;  %vm7436_vm1 = vcmp.eq.s32.totalorder %v4269_v18, 1 }
 0x77c   : > { %v4238_v46 = vsel %vm217_vm0, %v4234_v19, 0.0  ;;  %v4239_v58 = vsel %vm217_vm0, %v4235_v17, 0.0  ;;  %v4241_v35 = vsel %vm217_vm0, %v4236_v50, 0.0  ;;  %v4243_v10 = vsel %vm217_vm0, %v4237_v26, 0.0 }
 0x77d   : > { %v4240_v54 = vadd.f32 %v4239_v58, %v4238_v46 }
 0x77f   : > { %v4242_v27 = vadd.f32 %v4241_v35, %v4240_v54 }
 0x781   : > { %v4244_v33 = vadd.f32 %v4243_v10, %v4242_v27 }
 0x783   : > { %4245 = vadd.xlane.f32.xlu1 %v4244_v33 }
 0x785   : > { %v5418_v24 = vpop.eup %5417 }
 0x810   : > { %v4246_v36 = vpop.xlane.xlu1 %4245 }
 0x811   : > { %v4247_v12 = vrot.slane %v4246_v36, 4 }
 0x813   : > { %v4248_v51 = vadd.f32 %v4247_v12, %v4246_v36  ;;  %v7928_v36 = vmov %v7901_v43 }
 0x815   : > { %v4249_v31 = vrot.slane %v4248_v51, 2 }
 0x817   : > { %v4250_v45 = vadd.f32 %v4249_v31, %v4248_v51 }
 0x819   : > { %v4251_v15 = vrot.slane %v4250_v45, 1 }
 0x81b   : > { %v4252_v8 = vadd.f32 %v4251_v15, %v4250_v45 }
 0x81d   : > { %5194 = vpush %v4252_v8 }
 0x81e   : > { %5196 = vpush %v5418_v24 }
 0x84e   : > { %s5195_s16 = spop %5194 }
 0x84f   : > { %s7432_s19 = scalar_select %p265_p13, %s5195_s16, %s5665_s0  }
 0x850   : > { %s5197_s20 = spop %5196 }
 0x851   : > { %s4257_s21 = smul.f32 %s5197_s20, %s5195_s16  ;;  %s7919_s0 = smov %s7432_s19 }
 0x853   : > { %s7938_s21 = smov (!%p265_p13, %s4257_s21), 0.0 }
 0x854   : > { %v4259_v47 = vstv %s7938_s21 }
 0x855   : > { %v4260_v14 = vmul.f32 %v7871_v42, %v4259_v47  ;;  %v4261_v55 = vmul.f32 %v7869_v61, %v4259_v47  ;;  %v4262_v1 = vmul.f32 %v7888_v6, %v4259_v47  ;;  %v4263_v2 = vmul.f32 %v7889_v29, %v4259_v47 }
 0x856   : > { %v4275_v30 = vmul.f32 %v7872_v9, %v4259_v47  ;;  %v4276_v13 = vmul.f32 %v7870_v63, %v4259_v47  ;;  %v4277_v19 = vmul.f32 %v7890_v60, %v4259_v47  ;;  %v4278_v17 = vmul.f32 %v7891_v62, %v4259_v47 }
 0x857   : > { %v4264_v50 = vadd.f32 %v4260_v14, %v7383_v34  ;;  %v4265_v26 = vadd.f32 %v4261_v55, %v7386_v44  ;;  %v4266_v46 = vadd.f32 %v4262_v1, %v7389_v32  ;;  %v4267_v58 = vadd.f32 %v4263_v2, %v7392_v0  ;;  %238 = sbr.rel (!%p7481_p0) target bundleno = 345 (0x159), region = 88 }
 0x858   : > { %v4279_v54 = vadd.f32 %v4275_v30, %v7395_v56  ;;  %v4280_v35 = vadd.f32 %v4276_v13, %v7398_v39  ;;  %v4281_v27 = vadd.f32 %v4277_v19, %v7401_v38  ;;  %v4282_v10 = vadd.f32 %v4278_v17, %v7404_v37 }
 0x859   : > { %v4271_v47 = vsel %vm7436_vm1, %v4264_v50, %v7871_v42   ;;  %v4272_v33 = vsel %vm7436_vm1, %v4265_v26, %v7869_v61   ;;  %v4273_v46 = vsel %vm7436_vm1, %v4266_v46, %v7888_v6   ;;  %v4274_v45 = vsel %vm7436_vm1, %v4267_v58, %v7889_v29  }
 0x85a   : > { %v4283_v57 = vsel %vm7436_vm1, %v4279_v54, %v7872_v9   ;;  %v4284_v14 = vsel %vm7436_vm1, %v4280_v35, %v7870_v63   ;;  %v4285_v31 = vsel %vm7436_vm1, %v4281_v27, %v7890_v60   ;;  %v4286_v30 = vsel %vm7436_vm1, %v4282_v10, %v7891_v62  }
 0x85b   : > { %v7920_v63 = vmov %v4283_v57  ;;  %v7921_v29 = vmov %v4272_v33  ;;  %v7922_v60 = vmov %v7392_v0  ;;  %v7923_v61 = vmov %v7389_v32 }
 0x85c   : > { %v7924_v62 = vmov %v7386_v44  ;;  %v7925_v32 = vmov %v7907_v5  ;;  %v7926_v55 = vmov %v7905_v25  ;;  %v7927_v58 = vmov %v7903_v16 }
 0x85d   : > { %v7929_v57 = vmov %v7899_v59  ;;  %v7930_v44 = vmov %v7897_v7  ;;  %v7931_v33 = vmov %v7895_v20  ;;  %v7932_v35 = vmov %v7893_v22 }
 0x85e   :  { %5540 = shalt.err (!%p5537_p5)
}
 0x85f   :  { %s5541_s24 = scalar_lea.hbm %s7595_s8, 1024 }
 0x860   :  { %p5542_p6 = scmp.ne.s32.totalorder %s7595_s8, %s5541_s24  ;;  %p5545_p7 = scmp.lt.u32.totalorder %s5541_s24, %s7595_s8 }
 0x862   :  { %p5547_p8 = pnand %p5545_p7, %p5542_p6 }
 0x864   :  { %5550 = shalt.err (!%p5547_p8)
}
 0x865   :  { %4308 = dma.vmem_to_hbm [thread:$0]  %s4303_s12, 1024, %s7595_s8, [#allocation5], %s5769_s17, %s5769_s17, %s5770_s18  }
 0x866   :  { %5661 = dma.done.wait [#allocation5], 1024  }
 0x867   :  { %5662 = vsyncadd [#allocation5], 4294966272 }
 0x868   :  { %4312 = vsyncpa [#allocation4], 1 }
 0x869   :  { %4313 = vsyncpa [#allocation7], 1 }
 0x86a   :  { %4314 = vsyncpa [#allocation10], 1 }
 0x86b   :  { %4315 = vsyncpa [#allocation5], 1 }

</bundles_post_ra>
